<compile_context>
chip_gen: v6e
topology: v6e:2x2x1
jax: 0.10.0
libtpu: 0.0.40
codegen_flags: <defaults>
</compile_context>

<pallas_src>
from functools import partial

import jax
import jax.numpy as jnp
from jax.experimental import pallas as pl
from jax.experimental.pallas import tpu as pltpu


def _mdnrnn_kernel(prev_ref, patch_ref,
                   wp_ref, bp_ref,
                   wc_ref, bc_ref, we_ref, be_ref,
                   wih_ref, whh_ref, bl_ref,
                   wh_ref, bh_ref,
                   h0_ref, c0_ref,
                   packed_ref, h_out_ref, c_out_ref,
                   gx_scr, hseq_scr,
                   *, B, Bp, Tp, Ta, HW, G, Z):
    """Whole MDNRNN forward for one (small) batch, fully VMEM resident."""
    f32 = jnp.float32
    bf16 = jnp.bfloat16
    Hh = whh_ref.shape[0]
    T = Tp + Ta
    HEAD = 2 * G + G * Z

    def bdot(a, b):
        # Explicit bf16 MXU feed, f32 accumulation, for every matmul (recurrence
        # included — default TPU dot precision truncates f32 operands to bf16
        # anyway, so this is the honest statement of the precision in use).
        return jnp.dot(a.astype(bf16), b.astype(bf16), preferred_element_type=f32)

    # ---- prev_steps_fc branch: batched over Tp*B rows, projected through
    #      W_ih and stored straight into the padded-batch gate scratch --------
    x_prev = bdot(prev_ref[...], wp_ref[...]) + bp_ref[...]               # (Tp*B, D)
    g_prev = bdot(x_prev, wih_ref[...]) + bl_ref[...]                     # (Tp*B, 4H)
    gx_scr[pl.ds(0, Tp), pl.ds(0, B), :] = g_prev.reshape(Tp, B, 4 * Hh)

    # ---- audio encoder branch: conv3x3 (im2col matmul) -> ReLU ->
    #      mean pool as an MXU matmul (1/HW folded into `we` by the wrapper) ->
    #      Linear(K -> D) -> W_ih projection, batched over Ta*B frames --------
    conv = jnp.maximum(bdot(patch_ref[...], wc_ref[...]) + bc_ref[...], 0.0)  # (Ta*B*HW, K)
    n_f = Ta * B
    n_r = n_f * HW
    col = jax.lax.broadcasted_iota(jnp.int32, (n_f, n_r), 1)
    row = jax.lax.broadcasted_iota(jnp.int32, (n_f, n_r), 0)
    lo = row * HW
    pool = jnp.where((col >= lo) & (col < lo + HW), 1.0, 0.0)             # (Ta*B, Ta*B*HW)
    pooled = bdot(pool, conv)                                             # (Ta*B, K) sum-pool
    x_audio = bdot(pooled, we_ref[...]) + be_ref[...]                     # (Ta*B, D)
    g_aud = bdot(x_audio, wih_ref[...]) + bl_ref[...]                     # (Ta*B, 4H)
    gx_scr[pl.ds(Tp, Ta), pl.ds(0, B), :] = g_aud.reshape(Ta, B, 4 * Hh)

    if Bp > B:  # padded batch rows must hold defined data for the recurrence
        gx_scr[:, pl.ds(B, Bp - B), :] = jnp.zeros((T, Bp - B, 4 * Hh), f32)

    # ---- serial recurrence: only (Bp,H)@(H,4H) stays on the critical path.
    #      Per-step accesses are full-tile ref[t] reads/writes; the loop is
    #      fully unrolled so the scheduler can overlap adjacent steps. --------
    whh_bf = whh_ref[...].astype(bf16)

    def step(t, carry):
        h, c = carry                                                      # (Bp, Hh) f32
        gates = gx_scr[t] + jnp.dot(h.astype(bf16), whh_bf,
                                    preferred_element_type=f32)           # (Bp, 4H)
        i_g = jax.nn.sigmoid(gates[:, 0 * Hh:1 * Hh])                     # PyTorch gate
        f_g = jax.nn.sigmoid(gates[:, 1 * Hh:2 * Hh])                     # order i,f,g,o
        g_g = jnp.tanh(gates[:, 2 * Hh:3 * Hh])
        o_g = jax.nn.sigmoid(gates[:, 3 * Hh:4 * Hh])
        c = f_g * c + i_g * g_g
        h = o_g * jnp.tanh(c)
        hseq_scr[t] = h
        return h, c

    h_fin, c_fin = jax.lax.fori_loop(0, T, step, (h0_ref[...], c0_ref[...]),
                                     unroll=True)
    h_out_ref[...] = h_fin
    c_out_ref[...] = c_fin

    # ---- MDN heads: ONE fused 128-lane matmul [fc1|fc2|fc3|pad], lane-masked
    #      softmax / ELU, single lane-dense store into packed_ref -------------
    h_all = hseq_scr[...].reshape(T * Bp, Hh)
    raw = bdot(h_all, wh_ref[...]) + bh_ref[...]                          # (T*Bp, PACK)

    lane = jax.lax.broadcasted_iota(jnp.int32, raw.shape, 1)
    is_pi = lane < G
    is_sg = (lane >= G + G * Z) & (lane < HEAD)
    is_valid = lane < HEAD

    # pi: clamp happens BEFORE softmax, exactly as in the reference module.
    logit = jnp.clip(raw, 1e-8, 1.0)
    m = jnp.max(jnp.where(is_pi, logit, 0.0), axis=-1, keepdims=True)
    e = jnp.where(is_pi, jnp.exp(logit - m), 0.0)
    inv = pl.reciprocal(jnp.sum(e, axis=-1, keepdims=True), approx=True)
    pi_v = e * inv

    # sigma: elu(x) + 1 + 1e-8
    sg_v = jnp.where(raw > 0.0, raw, jnp.exp(jnp.minimum(raw, 0.0)) - 1.0) + (1.0 + 1e-8)

    out = jnp.where(is_pi, pi_v, jnp.where(is_sg, sg_v, raw))             # mu passes through
    packed_ref[...] = jnp.where(is_valid, out, 0.0)


def make_params(key, *, dim, z_size, n_hidden, n_gaussians, conv_ch, in_ch):
    """Deterministic synthetic parameters (shapes implied by MDNRNN.__init__)."""
    ks = jax.random.split(key, 16)

    def u(k, shape, fan):
        return jax.random.uniform(k, shape, jnp.float32, -1.0, 1.0) / jnp.sqrt(float(fan))

    P = in_ch * 9  # 3x3 patch
    # PyTorch LSTM has two bias vectors (b_ih, b_hh); fold their SUM into bl.
    b_ih = u(ks[8], (1, 4 * n_hidden), n_hidden)
    b_hh = u(ks[15], (1, 4 * n_hidden), n_hidden)
    return dict(
        wp=u(ks[0], (z_size, dim), z_size),              # prev_steps_fc
        bp=u(ks[1], (1, dim), z_size),
        wc=u(ks[2], (P, conv_ch), P),                    # audiofeat conv3x3 (c,dy,dx flat)
        bc=u(ks[3], (1, conv_ch), P),
        we=u(ks[4], (conv_ch, dim), conv_ch),            # audiofeat linear
        be=u(ks[5], (1, dim), conv_ch),
        wih=u(ks[6], (dim, 4 * n_hidden), n_hidden),     # LSTM (gate order i,f,g,o)
        whh=u(ks[7], (n_hidden, 4 * n_hidden), n_hidden),
        bl=b_ih + b_hh,
        w1=u(ks[9], (n_hidden, n_gaussians), n_hidden),               # fc1 (pi)
        b1=u(ks[10], (1, n_gaussians), n_hidden),
        w2=u(ks[11], (n_hidden, n_gaussians * z_size), n_hidden),     # fc2 (mu)
        b2=u(ks[12], (1, n_gaussians * z_size), n_hidden),
        w3=u(ks[13], (n_hidden, n_gaussians), n_hidden),              # fc3 (sigma)
        b3=u(ks[14], (1, n_gaussians), n_hidden),
    )


@jax.jit
def mdnrnn_forward(params, audio_inputs, prev_steps, h0, c0):
    """audio_inputs: (B, Ta, C, H, W) NCHW frames, prev_steps: (B, Tp, z_size),
    h0/c0: (1, B, n_hidden).  Returns ((pi, mu, sigma), (h, c)) like the module."""
    B, Ta, C, Hi, Wi = audio_inputs.shape
    Tp, Z = prev_steps.shape[1], prev_steps.shape[2]
    Hh = params["whh"].shape[0]
    G = params["w1"].shape[1]
    D = params["wp"].shape[1]
    K = params["wc"].shape[1]
    T = Tp + Ta
    HW = Hi * Wi
    Bp = 8 * pl.cdiv(B, 8)                 # pad batch to full sublane tiles
    HEAD = 2 * G + G * Z
    PACK = 128 * pl.cdiv(HEAD, 128)        # lane-dense packed head output width

    # --- glue: im2col for the 3x3 SAME conv, time-major, shipped as bf16 -----
    # TODO(synk): move this 9x im2col on-chip at production scale (HBM traffic).
    imgs = audio_inputs.reshape(B * Ta, C, Hi, Wi).astype(jnp.float32)
    padded = jnp.pad(imgs, ((0, 0), (0, 0), (1, 1), (1, 1)))
    shifts = [padded[:, :, dy:dy + Hi, dx:dx + Wi] for dy in range(3) for dx in range(3)]
    patches = jnp.stack(shifts, axis=-1)                           # (B*Ta, C, H, W, 9)
    patches = patches.transpose(0, 2, 3, 1, 4).reshape(B, Ta, HW, C * 9)
    patches = patches.transpose(1, 0, 2, 3).reshape(Ta * B * HW, C * 9)
    patches = patches.astype(jnp.bfloat16)                         # halve DMA bytes

    prev_tm = prev_steps.transpose(1, 0, 2).reshape(Tp * B, Z).astype(jnp.bfloat16)

    # fused MDN head weights: [fc1 | fc2 | fc3 | zero pad to 128 lanes]
    wheads = jnp.pad(jnp.concatenate([params["w1"], params["w2"], params["w3"]], axis=1),
                     ((0, 0), (0, PACK - HEAD)))
    bheads = jnp.pad(jnp.concatenate([params["b1"], params["b2"], params["b3"]], axis=1),
                     ((0, 0), (0, PACK - HEAD)))
    we_scaled = params["we"] * (1.0 / HW)   # fold mean-pool scale into the linear

    h0p = jnp.pad(h0[0].astype(jnp.float32), ((0, Bp - B), (0, 0)))
    c0p = jnp.pad(c0[0].astype(jnp.float32), ((0, Bp - B), (0, 0)))

    args = (prev_tm, patches,
            params["wp"], params["bp"],
            params["wc"], params["bc"], we_scaled, params["be"],
            params["wih"], params["whh"], params["bl"],
            wheads, bheads, h0p, c0p)

    vmem = pl.BlockSpec(memory_space=pltpu.MemorySpace.VMEM)
    out_shape = (
        jax.ShapeDtypeStruct((T * Bp, PACK), jnp.float32),   # packed [pi|mu|sigma|pad]
        jax.ShapeDtypeStruct((Bp, Hh), jnp.float32),         # h_n (batch-padded)
        jax.ShapeDtypeStruct((Bp, Hh), jnp.float32),         # c_n (batch-padded)
    )
    scratch = [pltpu.VMEM((T, Bp, 4 * Hh), jnp.float32),     # gates_x = x @ W_ih + b
               pltpu.VMEM((T, Bp, Hh), jnp.float32)]         # h_t sequence

    # VMEM budget + advisory cost estimate (review items).
    in_bytes = sum(int(a.size) * a.dtype.itemsize for a in args)
    out_bytes = (T * Bp * PACK + 2 * Bp * Hh) * 4
    scratch_bytes = (T * Bp * 4 * Hh + T * Bp * Hh) * 4
    vmem_limit = int(min(48 * 1024 * 1024,
                         max(16 * 1024 * 1024,
                             2 * (in_bytes + out_bytes + scratch_bytes))))
    flops = 2 * (Tp * B * Z * D
                 + Ta * B * HW * (C * 9) * K
                 + (Ta * B) * (Ta * B * HW) * K
                 + Ta * B * K * D
                 + T * B * D * 4 * Hh
                 + T * Bp * Hh * 4 * Hh
                 + T * Bp * Hh * PACK)
    transcendentals = T * Bp * (4 * Hh + Hh) + 2 * T * Bp * PACK

    packed, h_n, c_n = pl.pallas_call(
        partial(_mdnrnn_kernel, B=B, Bp=Bp, Tp=Tp, Ta=Ta, HW=HW, G=G, Z=Z),
        out_shape=out_shape,
        in_specs=[vmem] * len(args),
        out_specs=(vmem, vmem, vmem),
        scratch_shapes=scratch,
        compiler_params=pltpu.CompilerParams(vmem_limit_bytes=vmem_limit),
        cost_estimate=pl.CostEstimate(flops=int(flops),
                                      transcendentals=int(transcendentals),
                                      bytes_accessed=int(in_bytes + out_bytes)),
    )(*args)

    # --- unpack heads, drop batch padding, back to PyTorch batch-first -------
    packed = packed.reshape(T, Bp, PACK)[:, :B]                           # (T, B, PACK)
    pi = packed[..., :G].transpose(1, 0, 2)                               # (B, T, G)
    mu = packed[..., G:G + G * Z].transpose(1, 0, 2).reshape(B, T, Z, G)  # .view(-1,T,Z,G)
    sigma = packed[..., G + G * Z:HEAD].transpose(1, 0, 2)                # (B, T, G)
    return (pi, mu, sigma), (h_n[:B][None], c_n[:B][None])                # (1, B, H) states


if __name__ == "__main__":
    # Small shapes consistent with the module's forward.
    B, Tp, Ta = 2, 4, 4
    C, Hi, Wi = 4, 16, 16             # audio "frame" NCHW
    Z, D, Hh, G, K = 6, 16, 32, 5, 8  # z_size, dim, n_hidden, n_gaussians, conv channels

    key = jax.random.PRNGKey(0)
    k_params, k_audio, k_prev = jax.random.split(key, 3)

    params = make_params(k_params, dim=D, z_size=Z, n_hidden=Hh,
                         n_gaussians=G, conv_ch=K, in_ch=C)
    audio_inputs = jax.random.normal(k_audio, (B, Ta, C, Hi, Wi), jnp.float32)
    prev_steps = jax.random.normal(k_prev, (B, Tp, Z), jnp.float32)
    h0 = jnp.zeros((1, B, Hh), jnp.float32)   # MDNRNN.init_hidden
    c0 = jnp.zeros((1, B, Hh), jnp.float32)

    (pi, mu, sigma), (h_n, c_n) = mdnrnn_forward(params, audio_inputs, prev_steps, h0, c0)
    jax.block_until_ready((pi, mu, sigma, h_n, c_n))

    T = Tp + Ta
    assert pi.shape == (B, T, G)
    assert mu.shape == (B, T, Z, G)
    assert sigma.shape == (B, T, G)
    assert h_n.shape == (1, B, Hh) and c_n.shape == (1, B, Hh)
    # tolerance covers the EUP approximate-reciprocal softmax normalization
    assert bool(jnp.all(jnp.abs(jnp.sum(pi, axis=-1) - 1.0) < 5e-3))
    assert bool(jnp.all(sigma > 0.0))                                   # elu(x)+1+eps > 0
    assert bool(jnp.all(jnp.isfinite(mu))) and bool(jnp.all(jnp.isfinite(h_n)))
    assert bool(jnp.all(jnp.isfinite(c_n))) and bool(jnp.all(jnp.isfinite(pi)))

    print("KERNEL_OK")
</pallas_src>

<mosaic_0001>
module attributes {stable_mosaic.version = 11 : i64} {
  func.func @_mdnrnn_kernel(%arg0: memref<8x6xbf16, #tpu.memory_space<vmem>>, %arg1: memref<2048x36xbf16, #tpu.memory_space<vmem>>, %arg2: memref<6x16xf32, #tpu.memory_space<vmem>>, %arg3: memref<1x16xf32, #tpu.memory_space<vmem>>, %arg4: memref<36x8xf32, #tpu.memory_space<vmem>>, %arg5: memref<1x8xf32, #tpu.memory_space<vmem>>, %arg6: memref<8x16xf32, #tpu.memory_space<vmem>>, %arg7: memref<1x16xf32, #tpu.memory_space<vmem>>, %arg8: memref<16x128xf32, #tpu.memory_space<vmem>>, %arg9: memref<32x128xf32, #tpu.memory_space<vmem>>, %arg10: memref<1x128xf32, #tpu.memory_space<vmem>>, %arg11: memref<32x128xf32, #tpu.memory_space<vmem>>, %arg12: memref<1x128xf32, #tpu.memory_space<vmem>>, %arg13: memref<8x32xf32, #tpu.memory_space<vmem>>, %arg14: memref<8x32xf32, #tpu.memory_space<vmem>>, %arg15: memref<64x128xf32, #tpu.memory_space<vmem>>, %arg16: memref<8x32xf32, #tpu.memory_space<vmem>>, %arg17: memref<8x32xf32, #tpu.memory_space<vmem>>, %arg18: memref<8x8x128xf32, #tpu.memory_space<vmem>>, %arg19: memref<8x8x32xf32, #tpu.memory_space<vmem>>) attributes {dimension_semantics = [], scalar_prefetch = 0 : i64, scratch_operands = 2 : i64, tpu.core_type = #tpu.core_type<tc>} {
    %c0 = arith.constant 0 : index
    %c0_0 = arith.constant 0 : index
    %0 = vector.load %arg0[%c0, %c0_0] : memref<8x6xbf16, #tpu.memory_space<vmem>>, vector<8x6xbf16>
    %c0_1 = arith.constant 0 : index
    %c0_2 = arith.constant 0 : index
    %1 = vector.load %arg2[%c0_1, %c0_2] : memref<6x16xf32, #tpu.memory_space<vmem>>, vector<6x16xf32>
    %2 = arith.truncf %1 : vector<6x16xf32> to vector<6x16xbf16>
    %cst = arith.constant dense<0.000000e+00> : vector<8x16xf32>
    %3 = tpu.matmul %0, %2, %cst {dimension_numbers = #tpu.dot_dimension_numbers<[1], [0], [0], [1], [0, 0, 1, 1], [], []>} : vector<8x6xbf16>, vector<6x16xbf16>, vector<8x16xf32> -> vector<8x16xf32>
    %c0_3 = arith.constant 0 : index
    %c0_4 = arith.constant 0 : index
    %4 = vector.load %arg3[%c0_3, %c0_4] : memref<1x16xf32, #tpu.memory_space<vmem>>, vector<1x16xf32>
    %5 = vector.broadcast %4 : vector<1x16xf32> to vector<8x16xf32>
    %6 = arith.addf %3, %5 : vector<8x16xf32>
    %c0_5 = arith.constant 0 : index
    %c0_6 = arith.constant 0 : index
    %7 = vector.load %arg8[%c0_5, %c0_6] : memref<16x128xf32, #tpu.memory_space<vmem>>, vector<16x128xf32>
    %8 = arith.truncf %6 : vector<8x16xf32> to vector<8x16xbf16>
    %9 = arith.truncf %7 : vector<16x128xf32> to vector<16x128xbf16>
    %cst_7 = arith.constant dense<0.000000e+00> : vector<8x128xf32>
    %10 = tpu.matmul %8, %9, %cst_7 {dimension_numbers = #tpu.dot_dimension_numbers<[1], [0], [0], [1], [0, 0, 1, 1], [], []>} : vector<8x16xbf16>, vector<16x128xbf16>, vector<8x128xf32> -> vector<8x128xf32>
    %c0_8 = arith.constant 0 : index
    %c0_9 = arith.constant 0 : index
    %11 = vector.load %arg10[%c0_8, %c0_9] : memref<1x128xf32, #tpu.memory_space<vmem>>, vector<1x128xf32>
    %12 = vector.broadcast %11 : vector<1x128xf32> to vector<8x128xf32>
    %13 = arith.addf %10, %12 : vector<8x128xf32>
    %14 = vector.shape_cast %13 : vector<8x128xf32> to vector<4x2x128xf32>
    %c0_10 = arith.constant 0 : index
    %c0_11 = arith.constant 0 : index
    %c0_12 = arith.constant 0 : index
    %15 = vector.load %arg18[%c0_10, %c0_11, %c0_12] : memref<8x8x128xf32, #tpu.memory_space<vmem>>, vector<4x2x128xf32>
    tpu.vector_store %arg18[%c0_10, %c0_11, %c0_12], %14 {strides = array<i32>} : memref<8x8x128xf32, #tpu.memory_space<vmem>>, vector<4x2x128xf32>,
    %c0_13 = arith.constant 0 : index
    %c0_14 = arith.constant 0 : index
    %16 = vector.load %arg1[%c0_13, %c0_14] : memref<2048x36xbf16, #tpu.memory_space<vmem>>, vector<2048x36xbf16>
    %c0_15 = arith.constant 0 : index
    %c0_16 = arith.constant 0 : index
    %17 = vector.load %arg4[%c0_15, %c0_16] : memref<36x8xf32, #tpu.memory_space<vmem>>, vector<36x8xf32>
    %18 = arith.truncf %17 : vector<36x8xf32> to vector<36x8xbf16>
    %cst_17 = arith.constant dense<0.000000e+00> : vector<2048x8xf32>
    %19 = tpu.matmul %16, %18, %cst_17 {dimension_numbers = #tpu.dot_dimension_numbers<[1], [0], [0], [1], [0, 0, 1, 1], [], []>} : vector<2048x36xbf16>, vector<36x8xbf16>, vector<2048x8xf32> -> vector<2048x8xf32>
    %c0_18 = arith.constant 0 : index
    %c0_19 = arith.constant 0 : index
    %20 = vector.load %arg5[%c0_18, %c0_19] : memref<1x8xf32, #tpu.memory_space<vmem>>, vector<1x8xf32>
    %21 = vector.broadcast %20 : vector<1x8xf32> to vector<2048x8xf32>
    %22 = arith.addf %19, %21 : vector<2048x8xf32>
    %cst_20 = arith.constant 0.000000e+00 : f32
    %23 = vector.broadcast %cst_20 : f32 to vector<2048x8xf32>
    %24 = arith.maximumf %22, %23 : vector<2048x8xf32>
    %25 = tpu.iota {dimensions = array<i32: 1>} : vector<8x2048xi32>
    %26 = tpu.iota {dimensions = array<i32: 0>} : vector<8x2048xi32>
    %c256_i32 = arith.constant 256 : i32
    %27 = vector.broadcast %c256_i32 : i32 to vector<8x2048xi32>
    %28 = arith.muli %26, %27 : vector<8x2048xi32>
    %29 = arith.cmpi sge, %25, %28 : vector<8x2048xi32>
    %c256_i32_21 = arith.constant 256 : i32
    %30 = vector.broadcast %c256_i32_21 : i32 to vector<8x2048xi32>
    %31 = arith.addi %28, %30 : vector<8x2048xi32>
    %32 = arith.cmpi slt, %25, %31 : vector<8x2048xi32>
    %33 = arith.andi %29, %32 : vector<8x2048xi1>
    %cst_22 = arith.constant 1.000000e+00 : f32
    %cst_23 = arith.constant 0.000000e+00 : f32
    %34 = vector.broadcast %cst_22 : f32 to vector<8x2048xf32>
    %35 = vector.broadcast %cst_23 : f32 to vector<8x2048xf32>
    %36 = arith.select %33, %34, %35 : vector<8x2048xi1>, vector<8x2048xf32>
    %37 = arith.truncf %36 : vector<8x2048xf32> to vector<8x2048xbf16>
    %38 = arith.truncf %24 : vector<2048x8xf32> to vector<2048x8xbf16>
    %cst_24 = arith.constant dense<0.000000e+00> : vector<8x8xf32>
    %39 = tpu.matmul %37, %38, %cst_24 {dimension_numbers = #tpu.dot_dimension_numbers<[1], [0], [0], [1], [0, 0, 1, 1], [], []>} : vector<8x2048xbf16>, vector<2048x8xbf16>, vector<8x8xf32> -> vector<8x8xf32>
    %c0_25 = arith.constant 0 : index
    %c0_26 = arith.constant 0 : index
    %40 = vector.load %arg6[%c0_25, %c0_26] : memref<8x16xf32, #tpu.memory_space<vmem>>, vector<8x16xf32>
    %41 = arith.truncf %39 : vector<8x8xf32> to vector<8x8xbf16>
    %42 = arith.truncf %40 : vector<8x16xf32> to vector<8x16xbf16>
    %cst_27 = arith.constant dense<0.000000e+00> : vector<8x16xf32>
    %43 = tpu.matmul %41, %42, %cst_27 {dimension_numbers = #tpu.dot_dimension_numbers<[1], [0], [0], [1], [0, 0, 1, 1], [], []>} : vector<8x8xbf16>, vector<8x16xbf16>, vector<8x16xf32> -> vector<8x16xf32>
    %c0_28 = arith.constant 0 : index
    %c0_29 = arith.constant 0 : index
    %44 = vector.load %arg7[%c0_28, %c0_29] : memref<1x16xf32, #tpu.memory_space<vmem>>, vector<1x16xf32>
    %45 = vector.broadcast %44 : vector<1x16xf32> to vector<8x16xf32>
    %46 = arith.addf %43, %45 : vector<8x16xf32>
    %c0_30 = arith.constant 0 : index
    %c0_31 = arith.constant 0 : index
    %47 = vector.load %arg8[%c0_30, %c0_31] : memref<16x128xf32, #tpu.memory_space<vmem>>, vector<16x128xf32>
    %48 = arith.truncf %46 : vector<8x16xf32> to vector<8x16xbf16>
    %49 = arith.truncf %47 : vector<16x128xf32> to vector<16x128xbf16>
    %cst_32 = arith.constant dense<0.000000e+00> : vector<8x128xf32>
    %50 = tpu.matmul %48, %49, %cst_32 {dimension_numbers = #tpu.dot_dimension_numbers<[1], [0], [0], [1], [0, 0, 1, 1], [], []>} : vector<8x16xbf16>, vector<16x128xbf16>, vector<8x128xf32> -> vector<8x128xf32>
    %c0_33 = arith.constant 0 : index
    %c0_34 = arith.constant 0 : index
    %51 = vector.load %arg10[%c0_33, %c0_34] : memref<1x128xf32, #tpu.memory_space<vmem>>, vector<1x128xf32>
    %52 = vector.broadcast %51 : vector<1x128xf32> to vector<8x128xf32>
    %53 = arith.addf %50, %52 : vector<8x128xf32>
    %54 = vector.shape_cast %53 : vector<8x128xf32> to vector<4x2x128xf32>
    %c4 = arith.constant 4 : index
    %c0_35 = arith.constant 0 : index
    %c0_36 = arith.constant 0 : index
    %55 = vector.load %arg18[%c4, %c0_35, %c0_36] : memref<8x8x128xf32, #tpu.memory_space<vmem>>, vector<4x2x128xf32>
    tpu.vector_store %arg18[%c4, %c0_35, %c0_36], %54 {strides = array<i32>} : memref<8x8x128xf32, #tpu.memory_space<vmem>>, vector<4x2x128xf32>,
    %cst_37 = arith.constant 0.000000e+00 : f32
    %56 = vector.broadcast %cst_37 : f32 to vector<8x6x128xf32>
    %c0_38 = arith.constant 0 : index
    %c2 = arith.constant 2 : index
    %c0_39 = arith.constant 0 : index
    %57 = vector.load %arg18[%c0_38, %c2, %c0_39] : memref<8x8x128xf32, #tpu.memory_space<vmem>>, vector<8x6x128xf32>
    tpu.vector_store %arg18[%c0_38, %c2, %c0_39], %56 {strides = array<i32>} : memref<8x8x128xf32, #tpu.memory_space<vmem>>, vector<8x6x128xf32>,
    %c0_40 = arith.constant 0 : index
    %c0_41 = arith.constant 0 : index
    %58 = vector.load %arg9[%c0_40, %c0_41] : memref<32x128xf32, #tpu.memory_space<vmem>>, vector<32x128xf32>
    %59 = arith.truncf %58 : vector<32x128xf32> to vector<32x128xbf16>
    %c0_42 = arith.constant 0 : index
    %c0_43 = arith.constant 0 : index
    %60 = vector.load %arg13[%c0_42, %c0_43] : memref<8x32xf32, #tpu.memory_space<vmem>>, vector<8x32xf32>
    %c0_44 = arith.constant 0 : index
    %c0_45 = arith.constant 0 : index
    %61 = vector.load %arg14[%c0_44, %c0_45] : memref<8x32xf32, #tpu.memory_space<vmem>>, vector<8x32xf32>
    %c0_i32 = arith.constant 0 : i32
    %62 = arith.index_cast %c0_i32 : i32 to index
    %c0_46 = arith.constant 0 : index
    %c0_47 = arith.constant 0 : index
    %63 = vector.load %arg18[%62, %c0_46, %c0_47] : memref<8x8x128xf32, #tpu.memory_space<vmem>>, vector<1x8x128xf32>
    %64 = vector.shape_cast %63 : vector<1x8x128xf32> to vector<8x128xf32>
    %65 = arith.truncf %60 : vector<8x32xf32> to vector<8x32xbf16>
    %cst_48 = arith.constant dense<0.000000e+00> : vector<8x128xf32>
    %66 = tpu.matmul %65, %59, %cst_48 {dimension_numbers = #tpu.dot_dimension_numbers<[1], [0], [0], [1], [0, 0, 1, 1], [], []>} : vector<8x32xbf16>, vector<32x128xbf16>, vector<8x128xf32> -> vector<8x128xf32>
    %67 = arith.addf %64, %66 : vector<8x128xf32>
    %68 = vector.extract_strided_slice %67 {offsets = [0, 0], sizes = [8, 32], strides = [1, 1]} : vector<8x128xf32> to vector<8x32xf32>
    %69 = arith.negf %68 : vector<8x32xf32>
    %70 = math.exp %69 : vector<8x32xf32>
    %cst_49 = arith.constant 1.000000e+00 : f32
    %71 = vector.broadcast %cst_49 : f32 to vector<8x32xf32>
    %72 = arith.addf %71, %70 : vector<8x32xf32>
    %73 = arith.divf %71, %72 : vector<8x32xf32>
    %74 = vector.extract_strided_slice %67 {offsets = [0, 32], sizes = [8, 32], strides = [1, 1]} : vector<8x128xf32> to vector<8x32xf32>
    %75 = arith.negf %74 : vector<8x32xf32>
    %76 = math.exp %75 : vector<8x32xf32>
    %cst_50 = arith.constant 1.000000e+00 : f32
    %77 = vector.broadcast %cst_50 : f32 to vector<8x32xf32>
    %78 = arith.addf %77, %76 : vector<8x32xf32>
    %79 = arith.divf %77, %78 : vector<8x32xf32>
    %80 = vector.extract_strided_slice %67 {offsets = [0, 64], sizes = [8, 32], strides = [1, 1]} : vector<8x128xf32> to vector<8x32xf32>
    %81 = math.tanh %80 : vector<8x32xf32>
    %82 = vector.extract_strided_slice %67 {offsets = [0, 96], sizes = [8, 32], strides = [1, 1]} : vector<8x128xf32> to vector<8x32xf32>
    %83 = arith.negf %82 : vector<8x32xf32>
    %84 = math.exp %83 : vector<8x32xf32>
    %cst_51 = arith.constant 1.000000e+00 : f32
    %85 = vector.broadcast %cst_51 : f32 to vector<8x32xf32>
    %86 = arith.addf %85, %84 : vector<8x32xf32>
    %87 = arith.divf %85, %86 : vector<8x32xf32>
    %88 = arith.mulf %79, %61 : vector<8x32xf32>
    %89 = arith.mulf %73, %81 : vector<8x32xf32>
    %90 = arith.addf %88, %89 : vector<8x32xf32>
    %91 = math.tanh %90 : vector<8x32xf32>
    %92 = arith.mulf %87, %91 : vector<8x32xf32>
    %93 = arith.index_cast %c0_i32 : i32 to index
    %c0_52 = arith.constant 0 : index
    %c0_53 = arith.constant 0 : index
    %94 = vector.load %arg19[%93, %c0_52, %c0_53] : memref<8x8x32xf32, #tpu.memory_space<vmem>>, vector<1x8x32xf32>
    %95 = vector.shape_cast %94 : vector<1x8x32xf32> to vector<8x32xf32>
    %96 = vector.shape_cast %92 : vector<8x32xf32> to vector<1x8x32xf32>
    tpu.vector_store %arg19[%93, %c0_52, %c0_53], %96 {strides = array<i32>} : memref<8x8x32xf32, #tpu.memory_space<vmem>>, vector<1x8x32xf32>,
    %c1_i32 = arith.constant 1 : i32
    %97 = arith.index_cast %c1_i32 : i32 to index
    %c0_54 = arith.constant 0 : index
    %c0_55 = arith.constant 0 : index
    %98 = vector.load %arg18[%97, %c0_54, %c0_55] : memref<8x8x128xf32, #tpu.memory_space<vmem>>, vector<1x8x128xf32>
    %99 = vector.shape_cast %98 : vector<1x8x128xf32> to vector<8x128xf32>
    %100 = arith.truncf %92 : vector<8x32xf32> to vector<8x32xbf16>
    %cst_56 = arith.constant dense<0.000000e+00> : vector<8x128xf32>
    %101 = tpu.matmul %100, %59, %cst_56 {dimension_numbers = #tpu.dot_dimension_numbers<[1], [0], [0], [1], [0, 0, 1, 1], [], []>} : vector<8x32xbf16>, vector<32x128xbf16>, vector<8x128xf32> -> vector<8x128xf32>
    %102 = arith.addf %99, %101 : vector<8x128xf32>
    %103 = vector.extract_strided_slice %102 {offsets = [0, 0], sizes = [8, 32], strides = [1, 1]} : vector<8x128xf32> to vector<8x32xf32>
    %104 = arith.negf %103 : vector<8x32xf32>
    %105 = math.exp %104 : vector<8x32xf32>
    %cst_57 = arith.constant 1.000000e+00 : f32
    %106 = vector.broadcast %cst_57 : f32 to vector<8x32xf32>
    %107 = arith.addf %106, %105 : vector<8x32xf32>
    %108 = arith.divf %106, %107 : vector<8x32xf32>
    %109 = vector.extract_strided_slice %102 {offsets = [0, 32], sizes = [8, 32], strides = [1, 1]} : vector<8x128xf32> to vector<8x32xf32>
    %110 = arith.negf %109 : vector<8x32xf32>
    %111 = math.exp %110 : vector<8x32xf32>
    %cst_58 = arith.constant 1.000000e+00 : f32
    %112 = vector.broadcast %cst_58 : f32 to vector<8x32xf32>
    %113 = arith.addf %112, %111 : vector<8x32xf32>
    %114 = arith.divf %112, %113 : vector<8x32xf32>
    %115 = vector.extract_strided_slice %102 {offsets = [0, 64], sizes = [8, 32], strides = [1, 1]} : vector<8x128xf32> to vector<8x32xf32>
    %116 = math.tanh %115 : vector<8x32xf32>
    %117 = vector.extract_strided_slice %102 {offsets = [0, 96], sizes = [8, 32], strides = [1, 1]} : vector<8x128xf32> to vector<8x32xf32>
    %118 = arith.negf %117 : vector<8x32xf32>
    %119 = math.exp %118 : vector<8x32xf32>
    %cst_59 = arith.constant 1.000000e+00 : f32
    %120 = vector.broadcast %cst_59 : f32 to vector<8x32xf32>
    %121 = arith.addf %120, %119 : vector<8x32xf32>
    %122 = arith.divf %120, %121 : vector<8x32xf32>
    %123 = arith.mulf %114, %90 : vector<8x32xf32>
    %124 = arith.mulf %108, %116 : vector<8x32xf32>
    %125 = arith.addf %123, %124 : vector<8x32xf32>
    %126 = math.tanh %125 : vector<8x32xf32>
    %127 = arith.mulf %122, %126 : vector<8x32xf32>
    %128 = arith.index_cast %c1_i32 : i32 to index
    %c0_60 = arith.constant 0 : index
    %c0_61 = arith.constant 0 : index
    %129 = vector.load %arg19[%128, %c0_60, %c0_61] : memref<8x8x32xf32, #tpu.memory_space<vmem>>, vector<1x8x32xf32>
    %130 = vector.shape_cast %129 : vector<1x8x32xf32> to vector<8x32xf32>
    %131 = vector.shape_cast %127 : vector<8x32xf32> to vector<1x8x32xf32>
    tpu.vector_store %arg19[%128, %c0_60, %c0_61], %131 {strides = array<i32>} : memref<8x8x32xf32, #tpu.memory_space<vmem>>, vector<1x8x32xf32>,
    %c2_i32 = arith.constant 2 : i32
    %132 = arith.index_cast %c2_i32 : i32 to index
    %c0_62 = arith.constant 0 : index
    %c0_63 = arith.constant 0 : index
    %133 = vector.load %arg18[%132, %c0_62, %c0_63] : memref<8x8x128xf32, #tpu.memory_space<vmem>>, vector<1x8x128xf32>
    %134 = vector.shape_cast %133 : vector<1x8x128xf32> to vector<8x128xf32>
    %135 = arith.truncf %127 : vector<8x32xf32> to vector<8x32xbf16>
    %cst_64 = arith.constant dense<0.000000e+00> : vector<8x128xf32>
    %136 = tpu.matmul %135, %59, %cst_64 {dimension_numbers = #tpu.dot_dimension_numbers<[1], [0], [0], [1], [0, 0, 1, 1], [], []>} : vector<8x32xbf16>, vector<32x128xbf16>, vector<8x128xf32> -> vector<8x128xf32>
    %137 = arith.addf %134, %136 : vector<8x128xf32>
    %138 = vector.extract_strided_slice %137 {offsets = [0, 0], sizes = [8, 32], strides = [1, 1]} : vector<8x128xf32> to vector<8x32xf32>
    %139 = arith.negf %138 : vector<8x32xf32>
    %140 = math.exp %139 : vector<8x32xf32>
    %cst_65 = arith.constant 1.000000e+00 : f32
    %141 = vector.broadcast %cst_65 : f32 to vector<8x32xf32>
    %142 = arith.addf %141, %140 : vector<8x32xf32>
    %143 = arith.divf %141, %142 : vector<8x32xf32>
    %144 = vector.extract_strided_slice %137 {offsets = [0, 32], sizes = [8, 32], strides = [1, 1]} : vector<8x128xf32> to vector<8x32xf32>
    %145 = arith.negf %144 : vector<8x32xf32>
    %146 = math.exp %145 : vector<8x32xf32>
    %cst_66 = arith.constant 1.000000e+00 : f32
    %147 = vector.broadcast %cst_66 : f32 to vector<8x32xf32>
    %148 = arith.addf %147, %146 : vector<8x32xf32>
    %149 = arith.divf %147, %148 : vector<8x32xf32>
    %150 = vector.extract_strided_slice %137 {offsets = [0, 64], sizes = [8, 32], strides = [1, 1]} : vector<8x128xf32> to vector<8x32xf32>
    %151 = math.tanh %150 : vector<8x32xf32>
    %152 = vector.extract_strided_slice %137 {offsets = [0, 96], sizes = [8, 32], strides = [1, 1]} : vector<8x128xf32> to vector<8x32xf32>
    %153 = arith.negf %152 : vector<8x32xf32>
    %154 = math.exp %153 : vector<8x32xf32>
    %cst_67 = arith.constant 1.000000e+00 : f32
    %155 = vector.broadcast %cst_67 : f32 to vector<8x32xf32>
    %156 = arith.addf %155, %154 : vector<8x32xf32>
    %157 = arith.divf %155, %156 : vector<8x32xf32>
    %158 = arith.mulf %149, %125 : vector<8x32xf32>
    %159 = arith.mulf %143, %151 : vector<8x32xf32>
    %160 = arith.addf %158, %159 : vector<8x32xf32>
    %161 = math.tanh %160 : vector<8x32xf32>
    %162 = arith.mulf %157, %161 : vector<8x32xf32>
    %163 = arith.index_cast %c2_i32 : i32 to index
    %c0_68 = arith.constant 0 : index
    %c0_69 = arith.constant 0 : index
    %164 = vector.load %arg19[%163, %c0_68, %c0_69] : memref<8x8x32xf32, #tpu.memory_space<vmem>>, vector<1x8x32xf32>
    %165 = vector.shape_cast %164 : vector<1x8x32xf32> to vector<8x32xf32>
    %166 = vector.shape_cast %162 : vector<8x32xf32> to vector<1x8x32xf32>
    tpu.vector_store %arg19[%163, %c0_68, %c0_69], %166 {strides = array<i32>} : memref<8x8x32xf32, #tpu.memory_space<vmem>>, vector<1x8x32xf32>,
    %c3_i32 = arith.constant 3 : i32
    %167 = arith.index_cast %c3_i32 : i32 to index
    %c0_70 = arith.constant 0 : index
    %c0_71 = arith.constant 0 : index
    %168 = vector.load %arg18[%167, %c0_70, %c0_71] : memref<8x8x128xf32, #tpu.memory_space<vmem>>, vector<1x8x128xf32>
    %169 = vector.shape_cast %168 : vector<1x8x128xf32> to vector<8x128xf32>
    %170 = arith.truncf %162 : vector<8x32xf32> to vector<8x32xbf16>
    %cst_72 = arith.constant dense<0.000000e+00> : vector<8x128xf32>
    %171 = tpu.matmul %170, %59, %cst_72 {dimension_numbers = #tpu.dot_dimension_numbers<[1], [0], [0], [1], [0, 0, 1, 1], [], []>} : vector<8x32xbf16>, vector<32x128xbf16>, vector<8x128xf32> -> vector<8x128xf32>
    %172 = arith.addf %169, %171 : vector<8x128xf32>
    %173 = vector.extract_strided_slice %172 {offsets = [0, 0], sizes = [8, 32], strides = [1, 1]} : vector<8x128xf32> to vector<8x32xf32>
    %174 = arith.negf %173 : vector<8x32xf32>
    %175 = math.exp %174 : vector<8x32xf32>
    %cst_73 = arith.constant 1.000000e+00 : f32
    %176 = vector.broadcast %cst_73 : f32 to vector<8x32xf32>
    %177 = arith.addf %176, %175 : vector<8x32xf32>
    %178 = arith.divf %176, %177 : vector<8x32xf32>
    %179 = vector.extract_strided_slice %172 {offsets = [0, 32], sizes = [8, 32], strides = [1, 1]} : vector<8x128xf32> to vector<8x32xf32>
    %180 = arith.negf %179 : vector<8x32xf32>
    %181 = math.exp %180 : vector<8x32xf32>
    %cst_74 = arith.constant 1.000000e+00 : f32
    %182 = vector.broadcast %cst_74 : f32 to vector<8x32xf32>
    %183 = arith.addf %182, %181 : vector<8x32xf32>
    %184 = arith.divf %182, %183 : vector<8x32xf32>
    %185 = vector.extract_strided_slice %172 {offsets = [0, 64], sizes = [8, 32], strides = [1, 1]} : vector<8x128xf32> to vector<8x32xf32>
    %186 = math.tanh %185 : vector<8x32xf32>
    %187 = vector.extract_strided_slice %172 {offsets = [0, 96], sizes = [8, 32], strides = [1, 1]} : vector<8x128xf32> to vector<8x32xf32>
    %188 = arith.negf %187 : vector<8x32xf32>
    %189 = math.exp %188 : vector<8x32xf32>
    %cst_75 = arith.constant 1.000000e+00 : f32
    %190 = vector.broadcast %cst_75 : f32 to vector<8x32xf32>
    %191 = arith.addf %190, %189 : vector<8x32xf32>
    %192 = arith.divf %190, %191 : vector<8x32xf32>
    %193 = arith.mulf %184, %160 : vector<8x32xf32>
    %194 = arith.mulf %178, %186 : vector<8x32xf32>
    %195 = arith.addf %193, %194 : vector<8x32xf32>
    %196 = math.tanh %195 : vector<8x32xf32>
    %197 = arith.mulf %192, %196 : vector<8x32xf32>
    %198 = arith.index_cast %c3_i32 : i32 to index
    %c0_76 = arith.constant 0 : index
    %c0_77 = arith.constant 0 : index
    %199 = vector.load %arg19[%198, %c0_76, %c0_77] : memref<8x8x32xf32, #tpu.memory_space<vmem>>, vector<1x8x32xf32>
    %200 = vector.shape_cast %199 : vector<1x8x32xf32> to vector<8x32xf32>
    %201 = vector.shape_cast %197 : vector<8x32xf32> to vector<1x8x32xf32>
    tpu.vector_store %arg19[%198, %c0_76, %c0_77], %201 {strides = array<i32>} : memref<8x8x32xf32, #tpu.memory_space<vmem>>, vector<1x8x32xf32>,
    %c4_i32 = arith.constant 4 : i32
    %202 = arith.index_cast %c4_i32 : i32 to index
    %c0_78 = arith.constant 0 : index
    %c0_79 = arith.constant 0 : index
    %203 = vector.load %arg18[%202, %c0_78, %c0_79] : memref<8x8x128xf32, #tpu.memory_space<vmem>>, vector<1x8x128xf32>
    %204 = vector.shape_cast %203 : vector<1x8x128xf32> to vector<8x128xf32>
    %205 = arith.truncf %197 : vector<8x32xf32> to vector<8x32xbf16>
    %cst_80 = arith.constant dense<0.000000e+00> : vector<8x128xf32>
    %206 = tpu.matmul %205, %59, %cst_80 {dimension_numbers = #tpu.dot_dimension_numbers<[1], [0], [0], [1], [0, 0, 1, 1], [], []>} : vector<8x32xbf16>, vector<32x128xbf16>, vector<8x128xf32> -> vector<8x128xf32>
    %207 = arith.addf %204, %206 : vector<8x128xf32>
    %208 = vector.extract_strided_slice %207 {offsets = [0, 0], sizes = [8, 32], strides = [1, 1]} : vector<8x128xf32> to vector<8x32xf32>
    %209 = arith.negf %208 : vector<8x32xf32>
    %210 = math.exp %209 : vector<8x32xf32>
    %cst_81 = arith.constant 1.000000e+00 : f32
    %211 = vector.broadcast %cst_81 : f32 to vector<8x32xf32>
    %212 = arith.addf %211, %210 : vector<8x32xf32>
    %213 = arith.divf %211, %212 : vector<8x32xf32>
    %214 = vector.extract_strided_slice %207 {offsets = [0, 32], sizes = [8, 32], strides = [1, 1]} : vector<8x128xf32> to vector<8x32xf32>
    %215 = arith.negf %214 : vector<8x32xf32>
    %216 = math.exp %215 : vector<8x32xf32>
    %cst_82 = arith.constant 1.000000e+00 : f32
    %217 = vector.broadcast %cst_82 : f32 to vector<8x32xf32>
    %218 = arith.addf %217, %216 : vector<8x32xf32>
    %219 = arith.divf %217, %218 : vector<8x32xf32>
    %220 = vector.extract_strided_slice %207 {offsets = [0, 64], sizes = [8, 32], strides = [1, 1]} : vector<8x128xf32> to vector<8x32xf32>
    %221 = math.tanh %220 : vector<8x32xf32>
    %222 = vector.extract_strided_slice %207 {offsets = [0, 96], sizes = [8, 32], strides = [1, 1]} : vector<8x128xf32> to vector<8x32xf32>
    %223 = arith.negf %222 : vector<8x32xf32>
    %224 = math.exp %223 : vector<8x32xf32>
    %cst_83 = arith.constant 1.000000e+00 : f32
    %225 = vector.broadcast %cst_83 : f32 to vector<8x32xf32>
    %226 = arith.addf %225, %224 : vector<8x32xf32>
    %227 = arith.divf %225, %226 : vector<8x32xf32>
    %228 = arith.mulf %219, %195 : vector<8x32xf32>
    %229 = arith.mulf %213, %221 : vector<8x32xf32>
    %230 = arith.addf %228, %229 : vector<8x32xf32>
    %231 = math.tanh %230 : vector<8x32xf32>
    %232 = arith.mulf %227, %231 : vector<8x32xf32>
    %233 = arith.index_cast %c4_i32 : i32 to index
    %c0_84 = arith.constant 0 : index
    %c0_85 = arith.constant 0 : index
    %234 = vector.load %arg19[%233, %c0_84, %c0_85] : memref<8x8x32xf32, #tpu.memory_space<vmem>>, vector<1x8x32xf32>
    %235 = vector.shape_cast %234 : vector<1x8x32xf32> to vector<8x32xf32>
    %236 = vector.shape_cast %232 : vector<8x32xf32> to vector<1x8x32xf32>
    tpu.vector_store %arg19[%233, %c0_84, %c0_85], %236 {strides = array<i32>} : memref<8x8x32xf32, #tpu.memory_space<vmem>>, vector<1x8x32xf32>,
    %c5_i32 = arith.constant 5 : i32
    %237 = arith.index_cast %c5_i32 : i32 to index
    %c0_86 = arith.constant 0 : index
    %c0_87 = arith.constant 0 : index
    %238 = vector.load %arg18[%237, %c0_86, %c0_87] : memref<8x8x128xf32, #tpu.memory_space<vmem>>, vector<1x8x128xf32>
    %239 = vector.shape_cast %238 : vector<1x8x128xf32> to vector<8x128xf32>
    %240 = arith.truncf %232 : vector<8x32xf32> to vector<8x32xbf16>
    %cst_88 = arith.constant dense<0.000000e+00> : vector<8x128xf32>
    %241 = tpu.matmul %240, %59, %cst_88 {dimension_numbers = #tpu.dot_dimension_numbers<[1], [0], [0], [1], [0, 0, 1, 1], [], []>} : vector<8x32xbf16>, vector<32x128xbf16>, vector<8x128xf32> -> vector<8x128xf32>
    %242 = arith.addf %239, %241 : vector<8x128xf32>
    %243 = vector.extract_strided_slice %242 {offsets = [0, 0], sizes = [8, 32], strides = [1, 1]} : vector<8x128xf32> to vector<8x32xf32>
    %244 = arith.negf %243 : vector<8x32xf32>
    %245 = math.exp %244 : vector<8x32xf32>
    %cst_89 = arith.constant 1.000000e+00 : f32
    %246 = vector.broadcast %cst_89 : f32 to vector<8x32xf32>
    %247 = arith.addf %246, %245 : vector<8x32xf32>
    %248 = arith.divf %246, %247 : vector<8x32xf32>
    %249 = vector.extract_strided_slice %242 {offsets = [0, 32], sizes = [8, 32], strides = [1, 1]} : vector<8x128xf32> to vector<8x32xf32>
    %250 = arith.negf %249 : vector<8x32xf32>
    %251 = math.exp %250 : vector<8x32xf32>
    %cst_90 = arith.constant 1.000000e+00 : f32
    %252 = vector.broadcast %cst_90 : f32 to vector<8x32xf32>
    %253 = arith.addf %252, %251 : vector<8x32xf32>
    %254 = arith.divf %252, %253 : vector<8x32xf32>
    %255 = vector.extract_strided_slice %242 {offsets = [0, 64], sizes = [8, 32], strides = [1, 1]} : vector<8x128xf32> to vector<8x32xf32>
    %256 = math.tanh %255 : vector<8x32xf32>
    %257 = vector.extract_strided_slice %242 {offsets = [0, 96], sizes = [8, 32], strides = [1, 1]} : vector<8x128xf32> to vector<8x32xf32>
    %258 = arith.negf %257 : vector<8x32xf32>
    %259 = math.exp %258 : vector<8x32xf32>
    %cst_91 = arith.constant 1.000000e+00 : f32
    %260 = vector.broadcast %cst_91 : f32 to vector<8x32xf32>
    %261 = arith.addf %260, %259 : vector<8x32xf32>
    %262 = arith.divf %260, %261 : vector<8x32xf32>
    %263 = arith.mulf %254, %230 : vector<8x32xf32>
    %264 = arith.mulf %248, %256 : vector<8x32xf32>
    %265 = arith.addf %263, %264 : vector<8x32xf32>
    %266 = math.tanh %265 : vector<8x32xf32>
    %267 = arith.mulf %262, %266 : vector<8x32xf32>
    %268 = arith.index_cast %c5_i32 : i32 to index
    %c0_92 = arith.constant 0 : index
    %c0_93 = arith.constant 0 : index
    %269 = vector.load %arg19[%268, %c0_92, %c0_93] : memref<8x8x32xf32, #tpu.memory_space<vmem>>, vector<1x8x32xf32>
    %270 = vector.shape_cast %269 : vector<1x8x32xf32> to vector<8x32xf32>
    %271 = vector.shape_cast %267 : vector<8x32xf32> to vector<1x8x32xf32>
    tpu.vector_store %arg19[%268, %c0_92, %c0_93], %271 {strides = array<i32>} : memref<8x8x32xf32, #tpu.memory_space<vmem>>, vector<1x8x32xf32>,
    %c6_i32 = arith.constant 6 : i32
    %272 = arith.index_cast %c6_i32 : i32 to index
    %c0_94 = arith.constant 0 : index
    %c0_95 = arith.constant 0 : index
    %273 = vector.load %arg18[%272, %c0_94, %c0_95] : memref<8x8x128xf32, #tpu.memory_space<vmem>>, vector<1x8x128xf32>
    %274 = vector.shape_cast %273 : vector<1x8x128xf32> to vector<8x128xf32>
    %275 = arith.truncf %267 : vector<8x32xf32> to vector<8x32xbf16>
    %cst_96 = arith.constant dense<0.000000e+00> : vector<8x128xf32>
    %276 = tpu.matmul %275, %59, %cst_96 {dimension_numbers = #tpu.dot_dimension_numbers<[1], [0], [0], [1], [0, 0, 1, 1], [], []>} : vector<8x32xbf16>, vector<32x128xbf16>, vector<8x128xf32> -> vector<8x128xf32>
    %277 = arith.addf %274, %276 : vector<8x128xf32>
    %278 = vector.extract_strided_slice %277 {offsets = [0, 0], sizes = [8, 32], strides = [1, 1]} : vector<8x128xf32> to vector<8x32xf32>
    %279 = arith.negf %278 : vector<8x32xf32>
    %280 = math.exp %279 : vector<8x32xf32>
    %cst_97 = arith.constant 1.000000e+00 : f32
    %281 = vector.broadcast %cst_97 : f32 to vector<8x32xf32>
    %282 = arith.addf %281, %280 : vector<8x32xf32>
    %283 = arith.divf %281, %282 : vector<8x32xf32>
    %284 = vector.extract_strided_slice %277 {offsets = [0, 32], sizes = [8, 32], strides = [1, 1]} : vector<8x128xf32> to vector<8x32xf32>
    %285 = arith.negf %284 : vector<8x32xf32>
    %286 = math.exp %285 : vector<8x32xf32>
    %cst_98 = arith.constant 1.000000e+00 : f32
    %287 = vector.broadcast %cst_98 : f32 to vector<8x32xf32>
    %288 = arith.addf %287, %286 : vector<8x32xf32>
    %289 = arith.divf %287, %288 : vector<8x32xf32>
    %290 = vector.extract_strided_slice %277 {offsets = [0, 64], sizes = [8, 32], strides = [1, 1]} : vector<8x128xf32> to vector<8x32xf32>
    %291 = math.tanh %290 : vector<8x32xf32>
    %292 = vector.extract_strided_slice %277 {offsets = [0, 96], sizes = [8, 32], strides = [1, 1]} : vector<8x128xf32> to vector<8x32xf32>
    %293 = arith.negf %292 : vector<8x32xf32>
    %294 = math.exp %293 : vector<8x32xf32>
    %cst_99 = arith.constant 1.000000e+00 : f32
    %295 = vector.broadcast %cst_99 : f32 to vector<8x32xf32>
    %296 = arith.addf %295, %294 : vector<8x32xf32>
    %297 = arith.divf %295, %296 : vector<8x32xf32>
    %298 = arith.mulf %289, %265 : vector<8x32xf32>
    %299 = arith.mulf %283, %291 : vector<8x32xf32>
    %300 = arith.addf %298, %299 : vector<8x32xf32>
    %301 = math.tanh %300 : vector<8x32xf32>
    %302 = arith.mulf %297, %301 : vector<8x32xf32>
    %303 = arith.index_cast %c6_i32 : i32 to index
    %c0_100 = arith.constant 0 : index
    %c0_101 = arith.constant 0 : index
    %304 = vector.load %arg19[%303, %c0_100, %c0_101] : memref<8x8x32xf32, #tpu.memory_space<vmem>>, vector<1x8x32xf32>
    %305 = vector.shape_cast %304 : vector<1x8x32xf32> to vector<8x32xf32>
    %306 = vector.shape_cast %302 : vector<8x32xf32> to vector<1x8x32xf32>
    tpu.vector_store %arg19[%303, %c0_100, %c0_101], %306 {strides = array<i32>} : memref<8x8x32xf32, #tpu.memory_space<vmem>>, vector<1x8x32xf32>,
    %c7_i32 = arith.constant 7 : i32
    %307 = arith.index_cast %c7_i32 : i32 to index
    %c0_102 = arith.constant 0 : index
    %c0_103 = arith.constant 0 : index
    %308 = vector.load %arg18[%307, %c0_102, %c0_103] : memref<8x8x128xf32, #tpu.memory_space<vmem>>, vector<1x8x128xf32>
    %309 = vector.shape_cast %308 : vector<1x8x128xf32> to vector<8x128xf32>
    %310 = arith.truncf %302 : vector<8x32xf32> to vector<8x32xbf16>
    %cst_104 = arith.constant dense<0.000000e+00> : vector<8x128xf32>
    %311 = tpu.matmul %310, %59, %cst_104 {dimension_numbers = #tpu.dot_dimension_numbers<[1], [0], [0], [1], [0, 0, 1, 1], [], []>} : vector<8x32xbf16>, vector<32x128xbf16>, vector<8x128xf32> -> vector<8x128xf32>
    %312 = arith.addf %309, %311 : vector<8x128xf32>
    %313 = vector.extract_strided_slice %312 {offsets = [0, 0], sizes = [8, 32], strides = [1, 1]} : vector<8x128xf32> to vector<8x32xf32>
    %314 = arith.negf %313 : vector<8x32xf32>
    %315 = math.exp %314 : vector<8x32xf32>
    %cst_105 = arith.constant 1.000000e+00 : f32
    %316 = vector.broadcast %cst_105 : f32 to vector<8x32xf32>
    %317 = arith.addf %316, %315 : vector<8x32xf32>
    %318 = arith.divf %316, %317 : vector<8x32xf32>
    %319 = vector.extract_strided_slice %312 {offsets = [0, 32], sizes = [8, 32], strides = [1, 1]} : vector<8x128xf32> to vector<8x32xf32>
    %320 = arith.negf %319 : vector<8x32xf32>
    %321 = math.exp %320 : vector<8x32xf32>
    %cst_106 = arith.constant 1.000000e+00 : f32
    %322 = vector.broadcast %cst_106 : f32 to vector<8x32xf32>
    %323 = arith.addf %322, %321 : vector<8x32xf32>
    %324 = arith.divf %322, %323 : vector<8x32xf32>
    %325 = vector.extract_strided_slice %312 {offsets = [0, 64], sizes = [8, 32], strides = [1, 1]} : vector<8x128xf32> to vector<8x32xf32>
    %326 = math.tanh %325 : vector<8x32xf32>
    %327 = vector.extract_strided_slice %312 {offsets = [0, 96], sizes = [8, 32], strides = [1, 1]} : vector<8x128xf32> to vector<8x32xf32>
    %328 = arith.negf %327 : vector<8x32xf32>
    %329 = math.exp %328 : vector<8x32xf32>
    %cst_107 = arith.constant 1.000000e+00 : f32
    %330 = vector.broadcast %cst_107 : f32 to vector<8x32xf32>
    %331 = arith.addf %330, %329 : vector<8x32xf32>
    %332 = arith.divf %330, %331 : vector<8x32xf32>
    %333 = arith.mulf %324, %300 : vector<8x32xf32>
    %334 = arith.mulf %318, %326 : vector<8x32xf32>
    %335 = arith.addf %333, %334 : vector<8x32xf32>
    %336 = math.tanh %335 : vector<8x32xf32>
    %337 = arith.mulf %332, %336 : vector<8x32xf32>
    %338 = arith.index_cast %c7_i32 : i32 to index
    %c0_108 = arith.constant 0 : index
    %c0_109 = arith.constant 0 : index
    %339 = vector.load %arg19[%338, %c0_108, %c0_109] : memref<8x8x32xf32, #tpu.memory_space<vmem>>, vector<1x8x32xf32>
    %340 = vector.shape_cast %339 : vector<1x8x32xf32> to vector<8x32xf32>
    %341 = vector.shape_cast %337 : vector<8x32xf32> to vector<1x8x32xf32>
    tpu.vector_store %arg19[%338, %c0_108, %c0_109], %341 {strides = array<i32>} : memref<8x8x32xf32, #tpu.memory_space<vmem>>, vector<1x8x32xf32>,
    %c8_i32 = arith.constant 8 : i32
    %c0_110 = arith.constant 0 : index
    %c0_111 = arith.constant 0 : index
    %342 = vector.load %arg16[%c0_110, %c0_111] : memref<8x32xf32, #tpu.memory_space<vmem>>, vector<8x32xf32>
    tpu.vector_store %arg16[%c0_110, %c0_111], %337 {strides = array<i32>} : memref<8x32xf32, #tpu.memory_space<vmem>>, vector<8x32xf32>,
    %c0_112 = arith.constant 0 : index
    %c0_113 = arith.constant 0 : index
    %343 = vector.load %arg17[%c0_112, %c0_113] : memref<8x32xf32, #tpu.memory_space<vmem>>, vector<8x32xf32>
    tpu.vector_store %arg17[%c0_112, %c0_113], %335 {strides = array<i32>} : memref<8x32xf32, #tpu.memory_space<vmem>>, vector<8x32xf32>,
    %c0_114 = arith.constant 0 : index
    %c0_115 = arith.constant 0 : index
    %c0_116 = arith.constant 0 : index
    %344 = vector.load %arg19[%c0_114, %c0_115, %c0_116] : memref<8x8x32xf32, #tpu.memory_space<vmem>>, vector<8x8x32xf32>
    %345 = vector.shape_cast %344 : vector<8x8x32xf32> to vector<64x32xf32>
    %c0_117 = arith.constant 0 : index
    %c0_118 = arith.constant 0 : index
    %346 = vector.load %arg11[%c0_117, %c0_118] : memref<32x128xf32, #tpu.memory_space<vmem>>, vector<32x128xf32>
    %347 = arith.truncf %345 : vector<64x32xf32> to vector<64x32xbf16>
    %348 = arith.truncf %346 : vector<32x128xf32> to vector<32x128xbf16>
    %cst_119 = arith.constant dense<0.000000e+00> : vector<64x128xf32>
    %349 = tpu.matmul %347, %348, %cst_119 {dimension_numbers = #tpu.dot_dimension_numbers<[1], [0], [0], [1], [0, 0, 1, 1], [], []>} : vector<64x32xbf16>, vector<32x128xbf16>, vector<64x128xf32> -> vector<64x128xf32>
    %c0_120 = arith.constant 0 : index
    %c0_121 = arith.constant 0 : index
    %350 = vector.load %arg12[%c0_120, %c0_121] : memref<1x128xf32, #tpu.memory_space<vmem>>, vector<1x128xf32>
    %351 = vector.broadcast %350 : vector<1x128xf32> to vector<64x128xf32>
    %352 = arith.addf %349, %351 : vector<64x128xf32>
    %353 = tpu.iota {dimensions = array<i32: 1>} : vector<64x128xi32>
    %c5_i32_122 = arith.constant 5 : i32
    %354 = vector.broadcast %c5_i32_122 : i32 to vector<64x128xi32>
    %355 = arith.cmpi slt, %353, %354 : vector<64x128xi32>
    %c35_i32 = arith.constant 35 : i32
    %356 = vector.broadcast %c35_i32 : i32 to vector<64x128xi32>
    %357 = arith.cmpi sge, %353, %356 : vector<64x128xi32>
    %c40_i32 = arith.constant 40 : i32
    %358 = vector.broadcast %c40_i32 : i32 to vector<64x128xi32>
    %359 = arith.cmpi slt, %353, %358 : vector<64x128xi32>
    %360 = arith.andi %357, %359 : vector<64x128xi1>
    %c40_i32_123 = arith.constant 40 : i32
    %361 = vector.broadcast %c40_i32_123 : i32 to vector<64x128xi32>
    %362 = arith.cmpi slt, %353, %361 : vector<64x128xi32>
    %cst_124 = arith.constant 9.99999993E-9 : f32
    %cst_125 = arith.constant 1.000000e+00 : f32
    %363 = vector.broadcast %cst_124 : f32 to vector<64x128xf32>
    %364 = arith.maximumf %363, %352 : vector<64x128xf32>
    %365 = vector.broadcast %cst_125 : f32 to vector<64x128xf32>
    %366 = arith.minimumf %365, %364 : vector<64x128xf32>
    %cst_126 = arith.constant 0.000000e+00 : f32
    %367 = vector.broadcast %cst_126 : f32 to vector<64x128xf32>
    %368 = arith.select %355, %366, %367 : vector<64x128xi1>, vector<64x128xf32>
    %cst_127 = arith.constant dense<0xFF800000> : vector<64xf32>
    %369 = vector.multi_reduction <maximumf>, %368, %cst_127 [1] : vector<64x128xf32> to vector<64xf32>
    %370 = vector.shape_cast %369 : vector<64xf32> to vector<64x1xf32>
    %371 = vector.broadcast %370 : vector<64x1xf32> to vector<64x128xf32>
    %372 = arith.subf %366, %371 : vector<64x128xf32>
    %373 = math.exp %372 : vector<64x128xf32>
    %cst_128 = arith.constant 0.000000e+00 : f32
    %374 = vector.broadcast %cst_128 : f32 to vector<64x128xf32>
    %375 = arith.select %355, %373, %374 : vector<64x128xi1>, vector<64x128xf32>
    %cst_129 = arith.constant dense<0.000000e+00> : vector<64xf32>
    %376 = vector.multi_reduction <add>, %375, %cst_129 [1] : vector<64x128xf32> to vector<64xf32>
    %377 = vector.shape_cast %376 : vector<64xf32> to vector<64x1xf32>
    %378 = tpu.reciprocal %377 {approx = true} : vector<64x1xf32> -> vector<64x1xf32>
    %379 = vector.broadcast %378 : vector<64x1xf32> to vector<64x128xf32>
    %380 = arith.mulf %375, %379 : vector<64x128xf32>
    %cst_130 = arith.constant 0.000000e+00 : f32
    %381 = vector.broadcast %cst_130 : f32 to vector<64x128xf32>
    %382 = arith.cmpf ogt, %352, %381 : vector<64x128xf32>
    %cst_131 = arith.constant 0.000000e+00 : f32
    %383 = vector.broadcast %cst_131 : f32 to vector<64x128xf32>
    %384 = arith.minimumf %352, %383 : vector<64x128xf32>
    %385 = math.exp %384 : vector<64x128xf32>
    %cst_132 = arith.constant 1.000000e+00 : f32
    %386 = vector.broadcast %cst_132 : f32 to vector<64x128xf32>
    %387 = arith.subf %385, %386 : vector<64x128xf32>
    %388 = arith.select %382, %352, %387 : vector<64x128xi1>, vector<64x128xf32>
    %cst_133 = arith.constant 1.000000e+00 : f32
    %389 = vector.broadcast %cst_133 : f32 to vector<64x128xf32>
    %390 = arith.addf %388, %389 : vector<64x128xf32>
    %391 = arith.select %360, %390, %352 : vector<64x128xi1>, vector<64x128xf32>
    %392 = arith.select %355, %380, %391 : vector<64x128xi1>, vector<64x128xf32>
    %cst_134 = arith.constant 0.000000e+00 : f32
    %393 = vector.broadcast %cst_134 : f32 to vector<64x128xf32>
    %394 = arith.select %362, %392, %393 : vector<64x128xi1>, vector<64x128xf32>
    %c0_135 = arith.constant 0 : index
    %c0_136 = arith.constant 0 : index
    %395 = vector.load %arg15[%c0_135, %c0_136] : memref<64x128xf32, #tpu.memory_space<vmem>>, vector<64x128xf32>
    tpu.vector_store %arg15[%c0_135, %c0_136], %394 {strides = array<i32>} : memref<64x128xf32, #tpu.memory_space<vmem>>, vector<64x128xf32>,
    return
  }
}

</mosaic_0001>

<bundles_post_ra>
// kernel: mdnrnn_forward.1
= control target key start
LH: loop header
LB: loop body
LE: loop exit
PB: predicated region body
PF: predicated region fallthrough
CT: control target
= control target key end

     0   :  { %v7712_v0 = vmov 0.0   ;;  %vm68_vm0 = vcmask 1042432   ;;  %vm5760_vm1 = vmmov 0   ;;  %vm64_vm2 = vcmask 48128   ;;  %s7693_s2 = inlined_call_operand.vmem [shape: f32[6,16], index: 2, kind: input, shape index: {}]   ;;  %s7694_s4 = inlined_call_operand.vmem [shape: f32[36,8], index: 4, kind: input, shape index: {}]   ;;  %s7695_s0 = inlined_call_operand.vmem [shape: bf16[8,6], index: 0, kind: input, shape index: {}]   ;;  %s7696_s1 = inlined_call_operand.vmem [shape: bf16[2048,36], index: 1, kind: input, shape index: {}]   ;;  %s7697_s8 = inlined_call_operand.vmem [shape: f32[16,128], index: 8, kind: input, shape index: {}]   ;;  %s7698_s3 = inlined_call_operand.vmem [shape: f32[1,16], index: 3, kind: input, shape index: {}]   ;;  %s7699_s5 = inlined_call_operand.vmem [shape: f32[1,8], index: 5, kind: input, shape index: {}]   ;;  %s7700_s10 = inlined_call_operand.vmem [shape: f32[1,128], index: 10, kind: input, shape index: {}]   ;;  %s7701_s6 = inlined_call_operand.vmem [shape: f32[8,16], index: 6, kind: input, shape index: {}]   ;;  %s7702_s7 = inlined_call_operand.vmem [shape: f32[1,16], index: 7, kind: input, shape index: {}]   ;;  %s7703_s9 = inlined_call_operand.vmem [shape: f32[32,128], index: 9, kind: input, shape index: {}]   ;;  %s7704_s13 = inlined_call_operand.vmem [shape: f32[8,32], index: 13, kind: input, shape index: {}]   ;;  %s7705_s14 = inlined_call_operand.vmem [shape: f32[8,32], index: 14, kind: input, shape index: {}]   ;;  %s7706_s11 = inlined_call_operand.vmem [shape: f32[32,128], index: 11, kind: input, shape index: {}]   ;;  %s7707_s16 = inlined_call_operand.vmem [shape: f32[8,32], index: 16, kind: output, shape index: {1}]   ;;  %s7708_s12 = inlined_call_operand.vmem [shape: f32[1,128], index: 12, kind: input, shape index: {}]   ;;  %s7709_s15 = inlined_call_operand.vmem [shape: f32[64,128], index: 15, kind: output, shape index: {0}]   ;;  %s7710_s17 = inlined_call_operand.vmem [shape: f32[8,32], index: 17, kind: output, shape index: {2}]  }
   0x1   :  { %7718 = sst [smem:[#allocation16_spill]] %s7693_s2  ;;  %5140 = vmatprep.subr.bf16.mxu0 %v7712_v0  ;;  %3494 = vst [vmem:[#allocation2 + $0x2] sm:$0x3f] %v7712_v0  ;;  %3495 = vst [vmem:[#allocation2 + $0xa] sm:$0x3f] %v7712_v0  ;;  %5142 = vmatprep.mubr.msk.bf16.mxu0 %vm5760_vm1, %v7712_v0  ;;  %vm1489_vm3 = vcmask 1041408  }
   0x2   :  { %7719 = sst [smem:[#allocation17_spill]] %s7694_s4  ;;  %3496 = vst [vmem:[#allocation2 + $0x12] sm:$0x3f] %v7712_v0  ;;  %3497 = vst [vmem:[#allocation2 + $0x1a] sm:$0x3f] %v7712_v0  ;;  %5146 = vmatprep.subr.bf16.mxu1 %v7712_v0  ;;  %5148 = vmatprep.mubr.msk.bf16.mxu1 %vm5760_vm1, %v7712_v0  ;;  %v5517_v9 = vld [vmem:[%s7696_s1] sm:$0xff]  }
   0x3   :  { %3498 = vst [vmem:[#allocation2 + $0x22] sm:$0x3f] %v7712_v0  ;;  %3499 = vst [vmem:[#allocation2 + $0x2a] sm:$0x3f] %v7712_v0  ;;  %s7720_s26 = sld [smem:[#allocation16_spill]]  ;;  %vm1104_vm4 = vcmask 293888  }
   0x4   :  { %3500 = vst [vmem:[#allocation2 + $0x32] sm:$0x3f] %v7712_v0  ;;  %3501 = vst [vmem:[#allocation2 + $0x3a] sm:$0x3f] %v7712_v0  ;;  %s7721_s29 = sld [smem:[#allocation17_spill]]  ;;  %v5518_v15 = vld [vmem:[%s7696_s1 + $0x8] sm:$0xff]  }
   0x5   :  { %v54_v8 = vld [vmem:[%s7695_s0] sm:$0xf]  ;;  %v5519_v16 = vld [vmem:[%s7696_s1 + $0x10] sm:$0xff]   ;;  %v5520_v17 = vld [vmem:[%s7696_s1 + $0x18] sm:$0xff]   ;;  %vm123_vm5 = vcmask 130048  }
   0x6   :  { %v5521_v18 = vld [vmem:[%s7696_s1 + $0x20] sm:$0xff]   ;;  %v5522_v19 = vld [vmem:[%s7696_s1 + $0x28] sm:$0xff]   ;;  %v5523_v20 = vld [vmem:[%s7696_s1 + $0x30] sm:$0xff]  }
   0x7   :  { %v5524_v21 = vld [vmem:[%s7696_s1 + $0x38] sm:$0xff]   ;;  %v5525_v22 = vld [vmem:[%s7696_s1 + $0x40] sm:$0xff]   ;;  %v5526_v23 = vld [vmem:[%s7696_s1 + $0x48] sm:$0xff]  }
   0x8   :  { %v5527_v24 = vld [vmem:[%s7696_s1 + $0x50] sm:$0xff]   ;;  %v5528_v25 = vld [vmem:[%s7696_s1 + $0x58] sm:$0xff]   ;;  %v5529_v26 = vld [vmem:[%s7696_s1 + $0x60] sm:$0xff]  }
   0x9   :  { %v55_v1 = vld [vmem:[%s7720_s26] sm:$0x3f]  ;;  %v5530_v27 = vld [vmem:[%s7696_s1 + $0x68] sm:$0xff]   ;;  %v5531_v28 = vld [vmem:[%s7696_s1 + $0x70] sm:$0xff]  }
   0xa   :  { %v453_v2 = vld [vmem:[%s7721_s29 + $0x20] sm:$0xf]  ;;  %v56_v3 = vpack.c.bf16 %v55_v1, %v55_v1  ;;  %v451_v5 = vld [vmem:[%s7721_s29 + $0x10] sm:$0xff]  ;;  %v452_v6 = vld [vmem:[%s7721_s29 + $0x18] sm:$0xff] }
   0xb   :  { %v456_v4 = vpack.c.bf16 %v453_v2, %v453_v2  ;;  %v449_v10 = vld [vmem:[%s7721_s29] sm:$0xff]  ;;  %v5895_v12 = vpack.c.bf16 %v452_v6, %v451_v5  ;;  %v450_v13 = vld [vmem:[%s7721_s29 + $0x8] sm:$0xff]  ;;  %v5532_v29 = vld [vmem:[%s7696_s1 + $0x78] sm:$0xff]  }
   0xc   :  { %v70_v7 = vsel %vm68_vm0, %v56_v3, 0  ;;  %v5904_v14 = vpack.c.bf16 %v450_v13, %v449_v10  ;;  %v112_v30 = vld [vmem:[%s7697_s8] sm:$0xff]  ;;  %v113_v31 = vld [vmem:[%s7697_s8 + $0x8] sm:$0xff]  ;;  %v5535_v35 = vld [vmem:[%s7696_s1 + $0x90] sm:$0xff]  }
   0xd   :  { %5141 = vmatpush3.bf16.msra.mxu0 %v70_v7  ;;  %v5893_v11 = vsel %vm1489_vm3, %v456_v4, 0  ;;  %v115_v32 = vpack.c.bf16 %v113_v31, %v112_v30  ;;  %v5533_v33 = vld [vmem:[%s7696_s1 + $0x80] sm:$0xff]   ;;  %v5534_v34 = vld [vmem:[%s7696_s1 + $0x88] sm:$0xff]   ;;  %v5536_v36 = vld [vmem:[%s7696_s1 + $0x98] sm:$0xff]  }
   0xe   :  { %5508 = vmatprep.subr.msk.bf16.mxu0 %vm1489_vm3, %v456_v4  ;;  %v5537_v37 = vld [vmem:[%s7696_s1 + $0xa0] sm:$0xff]   ;;  %v5538_v38 = vld [vmem:[%s7696_s1 + $0xa8] sm:$0xff]   ;;  %v5539_v39 = vld [vmem:[%s7696_s1 + $0xb0] sm:$0xff]  }
   0xf   :  { %5147 = vmatpush3.bf16.msra.mxu1 %v115_v32  ;;  %v5540_v40 = vld [vmem:[%s7696_s1 + $0xb8] sm:$0xff]   ;;  %v5541_v41 = vld [vmem:[%s7696_s1 + $0xc0] sm:$0xff]   ;;  %v5542_v42 = vld [vmem:[%s7696_s1 + $0xc8] sm:$0xff]  }
  0x10   :  { %5143 = vmatmul.mubr.msk.bf16.vlgmr.msra.gmra.mxu0 %vm64_vm2, %v54_v8  ;;  %5509 = vmatprep.subr.msk.bf16.mxu1 %vm1489_vm3, %v456_v4  ;;  %v5543_v43 = vld [vmem:[%s7696_s1 + $0xd0] sm:$0xff]   ;;  %v5544_v44 = vld [vmem:[%s7696_s1 + $0xd8] sm:$0xff]   ;;  %v5545_v45 = vld [vmem:[%s7696_s1 + $0xe0] sm:$0xff]  }
  0x11   :  { %5153 = vmatpush3.bf16.msra.mxu0 %v5893_v11  ;;  %5158 = vmatprep.mubr.msk.bf16.mxu0 %vm1104_vm4, %v5517_v9  ;;  %v5546_v46 = vld [vmem:[%s7696_s1 + $0xe8] sm:$0xff]   ;;  %v5547_v47 = vld [vmem:[%s7696_s1 + $0xf0] sm:$0xff]   ;;  %v5548_v48 = vld [vmem:[%s7696_s1 + $0xf8] sm:$0xff]  }
  0x12   :  { %5154 = vmatprep.subr.bf16.mxu0 %v5895_v12  ;;  %v5549_v49 = vld [vmem:[%s7696_s1 + $0x100] sm:$0xff]   ;;  %v5550_v50 = vld [vmem:[%s7696_s1 + $0x108] sm:$0xff]   ;;  %v5551_v51 = vld [vmem:[%s7696_s1 + $0x110] sm:$0xff]  }
  0x13   :  { %v5552_v52 = vld [vmem:[%s7696_s1 + $0x118] sm:$0xff]   ;;  %v5553_v53 = vld [vmem:[%s7696_s1 + $0x120] sm:$0xff]   ;;  %v5554_v54 = vld [vmem:[%s7696_s1 + $0x128] sm:$0xff]  }
  0x14   :  { %v5555_v55 = vld [vmem:[%s7696_s1 + $0x130] sm:$0xff]   ;;  %v5556_v56 = vld [vmem:[%s7696_s1 + $0x138] sm:$0xff]   ;;  %v5557_v57 = vld [vmem:[%s7696_s1 + $0x140] sm:$0xff]  }
  0x15   :  { %5155 = vmatpush3.bf16.msra.mxu0 %v5895_v12  ;;  %v5558_v58 = vld [vmem:[%s7696_s1 + $0x148] sm:$0xff]   ;;  %v5559_v59 = vld [vmem:[%s7696_s1 + $0x150] sm:$0xff]   ;;  %v5560_v60 = vld [vmem:[%s7696_s1 + $0x158] sm:$0xff]  }
  0x16   :  { %5156 = vmatprep.subr.bf16.mxu0 %v5904_v14  ;;  %v5561_v61 = vld [vmem:[%s7696_s1 + $0x160] sm:$0xff]   ;;  %v5562_v62 = vld [vmem:[%s7696_s1 + $0x168] sm:$0xff]   ;;  %v5563_v63 = vld [vmem:[%s7696_s1 + $0x170] sm:$0xff]  }
  0x17   :  { %v4465_v1 = vld [vmem:[%s7698_s3] ss:$0 sm:$0xff]  ;;  %v5564_v3 = vld [vmem:[%s7696_s1 + $0x178] sm:$0xff]   ;;  %v5577_v7 = vld [vmem:[%s7696_s1 + $0x350] sm:$0xff]  }
  0x18   :  { %v5565_v5 = vld [vmem:[%s7696_s1 + $0x180] sm:$0xff]   ;;  %v5566_v13 = vld [vmem:[%s7696_s1 + $0x188] sm:$0xff]  }
  0x19   :  { %5157 = vmatpush3.bf16.msra.mxu0 %v5904_v14  ;;  %v5582_v32 = vld [vmem:[%s7696_s1 + $0x368] sm:$0xff]  }
  0x1c   :  { %5159 = vmatmul.mubr.msk.bf16.vlgmr.msra.gmra.mxu0 %vm1104_vm4, %v5518_v15  ;;  %v5567_v15 = vld [vmem:[%s7696_s1 + $0x190] sm:$0xff]  }
  0x1d   :  { %5162 = vmatprep.mubr.msk.bf16.mxu0 %vm1104_vm4, %v5519_v16 }
  0x24   :  { %5163 = vmatmul.mubr.msk.bf16.gmra.mxu0 %vm1104_vm4, %v5520_v17  ;;  %v5578_v17 = vld [vmem:[%s7696_s1 + $0x358] sm:$0xff]  }
  0x25   :  { %5166 = vmatprep.mubr.msk.bf16.mxu0 %vm1104_vm4, %v5521_v18 }
  0x2c   :  { %5167 = vmatmul.mubr.msk.bf16.gmra.mxu0 %vm1104_vm4, %v5522_v19 }
  0x2d   :  { %5170 = vmatprep.mubr.msk.bf16.mxu0 %vm1104_vm4, %v5523_v20 }
  0x34   :  { %5171 = vmatmul.mubr.msk.bf16.gmra.mxu0 %vm1104_vm4, %v5524_v21  ;;  %v5568_v21 = vld [vmem:[%s7696_s1 + $0x198] sm:$0xff]  }
  0x35   :  { %5174 = vmatprep.mubr.msk.bf16.mxu0 %vm1104_vm4, %v5525_v22 }
  0x3c   :  { %5175 = vmatmul.mubr.msk.bf16.gmra.mxu0 %vm1104_vm4, %v5526_v23 }
  0x3d   :  { %5178 = vmatprep.mubr.msk.bf16.mxu0 %vm1104_vm4, %v5527_v24  ;;  %v5569_v24 = vld [vmem:[%s7696_s1 + $0x1a0] sm:$0xff]  }
  0x44   :  { %5179 = vmatmul.mubr.msk.bf16.gmra.mxu0 %vm1104_vm4, %v5528_v25 }
  0x45   :  { %5182 = vmatprep.mubr.msk.bf16.mxu0 %vm1104_vm4, %v5529_v26 }
  0x4c   :  { %5183 = vmatmul.mubr.msk.bf16.gmra.mxu0 %vm1104_vm4, %v5530_v27 }
  0x4d   :  { %5186 = vmatprep.mubr.msk.bf16.mxu0 %vm1104_vm4, %v5531_v28 }
  0x54   :  { %5187 = vmatmul.mubr.msk.bf16.gmra.mxu0 %vm1104_vm4, %v5532_v29 }
  0x55   :  { %5190 = vmatprep.mubr.msk.bf16.mxu0 %vm1104_vm4, %v5533_v33 }
  0x5c   :  { %5191 = vmatmul.mubr.msk.bf16.gmra.mxu0 %vm1104_vm4, %v5534_v34  ;;  %v5585_v34 = vld [vmem:[%s7696_s1 + $0x370] sm:$0xff]  }
  0x5d   :  { %5194 = vmatprep.mubr.msk.bf16.mxu0 %vm1104_vm4, %v5535_v35 }
  0x64   :  { %5195 = vmatmul.mubr.msk.bf16.gmra.mxu0 %vm1104_vm4, %v5536_v36 }
  0x65   :  { %5198 = vmatprep.mubr.msk.bf16.mxu0 %vm1104_vm4, %v5537_v37 }
  0x6c   :  { %5199 = vmatmul.mubr.msk.bf16.gmra.mxu0 %vm1104_vm4, %v5538_v38  ;;  %v5570_v38 = vld [vmem:[%s7696_s1 + $0x1a8] sm:$0xff]  }
  0x6d   :  { %5202 = vmatprep.mubr.msk.bf16.mxu0 %vm1104_vm4, %v5539_v39 }
  0x74   :  { %5203 = vmatmul.mubr.msk.bf16.gmra.mxu0 %vm1104_vm4, %v5540_v40 }
  0x75   :  { %5206 = vmatprep.mubr.msk.bf16.mxu0 %vm1104_vm4, %v5541_v41  ;;  %v5571_v41 = vld [vmem:[%s7696_s1 + $0x1b0] sm:$0xff]  }
  0x7c   :  { %5207 = vmatmul.mubr.msk.bf16.gmra.mxu0 %vm1104_vm4, %v5542_v42 }
  0x7d   :  { %5210 = vmatprep.mubr.msk.bf16.mxu0 %vm1104_vm4, %v5543_v43 }
  0x84   :  { %5211 = vmatmul.mubr.msk.bf16.gmra.mxu0 %vm1104_vm4, %v5544_v44 }
  0x85   :  { %5214 = vmatprep.mubr.msk.bf16.mxu0 %vm1104_vm4, %v5545_v45 }
  0x8c   :  { %5215 = vmatmul.mubr.msk.bf16.gmra.mxu0 %vm1104_vm4, %v5546_v46 }
  0x8d   :  { %5218 = vmatprep.mubr.msk.bf16.mxu0 %vm1104_vm4, %v5547_v47 }
  0x94   :  { %5219 = vmatmul.mubr.msk.bf16.gmra.mxu0 %vm1104_vm4, %v5548_v48 }
  0x95   :  { %5222 = vmatprep.mubr.msk.bf16.mxu0 %vm1104_vm4, %v5549_v49 }
  0x9c   :  { %5223 = vmatmul.mubr.msk.bf16.gmra.mxu0 %vm1104_vm4, %v5550_v50  ;;  %v5586_v50 = vld [vmem:[%s7696_s1 + $0x378] sm:$0xff]  }
  0x9d   :  { %5226 = vmatprep.mubr.msk.bf16.mxu0 %vm1104_vm4, %v5551_v51 }
  0xa4   :  { %5227 = vmatmul.mubr.msk.bf16.gmra.mxu0 %vm1104_vm4, %v5552_v52  ;;  %v5589_v52 = vld [vmem:[%s7696_s1 + $0x380] sm:$0xff]  }
  0xa5   :  { %5230 = vmatprep.mubr.msk.bf16.mxu0 %vm1104_vm4, %v5553_v53 }
  0xac   :  { %5231 = vmatmul.mubr.msk.bf16.gmra.mxu0 %vm1104_vm4, %v5554_v54 }
  0xad   :  { %5234 = vmatprep.mubr.msk.bf16.mxu0 %vm1104_vm4, %v5555_v55  ;;  %v5572_v55 = vld [vmem:[%s7696_s1 + $0x1b8] sm:$0xff]  }
  0xb4   :  { %5235 = vmatmul.mubr.msk.bf16.gmra.mxu0 %vm1104_vm4, %v5556_v56  ;;  %v5573_v56 = vld [vmem:[%s7696_s1 + $0x1c0] sm:$0xff]  }
  0xb5   :  { %5238 = vmatprep.mubr.msk.bf16.mxu0 %vm1104_vm4, %v5557_v57 }
  0xbc   :  { %5239 = vmatmul.mubr.msk.bf16.gmra.mxu0 %vm1104_vm4, %v5558_v58 }
  0xbd   :  { %5242 = vmatprep.mubr.msk.bf16.mxu0 %vm1104_vm4, %v5559_v59  ;;  %v5590_v59 = vld [vmem:[%s7696_s1 + $0x388] sm:$0xff]  }
  0xc4   :  { %5243 = vmatmul.mubr.msk.bf16.gmra.mxu0 %vm1104_vm4, %v5560_v60 }
  0xc5   :  { %5246 = vmatprep.mubr.msk.bf16.mxu0 %vm1104_vm4, %v5561_v61  ;;  %v5593_v61 = vld [vmem:[%s7696_s1 + $0x390] sm:$0xff]  }
  0xcc   :  { %5247 = vmatmul.mubr.msk.bf16.gmra.mxu0 %vm1104_vm4, %v5562_v62 }
  0xcd   :  { %5250 = vmatprep.mubr.msk.bf16.mxu0 %vm1104_vm4, %v5563_v63  ;;  %v5574_v63 = vld [vmem:[%s7696_s1 + $0x1c8] sm:$0xff]  }
  0xd0   :  { %v106_v2 = vpop.f32.mrf.mxu0 }
  0xd1   :  { %v107_v4 = vadd.f32 %v4465_v1, %v106_v2  ;;  %v5575_v1 = vld [vmem:[%s7696_s1 + $0x1d0] sm:$0xff]  }
  0xd2   :  { %v5144_v6 = vpop.f32.mrf.mxu0 }
  0xd3   :  { %v114_v8 = vpack.c.bf16 %v107_v4, %v107_v4  ;;  %v5594_v4 = vld [vmem:[%s7696_s1 + $0x398] sm:$0xff]   ;;  %v5597_v6 = vld [vmem:[%s7696_s1 + $0x3a0] sm:$0xff]  }
  0xd4   :  { %v109_v9 = vpop.f32.mrf.mxu0  ;;  %5251 = vmatmul.mubr.msk.bf16.gmra.mxu0 %vm1104_vm4, %v5564_v3 }
  0xd5   :  { %5149 = vmatmul.mubr.msk.bf16.vlgmr.msra.gmra.mxu1 %vm123_vm5, %v114_v8  ;;  %5254 = vmatprep.mubr.msk.bf16.mxu0 %vm1104_vm4, %v5565_v5  ;;  %v5576_v8 = vld [vmem:[%s7696_s1 + $0x1d8] sm:$0xff]   ;;  %v5579_v9 = vld [vmem:[%s7696_s1 + $0x1e0] sm:$0xff]  }
  0xd6   :  { %v5145_v10 = vpop.f32.mrf.mxu0  ;;  %5505 = vmatpush3.bf16.msra.mxu1 %v5893_v11  ;;  %5370 = vmatprep.mubr.msk.bf16.mxu1 %vm1104_vm4, %v5577_v7  ;;  %v6129_v11 = vld [vmem:[%s7699_s5] ss:$0 sm:$0xff] }
  0xd7   :  { %5503 = vmatprep.subr.bf16.mxu1 %v5895_v12 }
  0xda   :  { %5506 = vmatpush3.bf16.msra.mxu1 %v5895_v12  ;;  %v5581_v12 = vld [vmem:[%s7696_s1 + $0x360] sm:$0xff]  }
  0xdb   :  { %5504 = vmatprep.subr.bf16.mxu1 %v5904_v14 }
  0xdc   :  { %v5160_v16 = vpop.f32.mrf.mxu0  ;;  %5255 = vmatmul.mubr.msk.bf16.gmra.mxu0 %vm1104_vm4, %v5566_v13 }
  0xdd   :  { %5258 = vmatprep.mubr.msk.bf16.mxu0 %vm1104_vm4, %v5567_v15  ;;  %v1536_v19 = vadd.f32 %v5160_v16, %v6129_v11  ;;  %v5598_v15 = vld [vmem:[%s7696_s1 + $0x3a8] sm:$0xff]  }
  0xde   :  { %v1527_v18 = vpop.f32.mrf.mxu0  ;;  %5507 = vmatpush3.bf16.msra.mxu1 %v5904_v14 }
  0xdf   :  { %v1528_v22 = vadd.f32 %v6129_v11, %v1527_v18  ;;  %v2552_v25 = vmax.f32 %v1536_v19, 0.0  ;;  %v5583_v19 = vld [vmem:[%s7696_s1 + $0x1f0] sm:$0xff]  }
  0xe0   :  { %v5161_v20 = vpop.f32.mrf.mxu0 }
  0xe1   :  { %v1539_v23 = vadd.f32 %v5161_v20, %v6129_v11  ;;  %5371 = vmatmul.mubr.msk.bf16.vlgmr.msra.gmra.mxu1 %vm1104_vm4, %v5578_v17  ;;  %v2550_v29 = vmax.f32 %v1528_v22, 0.0  ;;  %v5601_v17 = vld [vmem:[%s7696_s1 + $0x3b0] sm:$0xff]   ;;  %v5602_v22 = vld [vmem:[%s7696_s1 + $0x3b8] sm:$0xff]  }
  0xe2   :  { %v1530_v14 = vpop.f32.mrf.mxu0  ;;  %5374 = vmatprep.mubr.msk.bf16.mxu1 %vm1104_vm4, %v5581_v12  ;;  %v5580_v12 = vld [vmem:[%s7696_s1 + $0x1e8] sm:$0xff]  }
  0xe3   :  { %v2553_v26 = vmax.f32 %v1539_v23, 0.0  ;;  %v1531_v27 = vadd.f32 %v6129_v11, %v1530_v14 }
  0xe4   :  { %v5164_v28 = vpop.f32.mrf.mxu0  ;;  %5259 = vmatmul.mubr.msk.bf16.gmra.mxu0 %vm1104_vm4, %v5568_v21 }
  0xe5   :  { %v6153_v30 = vpack.c.bf16 %v2553_v26, %v2552_v25  ;;  %v2551_v31 = vmax.f32 %v1531_v27, 0.0  ;;  %5262 = vmatprep.mubr.msk.bf16.mxu0 %vm1104_vm4, %v5569_v24  ;;  %v1552_v36 = vadd.f32 %v5164_v28, %v6129_v11  ;;  %v5605_v24 = vld [vmem:[%s7696_s1 + $0x3c0] sm:$0xff]   ;;  %v5584_v25 = vld [vmem:[%s7696_s1 + $0x1f8] sm:$0xff]  }
  0xe6   :  { %v1543_v33 = vpop.f32.mrf.mxu0  ;;  %v5587_v26 = vld [vmem:[%s7696_s1 + $0x200] sm:$0xff]  }
  0xe7   :  { %v6162_v35 = vpack.c.bf16 %v2551_v31, %v2550_v29  ;;  %v1544_v39 = vadd.f32 %v6129_v11, %v1543_v33  ;;  %v2556_v43 = vmax.f32 %v1552_v36, 0.0  ;;  %v5606_v29 = vld [vmem:[%s7696_s1 + $0x3c8] sm:$0xff]   ;;  %v5609_v33 = vld [vmem:[%s7696_s1 + $0x3d0] sm:$0xff]   ;;  %v172_v36 = vlaneseq }
  0xe8   :  { %v5165_v37 = vpop.f32.mrf.mxu0 }
  0xe9   :  { %v1555_v40 = vadd.f32 %v5165_v37, %v6129_v11  ;;  %5375 = vmatmul.mubr.msk.bf16.gmra.mxu1 %vm1104_vm4, %v5582_v32  ;;  %v2554_v47 = vmax.f32 %v1544_v39, 0.0  ;;  %v5588_v39 = vld [vmem:[%s7696_s1 + $0x208] sm:$0xff]  }
  0xea   :  { %v1546_v42 = vpop.f32.mrf.mxu0  ;;  %5378 = vmatprep.mubr.msk.bf16.mxu1 %vm1104_vm4, %v5585_v34 }
  0xeb   :  { %v2557_v44 = vmax.f32 %v1555_v40, 0.0  ;;  %v1547_v45 = vadd.f32 %v6129_v11, %v1546_v42  ;;  %v5591_v42 = vld [vmem:[%s7696_s1 + $0x210] sm:$0xff]  }
  0xec   :  { %v6176_v46 = vpop.f32.mrf.mxu0  ;;  %5263 = vmatmul.mubr.msk.bf16.gmra.mxu0 %vm1104_vm4, %v5570_v38 }
  0xed   :  { %v6179_v48 = vpack.c.bf16 %v2557_v44, %v2556_v43  ;;  %v2555_v49 = vmax.f32 %v1547_v45, 0.0  ;;  %5266 = vmatprep.mubr.msk.bf16.mxu0 %vm1104_vm4, %v5571_v41 }
  0xee   :  { %v6185_v51 = vpop.f32.mrf.mxu0 }
  0xef   :  { %v6190_v53 = vpack.c.bf16 %v2555_v49, %v2554_v47 }
  0xf0   :  { %v6192_v54 = vpop.f32.mrf.mxu0 }
  0xf1   :  { %5379 = vmatmul.mubr.msk.bf16.gmra.mxu1 %vm1104_vm4, %v5586_v50 }
  0xf2   :  { %v6201_v57 = vpop.f32.mrf.mxu0  ;;  %5382 = vmatprep.mubr.msk.bf16.mxu1 %vm1104_vm4, %v5589_v52 }
  0xf4   :  { %v5172_v58 = vpop.f32.mrf.mxu0  ;;  %5267 = vmatmul.mubr.msk.bf16.gmra.mxu0 %vm1104_vm4, %v5572_v55  ;;  %v6312_v55 = vshrl.u32 %v172_v36, 7 }
  0xf5   :  { %5270 = vmatprep.mubr.msk.bf16.mxu0 %vm1104_vm4, %v5573_v56  ;;  %v1584_v37 = vadd.f32 %v5172_v58, %v6129_v11 }
  0xf6   :  { %v6209_v60 = vpop.f32.mrf.mxu0 }
  0xf7   :  { %v2564_v56 = vmax.f32 %v1584_v37, 0.0  ;;  %v1576_v58 = vadd.f32 %v6129_v11, %v6209_v60 }
  0xf8   :  { %v5173_v62 = vpop.f32.mrf.mxu0 }
  0xf9   :  { %5383 = vmatmul.mubr.msk.bf16.gmra.mxu1 %vm1104_vm4, %v5590_v59  ;;  %v1587_v31 = vadd.f32 %v5173_v62, %v6129_v11  ;;  %v6318_v62 = vand.u32 127, %v172_v36 }
  0xfa   :  { %v1578_v2 = vpop.f32.mrf.mxu0  ;;  %5386 = vmatprep.mubr.msk.bf16.mxu1 %vm1104_vm4, %v5593_v61 }
  0xfb   :  { %v2565_v43 = vmax.f32 %v1587_v31, 0.0  ;;  %v1579_v44 = vadd.f32 %v6129_v11, %v1578_v2 }
  0xfc   :  { %v6222_v3 = vpop.f32.mrf.mxu0  ;;  %5271 = vmatmul.mubr.msk.bf16.gmra.mxu0 %vm1104_vm4, %v5574_v63  ;;  %v1571_v63 = vadd.f32 %v6192_v54, %v6129_v11 }
  0xfd   :  { %5274 = vmatprep.mubr.msk.bf16.mxu0 %vm1104_vm4, %v5575_v1  ;;  %v2914_v60 = vpack.c.bf16 %v2565_v43, %v2564_v56  ;;  %v1560_v43 = vadd.f32 %v6129_v11, %v6185_v51  ;;  %v5614_v51 = vld [vmem:[%s7696_s1 + $0x3e8] sm:$0xff]  }
  0xfe   :  { %v6229_v5 = vpop.f32.mrf.mxu0 }
 0x100   :  { %v6234_v7 = vpop.f32.mrf.mxu0 }
 0x101   :  { %5387 = vmatmul.mubr.msk.bf16.gmra.mxu1 %vm1104_vm4, %v5594_v4 }
 0x102   :  { %v6243_v10 = vpop.f32.mrf.mxu0  ;;  %5390 = vmatprep.mubr.msk.bf16.mxu1 %vm1104_vm4, %v5597_v6  ;;  %v5610_v6 = vld [vmem:[%s7696_s1 + $0x3d8] sm:$0xff]  }
 0x104   :  { %v6246_v13 = vpop.f32.mrf.mxu0  ;;  %5275 = vmatmul.mubr.msk.bf16.gmra.mxu0 %vm1104_vm4, %v5576_v8  ;;  %v2563_v8 = vmax.f32 %v1579_v44, 0.0 }
 0x105   :  { %5278 = vmatprep.mubr.msk.bf16.mxu0 %vm1104_vm4, %v5579_v9 }
 0x106   :  { %v6253_v16 = vpop.f32.mrf.mxu0 }
 0x108   :  { %v6258_v18 = vpop.f32.mrf.mxu0 }
 0x109   :  { %5391 = vmatmul.mubr.msk.bf16.gmra.mxu1 %vm1104_vm4, %v5598_v15  ;;  %v1619_v36 = vadd.f32 %v6258_v18, %v6129_v11 }
 0x10a   :  { %v6267_v20 = vpop.f32.mrf.mxu0  ;;  %5394 = vmatprep.mubr.msk.bf16.mxu1 %vm1104_vm4, %v5601_v17  ;;  %v5613_v17 = vld [vmem:[%s7696_s1 + $0x3e0] sm:$0xff]  }
 0x10b   :  { %v2573_v56 = vmax.f32 %v1619_v36, 0.0 }
 0x10c   :  { %v5184_v21 = vpop.f32.mrf.mxu0  ;;  %5279 = vmatmul.mubr.msk.bf16.gmra.mxu0 %vm1104_vm4, %v5580_v12 }
 0x10d   :  { %5282 = vmatprep.mubr.msk.bf16.mxu0 %vm1104_vm4, %v5583_v19  ;;  %v1632_v59 = vadd.f32 %v5184_v21, %v6129_v11  ;;  %v6332_v21 = vmul.u32 256, %v6312_v55 }
 0x10e   :  { %v6275_v23 = vpop.f32.mrf.mxu0 }
 0x10f   :  { %v6362_v18 = vadd.s32 256, %v6332_v21  ;;  %vm2826_vm10 = vcmp.ge.s32.totalorder %v6318_v62, %v6332_v21 }
 0x110   :  { %v5185_v14 = vpop.f32.mrf.mxu0 }
 0x111   :  { %5395 = vmatmul.mubr.msk.bf16.gmra.mxu1 %vm1104_vm4, %v5602_v22  ;;  %v1635_v45 = vadd.f32 %v5185_v14, %v6129_v11  ;;  %v1568_v22 = vadd.f32 %v6176_v46, %v6129_v11  ;;  %v2576_v14 = vmax.f32 %v1632_v59, 0.0  ;;  %v5595_v46 = vld [vmem:[%s7696_s1 + $0x220] sm:$0xff]   ;;  %v5617_v59 = vld [vmem:[%s7696_s1 + $0x3f0] sm:$0xff]   ;;  %vm2843_vm11 = vcmp.lt.s32.totalorder %v6318_v62, %v6362_v18 }
 0x112   :  { %v1626_v27 = vpop.f32.mrf.mxu0  ;;  %5398 = vmatprep.mubr.msk.bf16.mxu1 %vm1104_vm4, %v5605_v24  ;;  %v2562_v24 = vmax.f32 %v1576_v58, 0.0  ;;  %vm2859_vm14 = vmand %vm2826_vm10, %vm2843_vm11 }
 0x113   :  { %v2577_v9 = vmax.f32 %v1635_v45, 0.0  ;;  %v1627_v12 = vadd.f32 %v6129_v11, %v1626_v27  ;;  %v6340_v27 = vadd.s32 128, %v6318_v62  ;;  %vm4730_vm0 = vmpackc.low %vm2859_vm14, %vm2859_vm14 }
 0x114   :  { %v5188_v28 = vpop.f32.mrf.mxu0  ;;  %5283 = vmatmul.mubr.msk.bf16.gmra.mxu0 %vm1104_vm4, %v5584_v25 }
 0x115   :  { %5286 = vmatprep.mubr.msk.bf16.mxu0 %vm1104_vm4, %v5587_v26  ;;  %v1648_v34 = vadd.f32 %v5188_v28, %v6129_v11  ;;  %v5592_v26 = vld [vmem:[%s7696_s1 + $0x218] sm:$0xff]   ;;  %v2561_v28 = vmax.f32 %v1571_v63, 0.0  ;;  %v2920_v37 = vpack.c.bf16 %v2577_v9, %v2576_v14  ;;  %vm2827_vm6 = vcmp.ge.s32.totalorder %v6340_v27, %v6332_v21 }
 0x116   :  { %v1639_v32 = vpop.f32.mrf.mxu0  ;;  %vm2844_vm7 = vcmp.lt.s32.totalorder %v6340_v27, %v6362_v18  ;;  %v1595_v27 = vadd.f32 %v6129_v11, %v6243_v10  ;;  %v5603_v10 = vld [vmem:[%s7696_s1 + $0x240] sm:$0xff]  }
 0x117   :  { %v1640_v40 = vadd.f32 %v6129_v11, %v1639_v32  ;;  %v2580_v49 = vmax.f32 %v1648_v34, 0.0  ;;  %v2913_v34 = vpack.c.bf16 %v2563_v8, %v2562_v24  ;;  %v5596_v8 = vld [vmem:[%s7696_s1 + $0x228] sm:$0xff]   ;;  %vm6408_vm8 = vmand %vm2827_vm6, %vm2844_vm7 }
 0x118   :  { %v5189_v38 = vpop.f32.mrf.mxu0  ;;  %vm4728_vm9 = vmpackc.low %vm6408_vm8, %vm6408_vm8 }
 0x119   :  { %v1651_v41 = vadd.f32 %v5189_v38, %v6129_v11  ;;  %5399 = vmatmul.mubr.msk.bf16.gmra.mxu1 %vm1104_vm4, %v5606_v29  ;;  %v2578_v1 = vmax.f32 %v1640_v40, 0.0  ;;  %v1624_v29 = vadd.f32 %v6129_v11, %v6275_v23  ;;  %v2575_v38 = vmax.f32 %v1627_v12, 0.0 }
 0x11a   :  { %v1642_v47 = vpop.f32.mrf.mxu0  ;;  %5402 = vmatprep.mubr.msk.bf16.mxu1 %vm1104_vm4, %v5609_v33  ;;  %v1563_v33 = vadd.f32 %v6129_v11, %v6201_v57  ;;  %v1616_v57 = vadd.f32 %v6246_v13, %v6129_v11 }
 0x11b   :  { %v2581_v50 = vmax.f32 %v1651_v41, 0.0  ;;  %v1643_v52 = vadd.f32 %v6129_v11, %v1642_v47  ;;  %v2574_v45 = vmax.f32 %v1624_v29, 0.0 }
 0x11c   :  { %v5192_v61 = vpop.f32.mrf.mxu0  ;;  %5287 = vmatmul.mubr.msk.bf16.gmra.mxu0 %vm1104_vm4, %v5588_v39 }
 0x11d   :  { %v2922_v2 = vpack.c.bf16 %v2581_v50, %v2580_v49  ;;  %v2579_v4 = vmax.f32 %v1643_v52, 0.0  ;;  %5290 = vmatprep.mubr.msk.bf16.mxu0 %vm1104_vm4, %v5591_v42  ;;  %v1664_v54 = vadd.f32 %v5192_v61, %v6129_v11  ;;  %v2560_v42 = vmax.f32 %v1568_v22, 0.0 }
 0x11e   :  { %v1655_v15 = vpop.f32.mrf.mxu0  ;;  %v2559_v52 = vmax.f32 %v1563_v33, 0.0  ;;  %v1611_v61 = vadd.f32 %v6129_v11, %v6267_v20  ;;  %v1608_v20 = vadd.f32 %v6129_v11, %v6253_v16 }
 0x11f   :  { %4930 = vmatprep.subr.bf16.mxu1 %v2922_v2  ;;  %v2921_v19 = vpack.c.bf16 %v2579_v4, %v2578_v1  ;;  %v1656_v31 = vadd.f32 %v6129_v11, %v1655_v15  ;;  %v2584_v39 = vmax.f32 %v1664_v54, 0.0  ;;  %v2912_v13 = vpack.c.bf16 %v2561_v28, %v2560_v42 }
 0x120   :  { %v5193_v25 = vpop.f32.mrf.mxu0  ;;  %4931 = vmatpush3.bf16.msra.mxu1 %v2914_v60  ;;  %v2919_v2 = vpack.c.bf16 %v2575_v38, %v2574_v45  ;;  %v2558_v4 = vmax.f32 %v1560_v43, 0.0  ;;  %v1603_v54 = vadd.f32 %v6234_v7, %v6129_v11  ;;  %v2571_v16 = vmax.f32 %v1611_v61, 0.0  ;;  %v5600_v38 = vld [vmem:[%s7696_s1 + $0x238] sm:$0xff]  }
 0x121   :  { %v1667_v32 = vadd.f32 %v5193_v25, %v6129_v11  ;;  %4932 = vmatprep.subr.bf16.mxu1 %v2921_v19  ;;  %5403 = vmatmul.mubr.msk.bf16.gmra.mxu1 %vm1104_vm4, %v5610_v6  ;;  %v2582_v47 = vmax.f32 %v1656_v31, 0.0  ;;  %v2572_v6 = vmax.f32 %v1616_v57, 0.0  ;;  %v2570_v29 = vmax.f32 %v1608_v20, 0.0 }
 0x122   :  { %v1658_v23 = vpop.f32.mrf.mxu0  ;;  %5406 = vmatprep.mubr.msk.bf16.mxu1 %vm1104_vm4, %v5613_v17  ;;  %v5599_v17 = vld [vmem:[%s7696_s1 + $0x230] sm:$0xff]   ;;  %v2911_v12 = vpack.c.bf16 %v2559_v52, %v2558_v4  ;;  %v7714_v42 = vmov 1.0|1.0   ;;  %v2567_v43 = vmax.f32 %v1595_v27, 0.0  ;;  %v2810_v57 = vadd.s32 384, %v6318_v62  ;;  %v5612_v4 = vld [vmem:[%s7696_s1 + $0x268] sm:$0xff]  }
 0x123   :  { %v2585_v40 = vmax.f32 %v1667_v32, 0.0  ;;  %v1659_v41 = vadd.f32 %v6129_v11, %v1658_v23  ;;  %v2918_v19 = vpack.c.bf16 %v2573_v56, %v2572_v6  ;;  %v5615_v6 = vld [vmem:[%s7696_s1 + $0x270] sm:$0xff]  }
 0x124   :  { %v5196_v44 = vpop.f32.mrf.mxu0  ;;  %5291 = vmatmul.mubr.msk.bf16.gmra.mxu0 %vm1104_vm4, %v5592_v26  ;;  %4933 = vmatpush3.bf16.msra.mxu1 %v2913_v34  ;;  %v1600_v26 = vadd.f32 %v6222_v3, %v6129_v11  ;;  %v2569_v34 = vmax.f32 %v1603_v54, 0.0  ;;  %vm2829_vm12 = vcmp.ge.s32.totalorder %v2810_v57, %v6332_v21  ;;  %vm2846_vm13 = vcmp.lt.s32.totalorder %v2810_v57, %v6362_v18 }
 0x125   :  { %v6364_v49 = vpack.c.bf16 %v2585_v40, %v2584_v39  ;;  %v2583_v50 = vmax.f32 %v1659_v41, 0.0  ;;  %4934 = vmatprep.subr.bf16.mxu1 %v2920_v37  ;;  %5294 = vmatprep.mubr.msk.bf16.mxu0 %vm1104_vm4, %v5595_v46  ;;  %v1680_v1 = vadd.f32 %v5196_v44, %v6129_v11  ;;  %v5618_v46 = vld [vmem:[%s7696_s1 + $0x3f8] sm:$0xff]   ;;  %v2917_v37 = vpack.c.bf16 %v2571_v16, %v2570_v29  ;;  %vm2862_vm15 = vmand %vm2829_vm12, %vm2846_vm13  ;;  %v5621_v29 = vld [vmem:[%s7696_s1 + $0x290] sm:$0xff]  }
 0x126   :  { %v1671_v58 = vpop.f32.mrf.mxu0  ;;  %v2568_v39 = vmax.f32 %v1600_v26, 0.0  ;;  %v1592_v40 = vadd.f32 %v6129_v11, %v6229_v5  ;;  %vm4732_vm2 = vmpackc.low %vm2862_vm15, %vm2862_vm15 }
 0x127   :  { %v6375_v63 = vpack.c.bf16 %v2583_v50, %v2582_v47  ;;  %v1672_v9 = vadd.f32 %v6129_v11, %v1671_v58  ;;  %v2588_v24 = vmax.f32 %v1680_v1, 0.0  ;;  %v5608_v58 = vld [vmem:[%s7696_s1 + $0x258] sm:$0xff]  }
 0x128   :  { %v5197_v60 = vpop.f32.mrf.mxu0  ;;  %4935 = vmatpush3.bf16.msra.mxu1 %v2912_v13  ;;  %v2566_v5 = vmax.f32 %v1592_v40, 0.0 }
 0x129   :  { %v1683_v15 = vadd.f32 %v5197_v60, %v6129_v11  ;;  %4936 = vmatprep.subr.bf16.mxu1 %v2919_v2  ;;  %5407 = vmatmul.mubr.msk.bf16.gmra.mxu1 %vm1104_vm4, %v5614_v51  ;;  %v2586_v31 = vmax.f32 %v1672_v9, 0.0  ;;  %v5607_v51 = vld [vmem:[%s7696_s1 + $0x250] sm:$0xff]  }
 0x12a   :  { %v1674_v22 = vpop.f32.mrf.mxu0  ;;  %5410 = vmatprep.mubr.msk.bf16.mxu1 %vm1104_vm4, %v5617_v59  ;;  %v2915_v47 = vpack.c.bf16 %v2567_v43, %v2566_v5 }
 0x12b   :  { %v2589_v14 = vmax.f32 %v1683_v15, 0.0  ;;  %v1675_v25 = vadd.f32 %v6129_v11, %v1674_v22  ;;  %v5616_v15 = vld [vmem:[%s7696_s1 + $0x278] sm:$0xff]  }
 0x12c   :  { %v6399_v28 = vpop.f32.mrf.mxu0  ;;  %5295 = vmatmul.mubr.msk.bf16.gmra.mxu0 %vm1104_vm4, %v5596_v8  ;;  %4937 = vmatpush3.bf16.msra.mxu1 %v2911_v12 }
 0x12d   :  { %v6412_v32 = vpack.c.bf16 %v2589_v14, %v2588_v24  ;;  %v2587_v3 = vmax.f32 %v1675_v25, 0.0  ;;  %4938 = vmatprep.subr.bf16.mxu1 %v2918_v19  ;;  %5298 = vmatprep.mubr.msk.bf16.mxu0 %vm1104_vm4, %v5599_v17  ;;  %v5619_v17 = vld [vmem:[%s7696_s1 + $0x280] sm:$0xff]   ;;  %v5620_v25 = vld [vmem:[%s7696_s1 + $0x288] sm:$0xff]  }
 0x12e   :  { %v6418_v33 = vpop.f32.mrf.mxu0 }
 0x12f   :  { %v6422_v36 = vpack.c.bf16 %v2587_v3, %v2586_v31 }
 0x130   :  { %v6427_v23 = vpop.f32.mrf.mxu0  ;;  %4939 = vmatpush3.bf16.msra.mxu1 %v6179_v48  ;;  %v2916_v48 = vpack.c.bf16 %v2569_v34, %v2568_v39 }
 0x131   :  { %4940 = vmatprep.subr.bf16.mxu1 %v2917_v37  ;;  %5411 = vmatmul.mubr.msk.bf16.gmra.mxu1 %vm1104_vm4, %v5618_v46  ;;  %v1699_v43 = vadd.f32 %v6427_v23, %v6129_v11 }
 0x132   :  { %v6439_v41 = vpop.f32.mrf.mxu0  ;;  %4729 = vmatprep.mubr.msk.bf16.mxu1 %vm4728_vm9, %v7714_v42 }
 0x134   :  { %v5204_v44 = vpop.f32.mrf.mxu0  ;;  %5299 = vmatmul.mubr.msk.bf16.gmra.mxu0 %vm1104_vm4, %v5600_v38  ;;  %4941 = vmatpush3.bf16.msra.mxu1 %v6190_v53  ;;  %v5604_v53 = vld [vmem:[%s7696_s1 + $0x248] sm:$0xff]  }
 0x135   :  { %4942 = vmatprep.subr.bf16.mxu1 %v2916_v48  ;;  %5302 = vmatprep.mubr.msk.bf16.mxu0 %vm1104_vm4, %v5603_v10  ;;  %v1712_v24 = vadd.f32 %v5204_v44, %v6129_v11 }
 0x136   :  { %v6446_v45 = vpop.f32.mrf.mxu0 }
 0x137   :  { %v2596_v39 = vmax.f32 %v1712_v24, 0.0  ;;  %v1704_v40 = vadd.f32 %v6129_v11, %v6446_v45 }
 0x138   :  { %v5205_v50 = vpop.f32.mrf.mxu0  ;;  %4943 = vmatpush3.bf16.msra.mxu1 %v6153_v30 }
 0x139   :  { %4944 = vmatprep.subr.bf16.mxu1 %v2915_v47  ;;  %v1715_v19 = vadd.f32 %v5205_v50, %v6129_v11 }
 0x13a   :  { %v1706_v13 = vpop.f32.mrf.mxu0 }
 0x13b   :  { %v2597_v31 = vmax.f32 %v1715_v19, 0.0  ;;  %v1707_v3 = vadd.f32 %v6129_v11, %v1706_v13 }
 0x13c   :  { %v6461_v52 = vpop.f32.mrf.mxu0  ;;  %5303 = vmatmul.mubr.msk.bf16.gmra.mxu0 %vm1104_vm4, %v5604_v53  ;;  %4945 = vmatpush3.bf16.msra.mxu1 %v6162_v35  ;;  %v5611_v35 = vld [vmem:[%s7696_s1 + $0x260] sm:$0xff]  }
 0x13d   :  { %5306 = vmatprep.mubr.msk.bf16.mxu0 %vm1104_vm4, %v5607_v51  ;;  %v2930_v47 = vpack.c.bf16 %v2597_v31, %v2596_v39  ;;  %v2595_v50 = vmax.f32 %v1707_v3, 0.0 }
 0x13e   :  { %v6466_v30 = vpop.f32.mrf.mxu0 }
 0x13f   :  { %4731 = vmatmul.mubr.msk.bf16.vlgmr.msra.gmra.mxu1 %vm4730_vm0, %v7714_v42 }
 0x140   :  { %v6469_v56 = vpop.f32.mrf.mxu0  ;;  %4733 = vmatprep.mubr.msk.bf16.mxu1 %vm4732_vm2, %v7714_v42 }
 0x142   :  { %v6478_v59 = vpop.f32.mrf.mxu0 }
 0x144   :  { %v6480_v61 = vpop.f32.mrf.mxu0  ;;  %5307 = vmatmul.mubr.msk.bf16.gmra.mxu0 %vm1104_vm4, %v5608_v58 }
 0x145   :  { %5310 = vmatprep.mubr.msk.bf16.mxu0 %vm1104_vm4, %v5611_v35  ;;  %v1696_v35 = vadd.f32 %v6399_v28, %v6129_v11  ;;  %v5623_v28 = vld [vmem:[%s7696_s1 + $0x2a0] sm:$0xff]   ;;  %v1744_v31 = vadd.f32 %v6480_v61, %v6129_v11 }
 0x146   :  { %v6484_v1 = vpop.f32.mrf.mxu0 }
 0x148   :  { %v6486_v2 = vpop.f32.mrf.mxu0 }
 0x14a   :  { %v6494_v60 = vpop.f32.mrf.mxu0 }
 0x14c   :  { %v5216_v8 = vpop.f32.mrf.mxu0  ;;  %5311 = vmatmul.mubr.msk.bf16.gmra.mxu0 %vm1104_vm4, %v5612_v4  ;;  %v2594_v4 = vmax.f32 %v1704_v40, 0.0 }
 0x14d   :  { %5314 = vmatprep.mubr.msk.bf16.mxu0 %vm1104_vm4, %v5615_v6  ;;  %v1760_v10 = vadd.f32 %v5216_v8, %v6129_v11  ;;  %v5622_v8 = vld [vmem:[%s7696_s1 + $0x298] sm:$0xff]  }
 0x14e   :  { %v1751_v20 = vpop.f32.mrf.mxu0  ;;  %v2929_v19 = vpack.c.bf16 %v2595_v50, %v2594_v4  ;;  %v5625_v50 = vld [vmem:[%s7696_s1 + $0x2b0] sm:$0xff]  }
 0x14f   :  { %v2608_v23 = vmax.f32 %v1760_v10, 0.0 }
 0x150   :  { %v5217_v9 = vpop.f32.mrf.mxu0 }
 0x151   :  { %v1763_v46 = vadd.f32 %v5217_v9, %v6129_v11  ;;  %v2593_v9 = vmax.f32 %v1699_v43, 0.0  ;;  %v2604_v43 = vmax.f32 %v1744_v31, 0.0 }
 0x152   :  { %v1754_v12 = vpop.f32.mrf.mxu0 }
 0x153   :  { %v2609_v53 = vmax.f32 %v1763_v46, 0.0  ;;  %v1755_v13 = vadd.f32 %v6129_v11, %v1754_v12 }
 0x154   :  { %v5220_v54 = vpop.f32.mrf.mxu0  ;;  %5315 = vmatmul.mubr.msk.bf16.gmra.mxu0 %vm1104_vm4, %v5616_v15  ;;  %v1752_v15 = vadd.f32 %v6129_v11, %v1751_v20 }
 0x155   :  { %5318 = vmatprep.mubr.msk.bf16.mxu0 %vm1104_vm4, %v5619_v17  ;;  %v1776_v16 = vadd.f32 %v5220_v54, %v6129_v11  ;;  %v1691_v54 = vadd.f32 %v6129_v11, %v6439_v41 }
 0x156   :  { %v1767_v22 = vpop.f32.mrf.mxu0  ;;  %v2606_v41 = vmax.f32 %v1752_v15, 0.0 }
 0x157   :  { %v1768_v26 = vadd.f32 %v6129_v11, %v1767_v22  ;;  %v2612_v27 = vmax.f32 %v1776_v16, 0.0  ;;  %v1747_v22 = vadd.f32 %v6486_v2, %v6129_v11  ;;  %v2936_v16 = vpack.c.bf16 %v2609_v53, %v2608_v23 }
 0x158   :  { %v5221_v14 = vpop.f32.mrf.mxu0  ;;  %v1728_v23 = vadd.f32 %v6461_v52, %v6129_v11 }
 0x159   :  { %v1779_v7 = vadd.f32 %v5221_v14, %v6129_v11  ;;  %v2610_v57 = vmax.f32 %v1768_v26, 0.0  ;;  %v2607_v14 = vmax.f32 %v1755_v13, 0.0 }
 0x15a   :  { %v1770_v34 = vpop.f32.mrf.mxu0 }
 0x15b   :  { %v2613_v37 = vmax.f32 %v1779_v7, 0.0  ;;  %v1771_v38 = vadd.f32 %v6129_v11, %v1770_v34  ;;  %v2592_v7 = vmax.f32 %v1696_v35, 0.0  ;;  %v2935_v10 = vpack.c.bf16 %v2607_v14, %v2606_v41  ;;  %v5629_v41 = vld [vmem:[%s7696_s1 + $0x2d0] sm:$0xff]  }
 0x15c   :  { %v5224_v48 = vpop.f32.mrf.mxu0  ;;  %5319 = vmatmul.mubr.msk.bf16.gmra.mxu0 %vm1104_vm4, %v5620_v25 }
 0x15d   :  { %v2938_v44 = vpack.c.bf16 %v2613_v37, %v2612_v27  ;;  %v2611_v5 = vmax.f32 %v1771_v38, 0.0  ;;  %5322 = vmatprep.mubr.msk.bf16.mxu0 %vm1104_vm4, %v5621_v29  ;;  %v1792_v45 = vadd.f32 %v5224_v48, %v6129_v11  ;;  %v1688_v29 = vadd.f32 %v6129_v11, %v6418_v33 }
 0x15e   :  { %v1783_v51 = vpop.f32.mrf.mxu0  ;;  %v2928_v27 = vpack.c.bf16 %v2593_v9, %v2592_v7  ;;  %v2591_v37 = vmax.f32 %v1691_v54, 0.0  ;;  %v2605_v38 = vmax.f32 %v1747_v22, 0.0  ;;  %v1739_v33 = vadd.f32 %v6129_v11, %v6494_v60  ;;  %v5626_v22 = vld [vmem:[%s7696_s1 + $0x2b8] sm:$0xff]  }
 0x15f   :  { %4952 = vmatprep.subr.bf16.mxu1 %v2938_v44  ;;  %v2937_v58 = vpack.c.bf16 %v2611_v5, %v2610_v57  ;;  %v1784_v17 = vadd.f32 %v6129_v11, %v1783_v51  ;;  %v2616_v20 = vmax.f32 %v1792_v45, 0.0  ;;  %v2590_v48 = vmax.f32 %v1688_v29, 0.0  ;;  %v5624_v44 = vld [vmem:[%s7696_s1 + $0x2a8] sm:$0xff]  }
 0x160   :  { %v5225_v6 = vpop.f32.mrf.mxu0  ;;  %4953 = vmatpush3.bf16.msra.mxu1 %v2930_v47  ;;  %v1736_v5 = vadd.f32 %v6129_v11, %v6484_v1  ;;  %v1731_v51 = vadd.f32 %v6469_v56, %v6129_v11  ;;  %v2934_v13 = vpack.c.bf16 %v2605_v38, %v2604_v43 }
 0x161   :  { %v1795_v12 = vadd.f32 %v5225_v6, %v6129_v11  ;;  %4954 = vmatprep.subr.bf16.mxu1 %v2937_v58  ;;  %v2614_v2 = vmax.f32 %v1784_v17, 0.0  ;;  %v2927_v53 = vpack.c.bf16 %v2591_v37, %v2590_v48  ;;  %v2603_v58 = vmax.f32 %v1739_v33, 0.0  ;;  %v5630_v37 = vld [vmem:[%s7696_s1 + $0x2d8] sm:$0xff]   ;;  %v5633_v48 = vld [vmem:[%s7696_s1 + $0x2f0] sm:$0xff]  }
 0x162   :  { %v1786_v24 = vpop.f32.mrf.mxu0 }
 0x163   :  { %v2617_v25 = vmax.f32 %v1795_v12, 0.0  ;;  %v1787_v26 = vadd.f32 %v6129_v11, %v1786_v24  ;;  %v2601_v12 = vmax.f32 %v1731_v51, 0.0  ;;  %v1720_v24 = vadd.f32 %v6129_v11, %v6466_v30  ;;  %v5635_v51 = vld [vmem:[%s7696_s1 + $0x300] sm:$0xff]  }
 0x164   :  { %v5228_v3 = vpop.f32.mrf.mxu0  ;;  %5323 = vmatmul.mubr.msk.bf16.gmra.mxu0 %vm1104_vm4, %v5622_v8  ;;  %4955 = vmatpush3.bf16.msra.mxu1 %v2929_v19  ;;  %v2602_v8 = vmax.f32 %v1736_v5, 0.0 }
 0x165   :  { %v6550_v46 = vpack.c.bf16 %v2617_v25, %v2616_v20  ;;  %v2615_v34 = vmax.f32 %v1787_v26, 0.0  ;;  %4956 = vmatprep.subr.bf16.mxu1 %v2936_v16  ;;  %5326 = vmatprep.mubr.msk.bf16.mxu0 %vm1104_vm4, %v5623_v28  ;;  %v1808_v40 = vadd.f32 %v5228_v3, %v6129_v11  ;;  %v1723_v28 = vadd.f32 %v6129_v11, %v6478_v59  ;;  %v5627_v59 = vld [vmem:[%s7696_s1 + $0x2c0] sm:$0xff]  }
 0x166   :  { %v1799_v39 = vpop.f32.mrf.mxu0  ;;  %v2933_v54 = vpack.c.bf16 %v2603_v58, %v2602_v8  ;;  %v2600_v16 = vmax.f32 %v1728_v23, 0.0  ;;  %v2809_v20 = vadd.s32 256, %v6318_v62  ;;  %v2598_v30 = vmax.f32 %v1720_v24, 0.0 }
 0x167   :  { %v6555_v61 = vpack.c.bf16 %v2615_v34, %v2614_v2  ;;  %v1800_v47 = vadd.f32 %v6129_v11, %v1799_v39  ;;  %v2620_v35 = vmax.f32 %v1808_v40, 0.0  ;;  %v2599_v26 = vmax.f32 %v1723_v28, 0.0 }
 0x168   :  { %v5229_v57 = vpop.f32.mrf.mxu0  ;;  %4957 = vmatpush3.bf16.msra.mxu1 %v2928_v27  ;;  %v2932_v25 = vpack.c.bf16 %v2601_v12, %v2600_v16  ;;  %vm2828_vm3 = vcmp.ge.s32.totalorder %v2809_v20, %v6332_v21  ;;  %vm2845_vm6 = vcmp.lt.s32.totalorder %v2809_v20, %v6362_v18 }
 0x169   :  { %v1811_v60 = vadd.f32 %v5229_v57, %v6129_v11  ;;  %4958 = vmatprep.subr.bf16.mxu1 %v2935_v10  ;;  %v2618_v9 = vmax.f32 %v1800_v47, 0.0  ;;  %v2931_v31 = vpack.c.bf16 %v2599_v26, %v2598_v30  ;;  %vm2861_vm9 = vmand %vm2828_vm3, %vm2845_vm6  ;;  %v5632_v10 = vld [vmem:[%s7696_s1 + $0x2e8] sm:$0xff]  }
 0x16a   :  { %v1802_v45 = vpop.f32.mrf.mxu0  ;;  %vm4734_vm11 = vmpackc.low %vm2861_vm9, %vm2861_vm9 }
 0x16b   :  { %v2621_v4 = vmax.f32 %v1811_v60, 0.0  ;;  %v1803_v1 = vadd.f32 %v6129_v11, %v1802_v45  ;;  %v4467_v45 = vld [vmem:[%s7700_s10] ss:$0 sm:$0xff] }
 0x16c   :  { %v6573_v6 = vpop.f32.mrf.mxu0  ;;  %5327 = vmatmul.mubr.msk.bf16.gmra.mxu0 %vm1104_vm4, %v5624_v44  ;;  %4959 = vmatpush3.bf16.msra.mxu1 %v2927_v53  ;;  %v5762_v44 = vmov 1983009808  }
 0x16d   :  { %v6576_v15 = vpack.c.bf16 %v2621_v4, %v2620_v35  ;;  %v2619_v56 = vmax.f32 %v1803_v1, 0.0  ;;  %4960 = vmatprep.subr.bf16.mxu1 %v2934_v13  ;;  %5330 = vmatprep.mubr.msk.bf16.mxu0 %vm1104_vm4, %v5625_v50  ;;  %v170_v5 = vunpack.c.l.s4 %v5762_v44  ;;  %v5634_v50 = vld [vmem:[%s7696_s1 + $0x2f8] sm:$0xff]  }
 0x16e   :  { %v6579_v17 = vpop.f32.mrf.mxu0 }
 0x16f   :  { %v6583_v52 = vpack.c.bf16 %v2619_v56, %v2618_v9  ;;  %v171_v53 = vunpack.c.0.s8 %v170_v5 }
 0x170   :  { %v6585_v19 = vpop.f32.mrf.mxu0  ;;  %4961 = vmatpush3.bf16.msra.mxu1 %v6412_v32  ;;  %v2812_v32 = vadd.s32 640, %v6318_v62 }
 0x171   :  { %4962 = vmatprep.subr.bf16.mxu1 %v2933_v54  ;;  %v6668_v35 = vsub.s32 %v171_v53, %v6312_v55  ;;  %v5636_v55 = vld [vmem:[%s7696_s1 + $0x308] sm:$0xff]  }
 0x172   :  { %v6596_v14 = vpop.f32.mrf.mxu0  ;;  %vm2831_vm7 = vcmp.ge.s32.totalorder %v2812_v32, %v6332_v21  ;;  %vm2848_vm8 = vcmp.lt.s32.totalorder %v2812_v32, %v6362_v18 }
 0x173   :  { %vm2864_vm10 = vmand %vm2831_vm7, %vm2848_vm8  ;;  %7724 = vst [vmem:[#allocation4_spill] sm:$0xff] %v6668_v35 }
 0x174   :  { %v6600_v7 = vpop.f32.mrf.mxu0  ;;  %5331 = vmatmul.mubr.msk.bf16.gmra.mxu0 %vm1104_vm4, %v5626_v22  ;;  %4963 = vmatpush3.bf16.msra.mxu1 %v6422_v36  ;;  %v5628_v36 = vld [vmem:[%s7696_s1 + $0x2c8] sm:$0xff]   ;;  %vm4736_vm12 = vmpackc.low %vm2864_vm10, %vm2864_vm10 }
 0x175   :  { %4964 = vmatprep.subr.bf16.mxu1 %v2932_v25  ;;  %5334 = vmatprep.mubr.msk.bf16.mxu0 %vm1104_vm4, %v5627_v59  ;;  %v1840_v12 = vadd.f32 %v6600_v7, %v6129_v11  ;;  %v5637_v25 = vld [vmem:[%s7696_s1 + $0x310] sm:$0xff]  }
 0x176   :  { %v6605_v29 = vpop.f32.mrf.mxu0 }
 0x178   :  { %v5237_v3 = vpop.f32.mrf.mxu0  ;;  %4965 = vmatpush3.bf16.msra.mxu1 %v6364_v49 }
 0x179   :  { %4966 = vmatprep.subr.bf16.mxu1 %v2931_v31  ;;  %v1843_v4 = vadd.f32 %v5237_v3, %v6129_v11 }
 0x17a   :  { %v1834_v2 = vpop.f32.mrf.mxu0 }
 0x17b   :  { %v2629_v16 = vmax.f32 %v1843_v4, 0.0  ;;  %v1835_v26 = vadd.f32 %v6129_v11, %v1834_v2  ;;  %v6693_v2 = vld [vmem:[%s7699_s5] ss:$0 sm:$0xff] }
 0x17c   :  { %v6618_v34 = vpop.f32.mrf.mxu0  ;;  %5335 = vmatmul.mubr.msk.bf16.gmra.mxu0 %vm1104_vm4, %v5628_v36  ;;  %4967 = vmatpush3.bf16.msra.mxu1 %v6375_v63  ;;  %v5631_v63 = vld [vmem:[%s7696_s1 + $0x2e0] sm:$0xff]  }
 0x17d   :  { %5338 = vmatprep.mubr.msk.bf16.mxu0 %vm1104_vm4, %v5629_v41 }
 0x17e   :  { %v6623_v49 = vpop.f32.mrf.mxu0 }
 0x17f   :  { %4735 = vmatmul.mubr.msk.bf16.vlgmr.msra.gmra.mxu1 %vm4734_vm11, %v7714_v42 }
 0x180   :  { %v6626_v27 = vpop.f32.mrf.mxu0  ;;  %4737 = vmatprep.mubr.msk.bf16.mxu1 %vm4736_vm12, %v7714_v42 }
 0x182   :  { %v6635_v38 = vpop.f32.mrf.mxu0 }
 0x184   :  { %v6637_v39 = vpop.f32.mrf.mxu0  ;;  %5339 = vmatmul.mubr.msk.bf16.gmra.mxu0 %vm1104_vm4, %v5630_v37 }
 0x185   :  { %5342 = vmatprep.mubr.msk.bf16.mxu0 %vm1104_vm4, %v5631_v63  ;;  %v2628_v63 = vmax.f32 %v1840_v12, 0.0 }
 0x186   :  { %v6641_v33 = vpop.f32.mrf.mxu0 }
 0x188   :  { %v6643_v40 = vpop.f32.mrf.mxu0 }
 0x18a   :  { %v6651_v43 = vpop.f32.mrf.mxu0 }
 0x18c   :  { %v5248_v57 = vpop.f32.mrf.mxu0  ;;  %5343 = vmatmul.mubr.msk.bf16.gmra.mxu0 %vm1104_vm4, %v5632_v10  ;;  %v1832_v10 = vadd.f32 %v6129_v11, %v6605_v29  ;;  %v2627_v29 = vmax.f32 %v1835_v26, 0.0 }
 0x18d   :  { %5346 = vmatprep.mubr.msk.bf16.mxu0 %vm1104_vm4, %v5633_v48  ;;  %v1888_v48 = vadd.f32 %v6693_v2, %v5248_v57 }
 0x18e   :  { %v6655_v47 = vpop.f32.mrf.mxu0 }
 0x190   :  { %v5249_v60 = vpop.f32.mrf.mxu0 }
 0x191   :  { %v1891_v32 = vadd.f32 %v5249_v60, %v6129_v11  ;;  %v1827_v60 = vadd.f32 %v6693_v2, %v6585_v19  ;;  %v2626_v19 = vmax.f32 %v1832_v10, 0.0 }
 0x192   :  { %v1882_v13 = vpop.f32.mrf.mxu0 }
 0x193   :  { %v1883_v57 = vadd.f32 %v6693_v2, %v1882_v13  ;;  %v2625_v12 = vmax.f32 %v1827_v60, 0.0 }
 0x194   :  { %v5252_v58 = vpop.f32.mrf.mxu0  ;;  %5347 = vmatmul.mubr.msk.bf16.gmra.mxu0 %vm1104_vm4, %v5634_v50 }
 0x195   :  { %v161_v1 = vpop.f32.mrf.mxu1  ;;  %5350 = vmatprep.mubr.msk.bf16.mxu0 %vm1104_vm4, %v5635_v51  ;;  %v1904_v9 = vadd.f32 %v5252_v58, %v6129_v11 }
 0x196   :  { %v162_v23 = vadd.f32 %v4467_v45, %v161_v1  ;;  %v1895_v8 = vpop.f32.mrf.mxu0  ;;  %v2641_v45 = vmax.f32 %v1891_v32, 0.0 }
 0x197   :  { %v5150_v56 = vpop.f32.mrf.mxu1  ;;  %v1896_v24 = vadd.f32 %v6129_v11, %v1895_v8  ;;  %v2644_v3 = vmax.f32 %v1904_v9, 0.0  ;;  %v2640_v8 = vmax.f32 %v1888_v48, 0.0 }
 0x198   :  { %v168_v28 = vcombine.high %v162_v23, %v162_v23  ;;  %v175_v54 = vrot.slane %v162_v23, %v6668_v35  ;;  %4469 = vst.sshfl [vmem:[#allocation2] sm:$0x3 pattern:$0x76325410] %v162_v23  ;;  %v5253_v22 = vpop.f32.mrf.mxu0  ;;  %v1824_v23 = vadd.f32 %v6693_v2, %v6573_v6  ;;  %v5638_v56 = vld [vmem:[%s7696_s1 + $0x318] sm:$0xff]   ;;  %v5639_v6 = vld [vmem:[%s7696_s1 + $0x320] sm:$0xff]  }
 0x199   :  { %v1907_v59 = vadd.f32 %v5253_v22, %v6129_v11  ;;  %v164_v20 = vpop.f32.mrf.mxu1  ;;  %v2642_v50 = vmax.f32 %v1896_v24, 0.0  ;;  %v1819_v22 = vadd.f32 %v6693_v2, %v6596_v14  ;;  %v2952_v24 = vpack.c.bf16 %v2641_v45, %v2640_v8 }
 0x19a   :  { %v182_v7 = vrot.slane %v168_v28, %v6668_v35  ;;  %v183_v30 = vcombine.high %v175_v54, %v175_v54  ;;  %4470 = vst.sshfl [vmem:[#allocation2 + $0x10] sm:$0x3 pattern:$0x76325410] %v168_v28  ;;  %v1898_v31 = vpop.f32.mrf.mxu0  ;;  %v1880_v28 = vadd.f32 %v6693_v2, %v6655_v47  ;;  %v2639_v20 = vmax.f32 %v1883_v57, 0.0 }
 0x19b   :  { %v2645_v36 = vmax.f32 %v1907_v59, 0.0  ;;  %v1899_v41 = vadd.f32 %v6129_v11, %v1898_v31  ;;  %v5151_v37 = vpop.f32.mrf.mxu1  ;;  %v2946_v11 = vpack.c.bf16 %v2629_v16, %v2628_v63  ;;  %v1875_v16 = vadd.f32 %v6693_v2, %v6643_v40 }
 0x19c   :  { %v184_v44 = vcombine.high %v182_v7, %v182_v7  ;;  %190 = vst [vmem:[#allocation2 + $0x8] sm:$0x3] %v183_v30  ;;  %v5256_v5 = vpop.f32.mrf.mxu0  ;;  %5351 = vmatmul.mubr.msk.bf16.gmra.mxu0 %vm1104_vm4, %v5636_v55  ;;  %v2945_v55 = vpack.c.bf16 %v2627_v29, %v2626_v19  ;;  %v2624_v32 = vmax.f32 %v1824_v23, 0.0  ;;  %v1816_v7 = vadd.f32 %v6693_v2, %v6579_v17  ;;  %v5641_v29 = vld [vmem:[%s7696_s1 + $0x330] sm:$0xff]  }
 0x19d   :  { %v2954_v53 = vpack.c.bf16 %v2645_v36, %v2644_v3  ;;  %v2643_v51 = vmax.f32 %v1899_v41, 0.0  ;;  %5354 = vmatprep.mubr.msk.bf16.mxu0 %vm1104_vm4, %v5637_v25  ;;  %v1920_v4 = vadd.f32 %v6693_v2, %v5256_v5  ;;  %v1872_v30 = vadd.f32 %v6693_v2, %v6637_v39 }
 0x19e   :  { %192 = vst [vmem:[#allocation2 + $0x18] sm:$0x3] %v184_v44  ;;  %v1911_v58 = vpop.f32.mrf.mxu0  ;;  %v2638_v14 = vmax.f32 %v1880_v28, 0.0  ;;  %v2944_v41 = vpack.c.bf16 %v2625_v12, %v2624_v32  ;;  %v2623_v37 = vmax.f32 %v1819_v22, 0.0  ;;  %v2637_v63 = vmax.f32 %v1875_v16, 0.0  ;;  %v5642_v16 = vld [vmem:[%s7696_s1 + $0x338] sm:$0xff]  }
 0x19f   :  { %4974 = vmatprep.subr.bf16.mxu1 %v2954_v53  ;;  %v2953_v1 = vpack.c.bf16 %v2643_v51, %v2642_v50  ;;  %v1912_v13 = vadd.f32 %v6693_v2, %v1911_v58  ;;  %v2648_v47 = vmax.f32 %v1920_v4, 0.0  ;;  %v1867_v17 = vadd.f32 %v6693_v2, %v6651_v43  ;;  %v5640_v53 = vld [vmem:[%s7696_s1 + $0x328] sm:$0xff]  }
 0x1a0   :  { %v5257_v9 = vpop.f32.mrf.mxu0  ;;  %4975 = vmatpush3.bf16.msra.mxu1 %v2946_v11  ;;  %v2951_v44 = vpack.c.bf16 %v2639_v20, %v2638_v14  ;;  %v2622_v5 = vmax.f32 %v1816_v7, 0.0  ;;  %v2636_v60 = vmax.f32 %v1872_v30, 0.0  ;;  %v1864_v51 = vadd.f32 %v6693_v2, %v6641_v33 }
 0x1a1   :  { %v1923_v54 = vadd.f32 %v6693_v2, %v5257_v9  ;;  %4976 = vmatprep.subr.bf16.mxu1 %v2953_v1  ;;  %v2646_v40 = vmax.f32 %v1912_v13, 0.0  ;;  %v1859_v58 = vadd.f32 %v6693_v2, %v6626_v27  ;;  %v2635_v1 = vmax.f32 %v1867_v17, 0.0  ;;  %v5372_v14 = vpop.f32.mrf.mxu1 }
 0x1a2   :  { %v1914_v59 = vpop.f32.mrf.mxu0  ;;  %v2943_v45 = vpack.c.bf16 %v2623_v37, %v2622_v5  ;;  %v2950_v57 = vpack.c.bf16 %v2637_v63, %v2636_v60  ;;  %v1856_v8 = vadd.f32 %v6693_v2, %v6618_v34 }
 0x1a3   :  { %v2649_v25 = vmax.f32 %v1923_v54, 0.0  ;;  %v1915_v26 = vadd.f32 %v6693_v2, %v1914_v59  ;;  %v2633_v54 = vmax.f32 %v1859_v58, 0.0  ;;  %v1848_v59 = vadd.f32 %v6693_v2, %v6623_v49 }
 0x1a4   :  { %v5260_v31 = vpop.f32.mrf.mxu0  ;;  %5355 = vmatmul.mubr.msk.bf16.gmra.mxu0 %vm1104_vm4, %v5638_v56  ;;  %4977 = vmatpush3.bf16.msra.mxu1 %v2945_v55  ;;  %v2634_v56 = vmax.f32 %v1864_v51, 0.0 }
 0x1a5   :  { %v6724_v3 = vpack.c.bf16 %v2649_v25, %v2648_v47  ;;  %v2647_v36 = vmax.f32 %v1915_v26, 0.0  ;;  %4978 = vmatprep.subr.bf16.mxu1 %v2952_v24  ;;  %5358 = vmatprep.mubr.msk.bf16.mxu0 %vm1104_vm4, %v5639_v6  ;;  %v1936_v48 = vadd.f32 %v6693_v2, %v5260_v31  ;;  %v1851_v6 = vadd.f32 %v6693_v2, %v6635_v38  ;;  %v5643_v38 = vld [vmem:[%s7696_s1 + $0x340] sm:$0xff]  }
 0x1a6   :  { %v1927_v10 = vpop.f32.mrf.mxu0  ;;  %v2949_v22 = vpack.c.bf16 %v2635_v1, %v2634_v56  ;;  %v2632_v24 = vmax.f32 %v1856_v8, 0.0  ;;  %v2811_v47 = vadd.s32 512, %v6318_v62  ;;  %v2630_v49 = vmax.f32 %v1848_v59, 0.0 }
 0x1a7   :  { %v6729_v39 = vpack.c.bf16 %v2647_v36, %v2646_v40  ;;  %v1928_v11 = vadd.f32 %v6693_v2, %v1927_v10  ;;  %v2652_v23 = vmax.f32 %v1936_v48, 0.0  ;;  %v2631_v26 = vmax.f32 %v1851_v6, 0.0  ;;  %v6789_v36 = vpop.f32.mrf.mxu1 }
 0x1a8   :  { %v5261_v50 = vpop.f32.mrf.mxu0  ;;  %4979 = vmatpush3.bf16.msra.mxu1 %v2944_v41  ;;  %v2948_v25 = vpack.c.bf16 %v2633_v54, %v2632_v24  ;;  %vm2830_vm13 = vcmp.ge.s32.totalorder %v2811_v47, %v6332_v21  ;;  %vm2847_vm14 = vcmp.lt.s32.totalorder %v2811_v47, %v6362_v18 }
 0x1a9   :  { %v1939_v43 = vadd.f32 %v6693_v2, %v5261_v50  ;;  %4980 = vmatprep.subr.bf16.mxu1 %v2951_v44  ;;  %v2650_v12 = vmax.f32 %v1928_v11, 0.0  ;;  %v2947_v30 = vpack.c.bf16 %v2631_v26, %v2630_v49  ;;  %vm2863_vm2 = vmand %vm2830_vm13, %vm2847_vm14  ;;  %v5373_v37 = vpop.f32.mrf.mxu1 }
 0x1aa   :  { %v1930_v4 = vpop.f32.mrf.mxu0  ;;  %vm4738_vm6 = vmpackc.low %vm2863_vm2, %vm2863_vm2 }
 0x1ab   :  { %v2653_v19 = vmax.f32 %v1939_v43, 0.0  ;;  %v1931_v33 = vadd.f32 %v6693_v2, %v1930_v4  ;;  %v6798_v10 = vpop.f32.mrf.mxu1 }
 0x1ac   :  { %v6747_v9 = vpop.f32.mrf.mxu0  ;;  %5359 = vmatmul.mubr.msk.bf16.gmra.mxu0 %vm1104_vm4, %v5640_v53  ;;  %4981 = vmatpush3.bf16.msra.mxu1 %v2943_v45 }
 0x1ad   :  { %v6750_v28 = vpack.c.bf16 %v2653_v19, %v2652_v23  ;;  %v2651_v27 = vmax.f32 %v1931_v33, 0.0  ;;  %4982 = vmatprep.subr.bf16.mxu1 %v2950_v57  ;;  %5362 = vmatprep.mubr.msk.bf16.mxu0 %vm1104_vm4, %v5641_v29  ;;  %v5376_v44 = vpop.f32.mrf.mxu1 }
 0x1ae   :  { %v6753_v13 = vpop.f32.mrf.mxu0  ;;  %v2400_v43 = vadd.f32 %v6693_v2, %v5376_v44 }
 0x1af   :  { %v6757_v34 = vpack.c.bf16 %v2651_v27, %v2650_v12  ;;  %v6807_v50 = vpop.f32.mrf.mxu1  ;;  %v6839_v47 = vadd.f32 %v6693_v2, %v6753_v13 }
 0x1b0   :  { %v6759_v55 = vpop.f32.mrf.mxu0  ;;  %4983 = vmatpush3.bf16.msra.mxu1 %v6576_v15  ;;  %v2814_v15 = vadd.s32 896, %v6318_v62  ;;  %v2768_v57 = vmax.f32 %v2400_v43, 0.0 }
 0x1b1   :  { %4984 = vmatprep.subr.bf16.mxu1 %v2949_v22  ;;  %v5377_v11 = vpop.f32.mrf.mxu1  ;;  %v6843_v49 = vadd.f32 %v6693_v2, %v6759_v55 }
 0x1b2   :  { %v6770_v20 = vpop.f32.mrf.mxu0  ;;  %vm2833_vm15 = vcmp.ge.s32.totalorder %v2814_v15, %v6332_v21  ;;  %vm2850_vm0 = vcmp.lt.s32.totalorder %v2814_v15, %v6362_v18  ;;  %v2403_v4 = vadd.f32 %v6693_v2, %v5377_v11 }
 0x1b3   :  { %vm2866_vm3 = vmand %vm2833_vm15, %vm2850_vm0  ;;  %v6816_v45 = vpop.f32.mrf.mxu1 }
 0x1b4   :  { %v6774_v32 = vpop.f32.mrf.mxu0  ;;  %5363 = vmatmul.mubr.msk.bf16.gmra.mxu0 %vm1104_vm4, %v5642_v16  ;;  %4985 = vmatpush3.bf16.msra.mxu1 %v6583_v52  ;;  %v5644_v52 = vld [vmem:[%s7696_s1 + $0x348] sm:$0xff]   ;;  %vm4740_vm7 = vmpackc.low %vm2866_vm3, %vm2866_vm3  ;;  %v2769_v19 = vmax.f32 %v2403_v4, 0.0  ;;  %s5764_s1 = smov 32  }
 0x1b5   :  { %4986 = vmatprep.subr.bf16.mxu1 %v2948_v25  ;;  %5366 = vmatprep.mubr.msk.bf16.mxu0 %vm1104_vm4, %v5643_v38  ;;  %v5380_v1 = vpop.f32.mrf.mxu1  ;;  %v6835_v38 = vadd.f32 %v6693_v2, %v6747_v9  ;;  %v1968_v11 = vadd.f32 %v6693_v2, %v6774_v32 }
 0x1b6   :  { %v6779_v7 = vpop.f32.mrf.mxu0  ;;  %v6825_v56 = vpack.c.bf16 %v2769_v19, %v2768_v57  ;;  %v2416_v27 = vadd.f32 %v6693_v2, %v5380_v1 }
 0x1b7   :  { %v6823_v33 = vpop.f32.mrf.mxu1 }
 0x1b8   :  { %v5269_v31 = vpop.f32.mrf.mxu0  ;;  %4987 = vmatpush3.bf16.msra.mxu1 %v6550_v46  ;;  %v2384_v46 = vadd.f32 %v6693_v2, %v5372_v14  ;;  %v2772_v16 = vmax.f32 %v2416_v27, 0.0 }
 0x1b9   :  { %4988 = vmatprep.subr.bf16.mxu1 %v2947_v30  ;;  %v5381_v12 = vpop.f32.mrf.mxu1  ;;  %v6847_v30 = vadd.f32 %v6693_v2, %v6770_v20  ;;  %v2660_v20 = vmax.f32 %v1968_v11, 0.0 }
 0x1ba   :  { %v1962_v40 = vpop.f32.mrf.mxu0  ;;  %v2764_v48 = vmax.f32 %v2384_v46, 0.0  ;;  %v2419_v24 = vadd.f32 %v6693_v2, %v5381_v12 }
 0x1bb   :  { %v6830_v6 = vpop.f32.mrf.mxu1 }
 0x1bc   :  { %v6791_v41 = vpop.f32.mrf.mxu0  ;;  %4989 = vmatpush3.bf16.msra.mxu1 %v6555_v61  ;;  %5367 = vmatmul.mubr.msk.bf16.gmra.mxu0 %vm1104_vm4, %v5644_v52  ;;  %v2387_v61 = vadd.f32 %v6693_v2, %v5373_v37  ;;  %v2773_v26 = vmax.f32 %v2419_v24, 0.0  ;;  %v1971_v37 = vadd.f32 %v6693_v2, %v5269_v31  ;;  %v1960_v31 = vadd.f32 %v6693_v2, %v6779_v7 }
 0x1bd   :  { %v5384_v59 = vpop.f32.mrf.mxu1 }
 0x1be   :  { %v6796_v63 = vpop.f32.mrf.mxu0  ;;  %v2765_v60 = vmax.f32 %v2387_v61, 0.0  ;;  %v6849_v14 = vpack.c.bf16 %v2773_v26, %v2772_v16  ;;  %v2432_v13 = vadd.f32 %v6693_v2, %v5384_v59  ;;  %v1963_v61 = vadd.f32 %v6693_v2, %v1962_v40 }
 0x1bf   :  { %4739 = vmatmul.mubr.msk.bf16.vlgmr.msra.gmra.mxu1 %vm4738_vm6, %v7714_v42  ;;  %v2423_v15 = vpop.f32.mrf.mxu1  ;;  %v2661_v12 = vmax.f32 %v1971_v37, 0.0  ;;  %v2658_v37 = vmax.f32 %v1960_v31, 0.0 }
 0x1c0   :  { %v6801_v17 = vpop.f32.mrf.mxu0  ;;  %4741 = vmatprep.mubr.msk.bf16.mxu1 %vm4740_vm7, %v7714_v42  ;;  %v6811_v51 = vpack.c.bf16 %v2765_v60, %v2764_v48  ;;  %v2776_v4 = vmax.f32 %v2432_v13, 0.0  ;;  %v2424_v1 = vadd.f32 %v6693_v2, %v2423_v15  ;;  %v2659_v32 = vmax.f32 %v1963_v61, 0.0 }
 0x1c1   :  { %v5385_v9 = vpop.f32.mrf.mxu1 }
 0x1c2   :  { %v6805_v5 = vpop.f32.mrf.mxu0  ;;  %v2435_v40 = vadd.f32 %v6693_v2, %v5385_v9  ;;  %v2961_v31 = vpack.c.bf16 %v2659_v32, %v2658_v37 }
 0x1c3   :  { %v2426_v44 = vpop.f32.mrf.mxu1 }
 0x1c4   :  { %v6809_v53 = vpop.f32.mrf.mxu0  ;;  %v2427_v24 = vadd.f32 %v6693_v2, %v2426_v44  ;;  %v2777_v7 = vmax.f32 %v2435_v40, 0.0 }
 0x1c5   :  { %v5388_v19 = vpop.f32.mrf.mxu1 }
 0x1c6   :  { %v6814_v29 = vpop.f32.mrf.mxu0  ;;  %v2775_v9 = vmax.f32 %v2427_v24, 0.0  ;;  %v2448_v24 = vadd.f32 %v6693_v2, %v5388_v19 }
 0x1c7   :  { %v2439_v0 = vpop.f32.mrf.mxu1 }
 0x1c8   :  { %v6818_v58 = vpop.f32.mrf.mxu0 }
 0x1c9   :  { %v5389_v44 = vpop.f32.mrf.mxu1 }
 0x1ca   :  { %v6821_v23 = vpop.f32.mrf.mxu0 }
 0x1cb   :  { %v2442_v11 = vpop.f32.mrf.mxu1 }
 0x1cc   :  { %v5280_v8 = vpop.f32.mrf.mxu0 }
 0x1ce   :  { %v6828_v54 = vpop.f32.mrf.mxu0 }
 0x1d0   :  { %v5281_v22 = vpop.f32.mrf.mxu0 }
 0x1d1   :  { %v2019_v59 = vadd.f32 %v6693_v2, %v5281_v22 }
 0x1d2   :  { %v2010_v25 = vpop.f32.mrf.mxu0 }
 0x1d3   :  { %v2673_v40 = vmax.f32 %v2019_v59, 0.0 }
 0x1d4   :  { %v5284_v52 = vpop.f32.mrf.mxu0 }
 0x1d5   :  { %v2032_v43 = vadd.f32 %v6693_v2, %v5284_v52  ;;  %v2774_v52 = vmax.f32 %v2424_v1, 0.0  ;;  %v2962_v1 = vpack.c.bf16 %v2661_v12, %v2660_v20  ;;  %v2780_v20 = vmax.f32 %v2448_v24, 0.0  ;;  %v5392_v12 = vpop.f32.mrf.mxu1 }
 0x1d6   :  { %v2023_v55 = vpop.f32.mrf.mxu0 }
 0x1d7   :  { %v2024_v27 = vadd.f32 %v6693_v2, %v2023_v55  ;;  %v2676_v13 = vmax.f32 %v2032_v43, 0.0  ;;  %v2016_v55 = vadd.f32 %v6693_v2, %v5280_v8  ;;  %v6873_v46 = vpack.c.bf16 %v2775_v9, %v2774_v52 }
 0x1d8   :  { %v5285_v57 = vpop.f32.mrf.mxu0  ;;  %v2011_v43 = vadd.f32 %v6693_v2, %v2010_v25  ;;  %v2451_v25 = vadd.f32 %v6693_v2, %v5389_v44 }
 0x1d9   :  { %v2035_v16 = vadd.f32 %v6693_v2, %v5285_v57  ;;  %v6871_v57 = vpack.c.bf16 %v2777_v7, %v2776_v4  ;;  %v2674_v61 = vmax.f32 %v2024_v27, 0.0  ;;  %7726 = vst [vmem:[#allocation6_spill] sm:$0xff] %v6873_v46  ;;  %v2440_v4 = vadd.f32 %v6693_v2, %v2439_v0 }
 0x1da   :  { %v2026_v26 = vpop.f32.mrf.mxu0  ;;  %v2672_v27 = vmax.f32 %v2016_v55, 0.0  ;;  %v2003_v0 = vadd.f32 %v6693_v2, %v6818_v58  ;;  %v2671_v7 = vmax.f32 %v2011_v43, 0.0 }
 0x1db   :  { %v2677_v42 = vmax.f32 %v2035_v16, 0.0  ;;  %v2027_v15 = vadd.f32 %v6693_v2, %v2026_v26  ;;  %7725 = vst [vmem:[#allocation5_spill] sm:$0xff] %v6871_v57  ;;  %v2778_v59 = vmax.f32 %v2440_v4, 0.0 }
 0x1dc   :  { %v5288_v48 = vpop.f32.mrf.mxu0 }
 0x1dd   :  { %v2970_v60 = vpack.c.bf16 %v2677_v42, %v2676_v13  ;;  %v2675_v22 = vmax.f32 %v2027_v15, 0.0  ;;  %v2048_v8 = vadd.f32 %v6693_v2, %v5288_v48  ;;  %v2008_v42 = vadd.f32 %v6693_v2, %v6828_v54  ;;  %v2455_v15 = vpop.f32.mrf.mxu1 }
 0x1de   :  { %v2039_v16 = vpop.f32.mrf.mxu0  ;;  %v2443_v48 = vadd.f32 %v6693_v2, %v2442_v11  ;;  %v2781_v13 = vmax.f32 %v2451_v25, 0.0 }
 0x1df   :  { %v2969_v26 = vpack.c.bf16 %v2675_v22, %v2674_v61  ;;  %4996 = vmatprep.subr.bf16.mxu1 %v2970_v60  ;;  %v2040_v19 = vadd.f32 %v6693_v2, %v2039_v16  ;;  %v2968_v60 = vpack.c.bf16 %v2673_v40, %v2672_v27  ;;  %v2680_v9 = vmax.f32 %v2048_v8, 0.0  ;;  %v5393_v43 = vpop.f32.mrf.mxu1 }
 0x1e0   :  { %v5289_v52 = vpop.f32.mrf.mxu0  ;;  %4997 = vmatpush3.bf16.msra.mxu1 %v2962_v1  ;;  %v2779_v44 = vmax.f32 %v2443_v48, 0.0  ;;  %v7727_v61 = vmax.f32 %v6835_v38, 0.0  ;;  %v7728_v22 = vmax.f32 %v6843_v49, 0.0  ;;  %v2000_v16 = vadd.f32 %v6693_v2, %v6809_v53 }
 0x1e1   :  { %v2051_v32 = vadd.f32 %v6693_v2, %v5289_v52  ;;  %4998 = vmatprep.subr.bf16.mxu1 %v2969_v26  ;;  %v2670_v24 = vmax.f32 %v2008_v42, 0.0  ;;  %v6894_v40 = vpack.c.bf16 %v2781_v13, %v2780_v20  ;;  %v2678_v11 = vmax.f32 %v2040_v19, 0.0  ;;  %v2458_v20 = vpop.f32.mrf.mxu1 }
 0x1e2   :  { %v2042_v54 = vpop.f32.mrf.mxu0  ;;  %v2960_v1 = vpack.c.bf16 %v7728_v22, %v7727_v61  ;;  %v6898_v4 = vpack.c.bf16 %v2779_v44, %v2778_v59  ;;  %v7731_v38 = vmax.f32 %v6839_v47, 0.0  ;;  %v7732_v49 = vmax.f32 %v6847_v30, 0.0 }
 0x1e3   :  { %v2681_v37 = vmax.f32 %v2051_v32, 0.0  ;;  %v2043_v55 = vadd.f32 %v6693_v2, %v2042_v54  ;;  %7729 = vst [vmem:[#allocation7_spill] sm:$0xff] %v6894_v40  ;;  %v2669_v52 = vmax.f32 %v2003_v0, 0.0  ;;  %v1995_v53 = vadd.f32 %v6693_v2, %v6821_v23 }
 0x1e4   :  { %v5292_v58 = vpop.f32.mrf.mxu0  ;;  %4999 = vmatpush3.bf16.msra.mxu1 %v2961_v31  ;;  %7730 = vst [vmem:[#allocation8_spill] sm:$0xff] %v6898_v4  ;;  %v2959_v27 = vpack.c.bf16 %v7732_v49, %v7731_v38  ;;  %v2464_v42 = vadd.f32 %v6693_v2, %v5392_v12  ;;  %v2967_v25 = vpack.c.bf16 %v2671_v7, %v2670_v24  ;;  %v2668_v48 = vmax.f32 %v2000_v16, 0.0 }
 0x1e5   :  { %v6896_v26 = vpack.c.bf16 %v2681_v37, %v2680_v9  ;;  %v2679_v8 = vmax.f32 %v2043_v55, 0.0  ;;  %5000 = vmatprep.subr.bf16.mxu1 %v2968_v60  ;;  %v2064_v32 = vadd.f32 %v6693_v2, %v5292_v58  ;;  %v2456_v59 = vadd.f32 %v6693_v2, %v2455_v15  ;;  %v5396_v60 = vpop.f32.mrf.mxu1 }
 0x1e6   :  { %v2055_v31 = vpop.f32.mrf.mxu0  ;;  %v1992_v47 = vadd.f32 %v6693_v2, %v6814_v29  ;;  %v2784_v0 = vmax.f32 %v2464_v42, 0.0  ;;  %v2467_v23 = vadd.f32 %v6693_v2, %v5393_v43  ;;  %v2459_v13 = vadd.f32 %v6693_v2, %v2458_v20 }
 0x1e7   :  { %v6907_v19 = vpack.c.bf16 %v2679_v8, %v2678_v11  ;;  %v2056_v12 = vadd.f32 %v6693_v2, %v2055_v31  ;;  %v2782_v54 = vmax.f32 %v2456_v59, 0.0  ;;  %v1987_v15 = vadd.f32 %v6693_v2, %v6801_v17  ;;  %v2471_v44 = vpop.f32.mrf.mxu1 }
 0x1e8   :  { %v5293_v30 = vpop.f32.mrf.mxu0  ;;  %5001 = vmatpush3.bf16.msra.mxu1 %v2960_v1  ;;  %v2966_v9 = vpack.c.bf16 %v2669_v52, %v2668_v48  ;;  %v2667_v37 = vmax.f32 %v1995_v53, 0.0  ;;  %v2785_v55 = vmax.f32 %v2467_v23, 0.0  ;;  %v2684_v61 = vmax.f32 %v2064_v32, 0.0 }
 0x1e9   :  { %v2067_v7 = vadd.f32 %v6693_v2, %v5293_v30  ;;  %5002 = vmatprep.subr.bf16.mxu1 %v2967_v25  ;;  %v2783_v16 = vmax.f32 %v2459_v13, 0.0  ;;  %v1984_v24 = vadd.f32 %v6693_v2, %v6791_v41  ;;  %v2666_v58 = vmax.f32 %v1992_v47, 0.0  ;;  %v5397_v17 = vpop.f32.mrf.mxu1 }
 0x1ea   :  { %v2058_v29 = vpop.f32.mrf.mxu0  ;;  %v6924_v11 = vpack.c.bf16 %v2785_v55, %v2784_v0  ;;  %v2682_v8 = vmax.f32 %v2056_v12, 0.0  ;;  %v2665_v53 = vmax.f32 %v1987_v15, 0.0  ;;  %v2480_v42 = vadd.f32 %v6693_v2, %v5396_v60 }
 0x1eb   :  { %v2685_v22 = vmax.f32 %v2067_v7, 0.0  ;;  %v2059_v1 = vadd.f32 %v6693_v2, %v2058_v29  ;;  %v6928_v52 = vpack.c.bf16 %v2783_v16, %v2782_v54  ;;  %v2474_v41 = vpop.f32.mrf.mxu1  ;;  %v1979_v20 = vadd.f32 %v6693_v2, %v6805_v5 }
 0x1ec   :  { %v6922_v43 = vpop.f32.mrf.mxu0  ;;  %5003 = vmatpush3.bf16.msra.mxu1 %v2959_v27  ;;  %7733 = vst [vmem:[#allocation9_spill] sm:$0xff] %v6924_v11  ;;  %v2965_v27 = vpack.c.bf16 %v2667_v37, %v2666_v58  ;;  %v2472_v32 = vadd.f32 %v6693_v2, %v2471_v44  ;;  %v2788_v48 = vmax.f32 %v2480_v42, 0.0  ;;  %v2483_v47 = vadd.f32 %v6693_v2, %v5397_v17 }
 0x1ed   :  { %v6926_v38 = vpack.c.bf16 %v2685_v22, %v2684_v61  ;;  %v2683_v49 = vmax.f32 %v2059_v1, 0.0  ;;  %5004 = vmatprep.subr.bf16.mxu1 %v2966_v9  ;;  %7734 = vst [vmem:[#allocation10_spill] sm:$0xff] %v6928_v52  ;;  %v5400_v30 = vpop.f32.mrf.mxu1  ;;  %v2664_v0 = vmax.f32 %v1984_v24, 0.0  ;;  %v1976_v23 = vadd.f32 %v6693_v2, %v6796_v63 }
 0x1ee   :  { %v6930_v31 = vpop.f32.mrf.mxu0  ;;  %v2786_v60 = vmax.f32 %v2472_v32, 0.0  ;;  %v2475_v5 = vadd.f32 %v6693_v2, %v2474_v41  ;;  %v2813_v7 = vadd.s32 768, %v6318_v62  ;;  %v2789_v54 = vmax.f32 %v2483_v47, 0.0 }
 0x1ef   :  { %v6935_v25 = vpack.c.bf16 %v2683_v49, %v2682_v8  ;;  %v2487_v13 = vpop.f32.mrf.mxu1  ;;  %v2964_v15 = vpack.c.bf16 %v2665_v53, %v2664_v0  ;;  %v2816_v9 = vadd.s32 1152, %v6318_v62  ;;  %v2662_v44 = vmax.f32 %v1976_v23, 0.0 }
 0x1f0   :  { %v6938_v59 = vpop.f32.mrf.mxu0  ;;  %5005 = vmatpush3.bf16.msra.mxu1 %v6750_v28  ;;  %v2663_v28 = vmax.f32 %v1979_v20, 0.0  ;;  %v2787_v37 = vmax.f32 %v2475_v5, 0.0  ;;  %v6952_v63 = vpack.c.bf16 %v2789_v54, %v2788_v48  ;;  %vm2832_vm4 = vcmp.ge.s32.totalorder %v2813_v7, %v6332_v21 }
 0x1f1   :  { %5006 = vmatprep.subr.bf16.mxu1 %v2965_v27  ;;  %v5401_v55 = vpop.f32.mrf.mxu1  ;;  %vm2849_vm8 = vcmp.lt.s32.totalorder %v2813_v7, %v6362_v18  ;;  %v2496_v1 = vadd.f32 %v6693_v2, %v5400_v30  ;;  %vm2835_vm9 = vcmp.ge.s32.totalorder %v2816_v9, %v6332_v21  ;;  %vm2852_vm10 = vcmp.lt.s32.totalorder %v2816_v9, %v6362_v18 }
 0x1f2   :  { %v6945_v12 = vpop.f32.mrf.mxu0  ;;  %v6954_v61 = vpack.c.bf16 %v2787_v37, %v2786_v60  ;;  %v2963_v24 = vpack.c.bf16 %v2663_v28, %v2662_v44  ;;  %v2499_v8 = vadd.f32 %v6693_v2, %v5401_v55  ;;  %vm6968_vm11 = vmand %vm2832_vm4, %vm2849_vm8  ;;  %v7741_v54 = vmov 1.0|1.0  }
 0x1f3   :  { %v2490_v16 = vpop.f32.mrf.mxu1  ;;  %v2792_v17 = vmax.f32 %v2496_v1, 0.0  ;;  %vm6975_vm12 = vmand %vm2835_vm9, %vm2852_vm10 }
 0x1f4   :  { %v6949_v29 = vpop.f32.mrf.mxu0  ;;  %5007 = vmatpush3.bf16.msra.mxu1 %v6757_v34  ;;  %v2488_v34 = vadd.f32 %v6693_v2, %v2487_v13  ;;  %v2491_v41 = vadd.f32 %v6693_v2, %v2490_v16  ;;  %v2793_v32 = vmax.f32 %v2499_v8, 0.0  ;;  %vm4742_vm13 = vmpackc.low %vm6968_vm11, %vm6968_vm11 }
 0x1f5   :  { %5008 = vmatprep.subr.bf16.mxu1 %v2964_v15  ;;  %v5404_v49 = vpop.f32.mrf.mxu1  ;;  %vm4744_vm14 = vmpackc.low %vm6975_vm12, %vm6975_vm12 }
 0x1f6   :  { %v6956_v22 = vpop.f32.mrf.mxu0  ;;  %v2790_v42 = vmax.f32 %v2488_v34, 0.0  ;;  %v2791_v48 = vmax.f32 %v2491_v41, 0.0  ;;  %v6985_v30 = vpack.c.bf16 %v2793_v32, %v2792_v17  ;;  %v2512_v5 = vadd.f32 %v6693_v2, %v5404_v49 }
 0x1f8   :  { %v6964_v58 = vpop.f32.mrf.mxu0  ;;  %5009 = vmatpush3.bf16.msra.mxu1 %v6724_v3  ;;  %v2503_v3 = vpop.f32.mrf.mxu1  ;;  %7739 = vst [vmem:[#allocation11_spill] sm:$0xff] %v6985_v30  ;;  %v6990_v23 = vpack.c.bf16 %v2791_v48, %v2790_v42  ;;  %v2796_v15 = vmax.f32 %v2512_v5, 0.0 }
 0x1f9   :  { %5010 = vmatprep.subr.bf16.mxu1 %v2963_v24 }
 0x1fa   :  { %v6973_v20 = vpop.f32.mrf.mxu0  ;;  %v5405_v0 = vpop.f32.mrf.mxu1  ;;  %7740 = vst [vmem:[#allocation12_spill] sm:$0xff] %v6990_v23 }
 0x1fb   :  { %v2515_v28 = vadd.f32 %v6693_v2, %v5405_v0 }
 0x1fc   :  { %v6979_v47 = vpop.f32.mrf.mxu0  ;;  %5011 = vmatpush3.bf16.msra.mxu1 %v6729_v39  ;;  %v2506_v7 = vpop.f32.mrf.mxu1  ;;  %v2504_v39 = vadd.f32 %v6693_v2, %v2503_v3 }
 0x1fd   :  { %v2507_v9 = vadd.f32 %v6693_v2, %v2506_v7  ;;  %v2797_v1 = vmax.f32 %v2515_v28, 0.0 }
 0x1fe   :  { %v6992_v60 = vpop.f32.mrf.mxu0  ;;  %v5408_v37 = vpop.f32.mrf.mxu1  ;;  %v2794_v55 = vmax.f32 %v2504_v39, 0.0 }
 0x1ff   :  { %4743 = vmatmul.mubr.msk.bf16.vlgmr.msra.gmra.mxu1 %vm4742_vm13, %v7741_v54  ;;  %v2795_v16 = vmax.f32 %v2507_v9, 0.0  ;;  %v2528_v24 = vadd.f32 %v6693_v2, %v5408_v37  ;;  %v7008_v49 = vpack.c.bf16 %v2797_v1, %v2796_v15 }
 0x200   :  { %v6997_v13 = vpop.f32.mrf.mxu0  ;;  %4745 = vmatprep.mubr.msk.bf16.mxu1 %vm4744_vm14, %v7741_v54  ;;  %v2519_v34 = vpop.f32.mrf.mxu1 }
 0x201   :  { %v2520_v17 = vadd.f32 %v6693_v2, %v2519_v34  ;;  %7742 = vst [vmem:[#allocation13_spill] sm:$0xff] %v7008_v49  ;;  %v7010_v53 = vpack.c.bf16 %v2795_v16, %v2794_v55  ;;  %v2800_v27 = vmax.f32 %v2528_v24, 0.0 }
 0x202   :  { %v7002_v44 = vpop.f32.mrf.mxu0  ;;  %v5409_v42 = vpop.f32.mrf.mxu1 }
 0x203   :  { %7743 = vst [vmem:[#allocation14_spill] sm:$0xff] %v7010_v53  ;;  %v2531_v32 = vadd.f32 %v6693_v2, %v5409_v42  ;;  %v2798_v48 = vmax.f32 %v2520_v17, 0.0 }
 0x204   :  { %v7006_v8 = vpop.f32.mrf.mxu0  ;;  %v2522_v3 = vpop.f32.mrf.mxu1 }
 0x205   :  { %v2523_v0 = vadd.f32 %v6693_v2, %v2522_v3  ;;  %v2801_v7 = vmax.f32 %v2531_v32, 0.0 }
 0x206   :  { %v7012_v41 = vpop.f32.mrf.mxu0  ;;  %v5412_v39 = vpop.f32.mrf.mxu1 }
 0x207   :  { %v2799_v28 = vmax.f32 %v2523_v0, 0.0  ;;  %v2544_v15 = vadd.f32 %v6693_v2, %v5412_v39  ;;  %v7021_v37 = vpack.c.bf16 %v2801_v7, %v2800_v27 }
 0x208   :  { %v7016_v5 = vpop.f32.mrf.mxu0  ;;  %v2535_v55 = vpop.f32.mrf.mxu1 }
 0x209   :  { %v7023_v1 = vpack.c.bf16 %v2799_v28, %v2798_v48  ;;  %v2536_v24 = vadd.f32 %v6693_v2, %v2535_v55  ;;  %v2804_v17 = vmax.f32 %v2544_v15, 0.0 }
 0x20a   :  { %v7019_v9 = vpop.f32.mrf.mxu0  ;;  %v5413_v34 = vpop.f32.mrf.mxu1 }
 0x20b   :  { %7744 = vst [vmem:[#allocation15_spill] sm:$0xff] %v7023_v1  ;;  %v2547_v42 = vadd.f32 %v6693_v2, %v5413_v34  ;;  %v2802_v46 = vmax.f32 %v2536_v24, 0.0  ;;  %v2099_v34 = vadd.f32 %v6693_v2, %v6964_v58 }
 0x20c   :  { %v5312_v16 = vpop.f32.mrf.mxu0  ;;  %v2538_v32 = vpop.f32.mrf.mxu1 }
 0x20d   :  { %v2805_v35 = vmax.f32 %v2547_v42, 0.0  ;;  %v2539_v39 = vadd.f32 %v6693_v2, %v2538_v32  ;;  %v2144_v53 = vadd.f32 %v6693_v2, %v5312_v16 }
 0x20e   :  { %v2135_v3 = vpop.f32.mrf.mxu0  ;;  %v4946_v23 = vpop.f32.mrf.mxu1 }
 0x20f   :  { %v7028_v27 = vpack.c.bf16 %v2805_v35, %v2804_v17  ;;  %v2803_v48 = vmax.f32 %v2539_v39, 0.0  ;;  %v2096_v35 = vadd.f32 %v6693_v2, %v6949_v29  ;;  %v2693_v39 = vmax.f32 %v2099_v34, 0.0 }
 0x210   :  { %v5313_v0 = vpop.f32.mrf.mxu0  ;;  %v4947_v28 = vpop.f32.mrf.mxu1  ;;  %v2088_v29 = vadd.f32 %v6693_v2, %v6956_v22  ;;  %v2083_v34 = vadd.f32 %v6693_v2, %v6938_v59  ;;  %v2080_v22 = vadd.f32 %v6693_v2, %v6922_v43  ;;  %v2704_v1 = vmax.f32 %v2144_v53, 0.0 }
 0x211   :  { %v7030_v57 = vadd.f32 %v4947_v28, %v4946_v23  ;;  %v7032_v30 = vpack.c.bf16 %v2803_v48, %v2802_v46  ;;  %v2091_v46 = vadd.f32 %v6693_v2, %v6973_v20  ;;  %v2147_v48 = vadd.f32 %v6693_v2, %v5313_v0 }
 0x212   :  { %v2138_v7 = vpop.f32.mrf.mxu0  ;;  %v4949_v15 = vpop.f32.mrf.mxu1  ;;  %v2690_v16 = vmax.f32 %v2088_v29, 0.0  ;;  %v2689_v59 = vmax.f32 %v2083_v34, 0.0 }
 0x213   :  { %v2691_v0 = vmax.f32 %v2091_v46, 0.0  ;;  %v2705_v52 = vmax.f32 %v2147_v48, 0.0 }
 0x214   :  { %v5316_v55 = vpop.f32.mrf.mxu0  ;;  %v4950_v4 = vpop.f32.mrf.mxu1 }
 0x215   :  { %v2160_v24 = vadd.f32 %v6693_v2, %v5316_v55  ;;  %v2692_v55 = vmax.f32 %v2096_v35, 0.0  ;;  %v2977_v48 = vpack.c.bf16 %v2691_v0, %v2690_v16  ;;  %v2984_v43 = vpack.c.bf16 %v2705_v52, %v2704_v1 }
 0x216   :  { %v2151_v42 = vpop.f32.mrf.mxu0  ;;  %v2123_v0 = vadd.f32 %v6693_v2, %v7019_v9  ;;  %v2115_v9 = vadd.f32 %v6693_v2, %v6997_v13 }
 0x217   :  { %v2152_v32 = vadd.f32 %v6693_v2, %v2151_v42  ;;  %v2708_v58 = vmax.f32 %v2160_v24, 0.0  ;;  %v2978_v49 = vpack.c.bf16 %v2693_v39, %v2692_v55  ;;  %v2072_v55 = vadd.f32 %v6693_v2, %v6930_v31 }
 0x218   :  { %v5317_v17 = vpop.f32.mrf.mxu0 }
 0x219   :  { %v2163_v23 = vadd.f32 %v6693_v2, %v5317_v17  ;;  %v2706_v17 = vmax.f32 %v2152_v32, 0.0  ;;  %v2136_v32 = vadd.f32 %v6693_v2, %v2135_v3  ;;  %v2688_v3 = vmax.f32 %v2080_v22, 0.0 }
 0x21a   :  { %v2154_v28 = vpop.f32.mrf.mxu0  ;;  %v2120_v22 = vadd.f32 %v6693_v2, %v7012_v41 }
 0x21b   :  { %v2709_v15 = vmax.f32 %v2163_v23, 0.0  ;;  %v2155_v4 = vadd.f32 %v6693_v2, %v2154_v28  ;;  %v2139_v23 = vadd.f32 %v6693_v2, %v2138_v7  ;;  %v2075_v7 = vadd.f32 %v6693_v2, %v6945_v12 }
 0x21c   :  { %v5320_v42 = vpop.f32.mrf.mxu0  ;;  %v2702_v12 = vmax.f32 %v2136_v32, 0.0 }
 0x21d   :  { %v2986_v40 = vpack.c.bf16 %v2709_v15, %v2708_v58  ;;  %v2707_v20 = vmax.f32 %v2155_v4, 0.0  ;;  %v2176_v35 = vadd.f32 %v6693_v2, %v5320_v42  ;;  %v2703_v53 = vmax.f32 %v2139_v23, 0.0 }
 0x21e   :  { %v2167_v24 = vpop.f32.mrf.mxu0  ;;  %v2687_v1 = vmax.f32 %v2075_v7, 0.0  ;;  %v2686_v23 = vmax.f32 %v2072_v55, 0.0  ;;  %v2699_v7 = vmax.f32 %v2123_v0, 0.0  ;;  %v7091_v55 = vld [vmem:[%s7699_s5] ss:$0 sm:$0xff] }
 0x21f   :  { %v2985_v28 = vpack.c.bf16 %v2707_v20, %v2706_v17  ;;  %5018 = vmatprep.subr.bf16.mxu1 %v2986_v40  ;;  %v2168_v39 = vadd.f32 %v6693_v2, %v2167_v24  ;;  %v2131_v40 = vadd.f32 %v6693_v2, %v7016_v5  ;;  %v2712_v15 = vmax.f32 %v2176_v35, 0.0 }
 0x220   :  { %v5321_v11 = vpop.f32.mrf.mxu0  ;;  %5019 = vmatpush3.bf16.msra.mxu1 %v2978_v49  ;;  %v2976_v5 = vpack.c.bf16 %v2689_v59, %v2688_v3  ;;  %v2983_v24 = vpack.c.bf16 %v2703_v53, %v2702_v12  ;;  %v2975_v32 = vpack.c.bf16 %v2687_v1, %v2686_v23  ;;  %v2698_v53 = vmax.f32 %v2120_v22, 0.0 }
 0x221   :  { %v2179_v46 = vadd.f32 %v6693_v2, %v5321_v11  ;;  %5020 = vmatprep.subr.bf16.mxu1 %v2985_v28  ;;  %v2128_v11 = vadd.f32 %v6693_v2, %v7006_v8  ;;  %v2710_v42 = vmax.f32 %v2168_v39, 0.0  ;;  %v2701_v17 = vmax.f32 %v2131_v40, 0.0 }
 0x222   :  { %v2170_v58 = vpop.f32.mrf.mxu0  ;;  %v2697_v3 = vmax.f32 %v2115_v9, 0.0 }
 0x223   :  { %v2713_v49 = vmax.f32 %v2179_v46, 0.0  ;;  %v2171_v4 = vadd.f32 %v6693_v2, %v2170_v58  ;;  %v2700_v28 = vmax.f32 %v2128_v11, 0.0  ;;  %v2112_v58 = vadd.f32 %v6693_v2, %v6979_v47 }
 0x224   :  { %v5324_v29 = vpop.f32.mrf.mxu0  ;;  %5021 = vmatpush3.bf16.msra.mxu1 %v2977_v48  ;;  %v2981_v47 = vpack.c.bf16 %v2699_v7, %v2698_v53 }
 0x225   :  { %v7066_v34 = vpack.c.bf16 %v2713_v49, %v2712_v15  ;;  %v2711_v52 = vmax.f32 %v2171_v4, 0.0  ;;  %5022 = vmatprep.subr.bf16.mxu1 %v2984_v43  ;;  %v2192_v8 = vadd.f32 %v6693_v2, %v5324_v29  ;;  %v2982_v39 = vpack.c.bf16 %v2701_v17, %v2700_v28 }
 0x226   :  { %v2183_v20 = vpop.f32.mrf.mxu0  ;;  %v2696_v12 = vmax.f32 %v2112_v58, 0.0 }
 0x227   :  { %v7070_v31 = vpack.c.bf16 %v2711_v52, %v2710_v42  ;;  %v2184_v16 = vadd.f32 %v6693_v2, %v2183_v20  ;;  %v2716_v48 = vmax.f32 %v2192_v8, 0.0  ;;  %v2104_v42 = vadd.f32 %v7091_v55, %v6992_v60 }
 0x228   :  { %v5325_v35 = vpop.f32.mrf.mxu0  ;;  %5023 = vmatpush3.bf16.msra.mxu1 %v2976_v5  ;;  %v2815_v5 = vadd.s32 1024, %v6318_v62  ;;  %v2980_v1 = vpack.c.bf16 %v2697_v3, %v2696_v12 }
 0x229   :  { %v2195_v59 = vadd.f32 %v6693_v2, %v5325_v35  ;;  %5024 = vmatprep.subr.bf16.mxu1 %v2983_v24  ;;  %v2714_v15 = vmax.f32 %v2184_v16, 0.0  ;;  %v2694_v0 = vmax.f32 %v2104_v42, 0.0 }
 0x22a   :  { %v2186_v46 = vpop.f32.mrf.mxu0  ;;  %vm2834_vm15 = vcmp.ge.s32.totalorder %v2815_v5, %v6332_v21  ;;  %vm2851_vm0 = vcmp.lt.s32.totalorder %v2815_v5, %v6362_v18 }
 0x22b   :  { %v2717_v40 = vmax.f32 %v2195_v59, 0.0  ;;  %v2187_v43 = vadd.f32 %v6693_v2, %v2186_v46  ;;  %v2107_v2 = vadd.f32 %v7091_v55, %v7002_v44  ;;  %v2818_v44 = vadd.s32 1408, %v6318_v62  ;;  %vm2867_vm6 = vmand %vm2834_vm15, %vm2851_vm0 }
 0x22c   :  { %v7082_v41 = vpop.f32.mrf.mxu0  ;;  %5025 = vmatpush3.bf16.msra.mxu1 %v2975_v32  ;;  %vm4746_vm4 = vmpackc.low %vm2867_vm6, %vm2867_vm6 }
 0x22d   :  { %v7084_v49 = vpack.c.bf16 %v2717_v40, %v2716_v48  ;;  %v2715_v4 = vmax.f32 %v2187_v43, 0.0  ;;  %5026 = vmatprep.subr.bf16.mxu1 %v2982_v39  ;;  %v2695_v17 = vmax.f32 %v2107_v2, 0.0  ;;  %vm2837_vm2 = vcmp.ge.s32.totalorder %v2818_v44, %v6332_v21 }
 0x22e   :  { %v7086_v13 = vpop.f32.mrf.mxu0  ;;  %vm2854_vm3 = vcmp.lt.s32.totalorder %v2818_v44, %v6362_v18 }
 0x22f   :  { %v7095_v11 = vpack.c.bf16 %v2715_v4, %v2714_v15  ;;  %vm2870_vm7 = vmand %vm2837_vm2, %vm2854_vm3 }
 0x230   :  { %v7097_v29 = vpop.f32.mrf.mxu0  ;;  %5027 = vmatpush3.bf16.msra.mxu1 %v6926_v38  ;;  %v2979_v38 = vpack.c.bf16 %v2695_v17, %v2694_v0  ;;  %vm4748_vm8 = vmpackc.low %vm2870_vm7, %vm2870_vm7 }
 0x231   :  { %5028 = vmatprep.subr.bf16.mxu1 %v2981_v47 }
 0x232   :  { %v7102_v52 = vpop.f32.mrf.mxu0 }
 0x234   :  { %v5332_v20 = vpop.f32.mrf.mxu0  ;;  %5029 = vmatpush3.bf16.msra.mxu1 %v6935_v25 }
 0x235   :  { %5030 = vmatprep.subr.bf16.mxu1 %v2980_v1  ;;  %v2224_v2 = vadd.f32 %v7091_v55, %v5332_v20 }
 0x236   :  { %v2215_v24 = vpop.f32.mrf.mxu0 }
 0x238   :  { %v5333_v60 = vpop.f32.mrf.mxu0  ;;  %5031 = vmatpush3.bf16.msra.mxu1 %v6896_v26 }
 0x239   :  { %5032 = vmatprep.subr.bf16.mxu1 %v2979_v38  ;;  %v2227_v15 = vadd.f32 %v7091_v55, %v5333_v60  ;;  %v2724_v60 = vmax.f32 %v2224_v2, 0.0 }
 0x23a   :  { %v2218_v8 = vpop.f32.mrf.mxu0 }
 0x23b   :  { %v2725_v42 = vmax.f32 %v2227_v15, 0.0  ;;  %v2219_v5 = vadd.f32 %v7091_v55, %v2218_v8  ;;  %v2211_v8 = vadd.f32 %v7091_v55, %v7097_v29 }
 0x23c   :  { %v7112_v25 = vpop.f32.mrf.mxu0  ;;  %5033 = vmatpush3.bf16.msra.mxu1 %v6907_v19 }
 0x23d   :  { %v2723_v15 = vmax.f32 %v2219_v5, 0.0  ;;  %v2721_v29 = vmax.f32 %v2211_v8, 0.0 }
 0x23e   :  { %v7115_v23 = vpop.f32.mrf.mxu0 }
 0x23f   :  { %4747 = vmatmul.mubr.msk.bf16.vlgmr.msra.gmra.mxu1 %vm4746_vm4, %v7741_v54  ;;  %v4968_v28 = vpop.f32.mrf.mxu1 }
 0x240   :  { %v7118_v35 = vpop.f32.mrf.mxu0  ;;  %4749 = vmatprep.mubr.msk.bf16.mxu1 %vm4748_vm8, %v7741_v54 }
 0x241   :  { %v4969_v26 = vpop.f32.mrf.mxu1 }
 0x242   :  { %v7121_v22 = vpop.f32.mrf.mxu0  ;;  %v4970_v16 = vadd.f32 %v4969_v26, %v4968_v28  ;;  %v2216_v28 = vadd.f32 %v7091_v55, %v2215_v24  ;;  %v2208_v24 = vadd.f32 %v7091_v55, %v7082_v41 }
 0x243   :  { %v4971_v59 = vpop.f32.mrf.mxu1 }
 0x244   :  { %v5340_v32 = vpop.f32.mrf.mxu0  ;;  %v7124_v9 = vadd.f32 %v4970_v16, %v7030_v57  ;;  %v2720_v41 = vmax.f32 %v2208_v24, 0.0 }
 0x245   :  { %v4972_v19 = vpop.f32.mrf.mxu1 }
 0x246   :  { %v7126_v39 = vpop.f32.mrf.mxu0 }
 0x248   :  { %v5341_v46 = vpop.f32.mrf.mxu0 }
 0x24a   :  { %v2250_v7 = vpop.f32.mrf.mxu0 }
 0x24c   :  { %v5344_v48 = vpop.f32.mrf.mxu0 }
 0x24d   :  { %v2272_v20 = vadd.f32 %v7091_v55, %v5344_v48 }
 0x24e   :  { %v2263_v40 = vpop.f32.mrf.mxu0 }
 0x250   :  { %v5345_v43 = vpop.f32.mrf.mxu0 }
 0x251   :  { %v2275_v17 = vadd.f32 %v7091_v55, %v5345_v43 }
 0x252   :  { %v2266_v58 = vpop.f32.mrf.mxu0 }
 0x254   :  { %v5348_v53 = vpop.f32.mrf.mxu0 }
 0x255   :  { %v2288_v3 = vadd.f32 %v7091_v55, %v5348_v53  ;;  %v2994_v53 = vpack.c.bf16 %v2725_v42, %v2724_v60  ;;  %v2203_v42 = vadd.f32 %v7091_v55, %v7102_v52 }
 0x256   :  { %v2279_v4 = vpop.f32.mrf.mxu0 }
 0x257   :  { %v2280_v57 = vadd.f32 %v7091_v55, %v2279_v4  ;;  %v2740_v44 = vmax.f32 %v2288_v3, 0.0  ;;  %v2737_v4 = vmax.f32 %v2275_v17, 0.0  ;;  %v2267_v3 = vadd.f32 %v7091_v55, %v2266_v58 }
 0x258   :  { %v5349_v47 = vpop.f32.mrf.mxu0  ;;  %v2259_v58 = vadd.f32 %v7091_v55, %v5341_v46  ;;  %v2719_v52 = vmax.f32 %v2203_v42, 0.0  ;;  %v2251_v46 = vadd.f32 %v7091_v55, %v2250_v7  ;;  %v2240_v7 = vadd.f32 %v7091_v55, %v7112_v25 }
 0x259   :  { %v2291_v12 = vadd.f32 %v7091_v55, %v5349_v47  ;;  %v2738_v16 = vmax.f32 %v2280_v57, 0.0  ;;  %v2722_v47 = vmax.f32 %v2216_v28, 0.0  ;;  %v2736_v57 = vmax.f32 %v2272_v20, 0.0 }
 0x25a   :  { %v2282_v1 = vpop.f32.mrf.mxu0  ;;  %v2992_v28 = vpack.c.bf16 %v2721_v29, %v2720_v41  ;;  %v2817_v25 = vadd.s32 1280, %v6318_v62  ;;  %v2820_v41 = vadd.s32 1664, %v6318_v62 }
 0x25b   :  { %v2741_v0 = vmax.f32 %v2291_v12, 0.0  ;;  %v2283_v38 = vadd.f32 %v7091_v55, %v2282_v1  ;;  %v2264_v12 = vadd.f32 %v7091_v55, %v2263_v40  ;;  %v2993_v5 = vpack.c.bf16 %v2723_v15, %v2722_v47 }
 0x25c   :  { %v7137_v26 = vpop.f32.mrf.mxu0  ;;  %v3000_v17 = vpack.c.bf16 %v2737_v4, %v2736_v57  ;;  %v2256_v40 = vadd.f32 %v7091_v55, %v5340_v32  ;;  %v2243_v4 = vadd.f32 %v7091_v55, %v7118_v35  ;;  %v2728_v35 = vmax.f32 %v2240_v7, 0.0 }
 0x25d   :  { %v3002_v59 = vpack.c.bf16 %v2741_v0, %v2740_v44  ;;  %v2739_v19 = vmax.f32 %v2283_v38, 0.0  ;;  %v2735_v44 = vmax.f32 %v2267_v3, 0.0  ;;  %v2200_v0 = vadd.f32 %v7091_v55, %v7086_v13 }
 0x25e   :  { %v7142_v43 = vpop.f32.mrf.mxu0  ;;  %v2734_v60 = vmax.f32 %v2264_v12, 0.0  ;;  %v2732_v13 = vmax.f32 %v2256_v40, 0.0  ;;  %v2729_v12 = vmax.f32 %v2243_v4, 0.0  ;;  %v2411_v40 = vadd.f32 %v7091_v55, %v6830_v6 }
 0x25f   :  { %v3001_v2 = vpack.c.bf16 %v2739_v19, %v2738_v16  ;;  %5040 = vmatprep.subr.bf16.mxu1 %v3002_v59  ;;  %v2733_v16 = vmax.f32 %v2259_v58, 0.0  ;;  %v2718_v19 = vmax.f32 %v2200_v0, 0.0  ;;  %vm2836_vm9 = vcmp.ge.s32.totalorder %v2817_v25, %v6332_v21 }
 0x260   :  { %v7147_v48 = vpop.f32.mrf.mxu0  ;;  %5041 = vmatpush3.bf16.msra.mxu1 %v2994_v53  ;;  %v2999_v59 = vpack.c.bf16 %v2735_v44, %v2734_v60  ;;  %v2248_v53 = vadd.f32 %v7091_v55, %v7126_v39  ;;  %v2235_v39 = vadd.f32 %v7091_v55, %v7121_v22  ;;  %vm2853_vm10 = vcmp.lt.s32.totalorder %v2817_v25, %v6362_v18 }
 0x261   :  { %5042 = vmatprep.subr.bf16.mxu1 %v3001_v2  ;;  %v2991_v32 = vpack.c.bf16 %v2719_v52, %v2718_v19  ;;  %v2998_v3 = vpack.c.bf16 %v2733_v16, %v2732_v13  ;;  %v2731_v2 = vmax.f32 %v2251_v46, 0.0  ;;  %vm2839_vm11 = vcmp.ge.s32.totalorder %v2820_v41, %v6332_v21  ;;  %vm7194_vm13 = vmand %vm2836_vm9, %vm2853_vm10 }
 0x262   :  { %v7152_v1 = vpop.f32.mrf.mxu0  ;;  %v2730_v47 = vmax.f32 %v2248_v53, 0.0  ;;  %v2727_v44 = vmax.f32 %v2235_v39, 0.0  ;;  %vm2856_vm12 = vcmp.lt.s32.totalorder %v2820_v41, %v6362_v18  ;;  %vm4750_vm15 = vmpackc.low %vm7194_vm13, %vm7194_vm13 }
 0x263   :  { %vm7198_vm14 = vmand %vm2839_vm11, %vm2856_vm12 }
 0x264   :  { %v7157_v38 = vpop.f32.mrf.mxu0  ;;  %5043 = vmatpush3.bf16.msra.mxu1 %v2993_v5  ;;  %v2997_v29 = vpack.c.bf16 %v2731_v2, %v2730_v47  ;;  %v2232_v5 = vadd.f32 %v7091_v55, %v7115_v23  ;;  %vm4752_vm0 = vmpackc.low %vm7198_vm14, %vm7198_vm14  ;;  %v2392_v2 = vadd.f32 %v7091_v55, %v6807_v50 }
 0x265   :  { %5044 = vmatprep.subr.bf16.mxu1 %v3000_v17  ;;  %v2996_v17 = vpack.c.bf16 %v2729_v12, %v2728_v35 }
 0x266   :  { %v7160_v20 = vpop.f32.mrf.mxu0  ;;  %v2726_v22 = vmax.f32 %v2232_v5, 0.0  ;;  %v2766_v25 = vmax.f32 %v2392_v2, 0.0 }
 0x267   :  { %v2312_v46 = vadd.f32 %v7091_v55, %v7160_v20 }
 0x268   :  { %v7163_v8 = vpop.f32.mrf.mxu0  ;;  %5045 = vmatpush3.bf16.msra.mxu1 %v2992_v28  ;;  %v2995_v60 = vpack.c.bf16 %v2727_v44, %v2726_v22  ;;  %v2376_v22 = vadd.f32 %v7091_v55, %v6789_v36 }
 0x269   :  { %5046 = vmatprep.subr.bf16.mxu1 %v2999_v59  ;;  %v2771_v59 = vmax.f32 %v2411_v40, 0.0  ;;  %v2323_v40 = vadd.f32 %v7091_v55, %v7163_v8  ;;  %v2746_v20 = vmax.f32 %v2312_v46, 0.0 }
 0x26a   :  { %v7167_v15 = vpop.f32.mrf.mxu0 }
 0x26b   :  { %v2315_v6 = vadd.f32 %v7091_v55, %v7167_v15 }
 0x26c   :  { %v5360_v24 = vpop.f32.mrf.mxu0  ;;  %5047 = vmatpush3.bf16.msra.mxu1 %v2991_v32 }
 0x26d   :  { %5048 = vmatprep.subr.bf16.mxu1 %v2998_v3  ;;  %v2336_v12 = vadd.f32 %v7091_v55, %v5360_v24 }
 0x26e   :  { %v7173_v57 = vpop.f32.mrf.mxu0 }
 0x26f   :  { %v2752_v44 = vmax.f32 %v2336_v12, 0.0  ;;  %v2328_v41 = vadd.f32 %v7091_v55, %v7173_v57 }
 0x270   :  { %v5361_v42 = vpop.f32.mrf.mxu0  ;;  %5049 = vmatpush3.bf16.msra.mxu1 %v7084_v49  ;;  %v2408_v49 = vadd.f32 %v7091_v55, %v6823_v33 }
 0x271   :  { %5050 = vmatprep.subr.bf16.mxu1 %v2997_v29  ;;  %v2339_v4 = vadd.f32 %v7091_v55, %v5361_v42 }
 0x272   :  { %v2330_v58 = vpop.f32.mrf.mxu0  ;;  %v2770_v52 = vmax.f32 %v2408_v49, 0.0  ;;  %v2379_v49 = vadd.f32 %v7091_v55, %v6798_v10 }
 0x273   :  { %v2753_v42 = vmax.f32 %v2339_v4, 0.0  ;;  %v2331_v35 = vadd.f32 %v7091_v55, %v2330_v58 }
 0x274   :  { %v5364_v0 = vpop.f32.mrf.mxu0  ;;  %5051 = vmatpush3.bf16.msra.mxu1 %v7095_v11  ;;  %v3017_v7 = vpack.c.bf16 %v2771_v59, %v2770_v52  ;;  %v2763_v36 = vmax.f32 %v2379_v49, 0.0  ;;  %v2307_v59 = vadd.f32 %v7091_v55, %v7147_v48 }
 0x275   :  { %5052 = vmatprep.subr.bf16.mxu1 %v2996_v17  ;;  %v2352_v28 = vadd.f32 %v7091_v55, %v5364_v0 }
 0x276   :  { %v2343_v23 = vpop.f32.mrf.mxu0  ;;  %v2745_v2 = vmax.f32 %v2307_v59, 0.0 }
 0x277   :  { %v2756_v19 = vmax.f32 %v2352_v28, 0.0  ;;  %v2320_v28 = vadd.f32 %v7091_v55, %v7157_v38 }
 0x278   :  { %v5365_v11 = vpop.f32.mrf.mxu0  ;;  %5053 = vmatpush3.bf16.msra.mxu1 %v7066_v34  ;;  %v2344_v34 = vadd.f32 %v7091_v55, %v2343_v23  ;;  %v3008_v23 = vpack.c.bf16 %v2753_v42, %v2752_v44  ;;  %v7759_v44 = vld [vmem:[#allocation6_spill] sm:$0xff] }
 0x279   :  { %v2355_v33 = vadd.f32 %v7091_v55, %v5365_v11  ;;  %5054 = vmatprep.subr.bf16.mxu1 %v2995_v60  ;;  %v2751_v60 = vmax.f32 %v2331_v35, 0.0 }
 0x27a   :  { %v2346_v16 = vpop.f32.mrf.mxu0 }
 0x27b   :  { %v2757_v13 = vmax.f32 %v2355_v33, 0.0  ;;  %v2347_v53 = vadd.f32 %v7091_v55, %v2346_v16  ;;  %v2762_v33 = vmax.f32 %v2376_v22, 0.0  ;;  %v2748_v16 = vmax.f32 %v2320_v28, 0.0 }
 0x27c   :  { %5055 = vmatpush3.bf16.msra.mxu1 %v7070_v31  ;;  %v2395_v31 = vadd.f32 %v7091_v55, %v6816_v45  ;;  %v5368_v39 = vpop.f32.mrf.mxu0 }
 0x27d   :  { %v3010_v32 = vpack.c.bf16 %v2757_v13, %v2756_v19  ;;  %5062 = vmatprep.subr.bf16.mxu1 %v6849_v14  ;;  %v2755_v3 = vmax.f32 %v2347_v53, 0.0  ;;  %v2754_v14 = vmax.f32 %v2344_v34, 0.0  ;;  %v2368_v52 = vadd.f32 %v7091_v55, %v5368_v39 }
 0x27e   :  { %v2767_v45 = vmax.f32 %v2395_v31, 0.0  ;;  %v2359_v24 = vpop.f32.mrf.mxu0  ;;  %v2747_v13 = vmax.f32 %v2315_v6, 0.0  ;;  %v3013_v53 = vpack.c.bf16 %v2763_v36, %v2762_v33  ;;  %v2819_v31 = vadd.s32 1536, %v6318_v62 }
 0x27f   :  { %4751 = vmatmul.mubr.msk.bf16.vlgmr.msra.gmra.mxu1 %vm4750_vm15, %v7741_v54  ;;  %v4990_v47 = vpop.f32.mrf.mxu1  ;;  %v3009_v50 = vpack.c.bf16 %v2755_v3, %v2754_v14  ;;  %v2760_v15 = vmax.f32 %v2368_v52, 0.0  ;;  %v2360_v34 = vadd.f32 %v7091_v55, %v2359_v24  ;;  %v2304_v3 = vadd.f32 %v7091_v55, %v7137_v26 }
 0x280   :  { %5063 = vmatpush3.bf16.msra.mxu1 %v3010_v32  ;;  %4753 = vmatprep.mubr.msk.bf16.mxu1 %vm4752_vm0, %v7741_v54  ;;  %v3015_v57 = vpack.c.bf16 %v2767_v45, %v2766_v25  ;;  %v5369_v11 = vpop.f32.mrf.mxu0  ;;  %v3005_v48 = vpack.c.bf16 %v2747_v13, %v2746_v20  ;;  %v2822_v14 = vadd.s32 1920, %v6318_v62  ;;  %vm2838_vm2 = vcmp.ge.s32.totalorder %v2819_v31, %v6332_v21  ;;  %v7753_v25 = vld [vmem:[#allocation7_spill] sm:$0xff]  ;;  %v7754_v45 = vld [vmem:[#allocation14_spill] sm:$0xff] }
 0x281   :  { %5064 = vmatprep.subr.bf16.mxu1 %v3017_v7  ;;  %v4991_v29 = vpop.f32.mrf.mxu1  ;;  %v2371_v8 = vadd.f32 %v7091_v55, %v5369_v11  ;;  %v2758_v7 = vmax.f32 %v2360_v34, 0.0  ;;  %v2744_v39 = vmax.f32 %v2304_v3, 0.0  ;;  %vm2855_vm3 = vcmp.lt.s32.totalorder %v2819_v31, %v6362_v18  ;;  %v3413_v34 = vld [vmem:[%s7697_s8] sm:$0xff]  ;;  %v3504_v31 = vld [vmem:[%s7703_s9 + $0x10] sm:$0xff] }
 0x282   :  { %v4992_v5 = vadd.f32 %v4991_v29, %v4990_v47  ;;  %v2362_v38 = vpop.f32.mrf.mxu0  ;;  %v2296_v29 = vadd.f32 %v7091_v55, %v7142_v43  ;;  %vm2841_vm6 = vcmp.ge.s32.totalorder %v2822_v14, %v6332_v21  ;;  %vm2858_vm7 = vcmp.lt.s32.totalorder %v2822_v14, %v6362_v18  ;;  %vm2871_vm4 = vmand %vm2838_vm2, %vm2855_vm3  ;;  %v7750_v43 = vld [vmem:[#allocation15_spill] sm:$0xff] }
 0x283   :  { %v4993_v17 = vpop.f32.mrf.mxu1  ;;  %v2761_v32 = vmax.f32 %v2371_v8, 0.0  ;;  %v2363_v4 = vadd.f32 %v7091_v55, %v2362_v38  ;;  %v3004_v26 = vpack.c.bf16 %v2745_v2, %v2744_v39  ;;  %vm2874_vm8 = vmand %vm2841_vm6, %vm2858_vm7  ;;  %vm3369_vm15 = vcmask 1043456  }
 0x284   :  { %5065 = vmatpush3.bf16.msra.mxu1 %v3009_v50  ;;  %v7224_v0 = vadd.f32 %v4992_v5, %v7124_v9  ;;  %v2750_v9 = vmax.f32 %v2328_v41, 0.0  ;;  %v2742_v35 = vmax.f32 %v2296_v29, 0.0  ;;  %vm4754_vm9 = vmpackc.low %vm2871_vm4, %vm2871_vm4  ;;  %v7751_v5 = vld [vmem:[#allocation10_spill] sm:$0xff]  ;;  %v7755_v17 = vld [vmem:[#allocation8_spill] sm:$0xff]  ;;  %v7760_v41 = vmov 0.0  }
 0x285   :  { %5066 = vmatprep.subr.bf16.mxu1 %v6825_v56  ;;  %v4994_v58 = vpop.f32.mrf.mxu1  ;;  %v2749_v56 = vmax.f32 %v2323_v40, 0.0  ;;  %v3012_v47 = vpack.c.bf16 %v2761_v32, %v2760_v15  ;;  %v2759_v12 = vmax.f32 %v2363_v4, 0.0  ;;  %vm4756_vm10 = vmpackc.low %vm2874_vm8, %vm2874_vm8  ;;  %v3414_v32 = vld [vmem:[%s7697_s8 + $0x8] sm:$0xff]  ;;  %vm3365_vm0 = vcmask 64512  }
 0x286   :  { %v3007_v10 = vpack.c.bf16 %v2751_v60, %v2750_v9  ;;  %v3416_v2 = vpack.c.bf16 %v3414_v32, %v3413_v34  ;;  %vm3512_vm2 = vcmask 261120   ;;  %vm4258_vm3 = vcmp.ge.s32.totalorder %v6318_v62, 35 }
 0x287   :  { %v3006_v19 = vpack.c.bf16 %v2749_v56, %v2748_v16  ;;  %vm4259_vm6 = vcmp.lt.s32.totalorder %v6318_v62, 40 }
 0x288   :  { %5067 = vmatpush3.bf16.msra.mxu1 %v3008_v23  ;;  %v3355_v23 = vld [vmem:[%s7701_s6] sm:$0xff]  ;;  %vm7583_vm8 = vmand %vm4258_vm3, %vm4259_vm6 }
 0x289   :  { %5068 = vmatprep.subr.bf16.mxu1 %v3015_v57  ;;  %v3357_v57 = vpack.c.bf16 %v3355_v23, %v3355_v23 }
 0x28c   :  { %5069 = vmatpush3.bf16.msra.mxu1 %v3007_v10 }
 0x28d   :  { %5070 = vmatprep.subr.bf16.mxu1 %v6811_v51  ;;  %v2299_v51 = vadd.f32 %v7091_v55, %v7152_v1  ;;  %v3011_v1 = vpack.c.bf16 %v2759_v12, %v2758_v7  ;;  %v7749_v55 = vld [vmem:[#allocation9_spill] sm:$0xff]  ;;  %v3505_v7 = vld [vmem:[%s7703_s9 + $0x18] sm:$0xff] }
 0x28e   :  { %v7306_v39 = vpack.c.bf16 %v3505_v7, %v3504_v31 }
 0x28f   :  { %v2743_v42 = vmax.f32 %v2299_v51, 0.0 }
 0x290   :  { %5071 = vmatpush3.bf16.msra.mxu1 %v3006_v19 }
 0x291   :  { %5072 = vmatprep.subr.bf16.mxu1 %v3013_v53  ;;  %v3003_v50 = vpack.c.bf16 %v2743_v42, %v2742_v35  ;;  %v3503_v42 = vld [vmem:[%s7703_s9 + $0x8] sm:$0xff] }
 0x294   :  { %5073 = vmatpush3.bf16.msra.mxu1 %v3005_v48  ;;  %v4760_v48 = vld [vmem:[%s7702_s7] ss:$0 sm:$0xff] }
 0x295   :  { %5074 = vmatprep.subr.bf16.mxu1 %v3012_v47 }
 0x298   :  { %5075 = vmatpush3.bf16.msra.mxu1 %v3004_v26  ;;  %v3502_v26 = vld [vmem:[%s7703_s9] sm:$0xff] }
 0x299   :  { %5076 = vmatprep.subr.bf16.mxu1 %v3011_v1 }
 0x29c   :  { %5077 = vmatpush3.bf16.msra.mxu1 %v3003_v50  ;;  %v7316_v50 = vpack.c.bf16 %v3503_v42, %v3502_v26 }
 0x29d   :  { %5084 = vmatprep.subr.bf16.mxu1 %v7028_v27  ;;  %v7752_v27 = vld [vmem:[#allocation13_spill] sm:$0xff] }
 0x29f   :  { %4755 = vmatmul.mubr.msk.bf16.vlgmr.msra.gmra.mxu1 %vm4754_vm9, %v7741_v54 }
 0x2a0   :  { %5085 = vmatpush3.bf16.msra.mxu1 %v6952_v63  ;;  %4757 = vmatprep.mubr.msk.bf16.mxu1 %vm4756_vm10, %v7741_v54  ;;  %v2821_v63 = vadd.s32 1792, %v6318_v62 }
 0x2a1   :  { %5086 = vmatprep.subr.bf16.mxu1 %v7032_v30  ;;  %v7756_v30 = vld [vmem:[#allocation11_spill] sm:$0xff] }
 0x2a2   :  { %vm2840_vm11 = vcmp.ge.s32.totalorder %v2821_v63, %v6332_v21  ;;  %vm2857_vm12 = vcmp.lt.s32.totalorder %v2821_v63, %v6362_v18 }
 0x2a3   :  { %vm2873_vm13 = vmand %vm2840_vm11, %vm2857_vm12 }
 0x2a4   :  { %5087 = vmatpush3.bf16.msra.mxu1 %v6954_v61  ;;  %v7757_v61 = vld [vmem:[#allocation5_spill] sm:$0xff]  ;;  %vm4758_vm14 = vmpackc.low %vm2873_vm13, %vm2873_vm13 }
 0x2a5   :  { %5088 = vmatprep.subr.bf16.mxu1 %v7021_v37  ;;  %v7758_v37 = vld [vmem:[#allocation12_spill] sm:$0xff] }
 0x2a8   :  { %5089 = vmatpush3.bf16.msra.mxu1 %v7749_v55  ;;  %v3508_v55 = vld [vmem:[%s7704_s13] sm:$0xff] }
 0x2a9   :  { %5090 = vmatprep.subr.bf16.mxu1 %v7750_v43  ;;  %v3511_v43 = vpack.c.bf16 %v3508_v55, %v3508_v55 }
 0x2ac   :  { %5091 = vmatpush3.bf16.msra.mxu1 %v7751_v5  ;;  %v4762_v5 = vld [vmem:[%s7700_s10] ss:$0 sm:$0xff]  ;;  %s5763_s10 = smov 64  }
 0x2ad   :  { %5092 = vmatprep.subr.bf16.mxu1 %v7752_v27 }
 0x2b0   :  { %5093 = vmatpush3.bf16.msra.mxu1 %v7753_v25 }
 0x2b1   :  { %5094 = vmatprep.subr.bf16.mxu1 %v7754_v45 }
 0x2b4   :  { %5095 = vmatpush3.bf16.msra.mxu1 %v7755_v17  ;;  %v7761_v17 = vld [vmem:[#allocation4_spill] sm:$0xff] }
 0x2b5   :  { %5096 = vmatprep.subr.bf16.mxu1 %v7756_v30 }
 0x2b8   :  { %5097 = vmatpush3.bf16.msra.mxu1 %v7757_v61 }
 0x2b9   :  { %5098 = vmatprep.subr.bf16.mxu1 %v7758_v37 }
 0x2bc   :  { %5099 = vmatpush3.bf16.msra.mxu1 %v7759_v44 }
 0x2bd   :  { %5414 = vmatprep.subr.bf16.mxu1 %v7760_v41 }
 0x2bf   :  { %v5012_v24 = vpop.f32.mrf.mxu1  ;;  %4759 = vmatmul.mubr.msk.bf16.vlgmr.msra.gmra.mxu1 %vm4758_vm14, %v7741_v54  ;;  %v3371_v54 = vsel %vm3369_vm15, %v3357_v57, 0  ;;  %v3509_v57 = vld [vmem:[%s7705_s14] sm:$0xff] }
 0x2c0   :  { %5416 = vmatprep.mubr.msk.bf16.mxu1 %vm5760_vm1, %v7760_v41  ;;  %5415 = vmatpush3.bf16.msra.mxu1 %v3371_v54 }
 0x2c1   :  { %v5013_v22 = vpop.f32.mrf.mxu1  ;;  %5420 = vmatprep.subr.bf16.mxu1 %v7760_v41 }
 0x2c2   :  { %v5014_v21 = vadd.f32 %v5013_v22, %v5012_v24 }
 0x2c3   :  { %v5015_v58 = vpop.f32.mrf.mxu1 }
 0x2c4   :  { %v3190_v18 = vadd.f32 %v5014_v21, %v7224_v0  ;;  %v3510_v21 = vld [vmem:[#allocation2] sm:$0xff] }
 0x2c5   :  { %v5016_v49 = vpop.f32.mrf.mxu1 }
 0x2ff   :  { %v5034_v40 = vpop.f32.mrf.mxu1 }
 0x301   :  { %v5035_v60 = vpop.f32.mrf.mxu1 }
 0x302   :  { %v5036_v28 = vadd.f32 %v5035_v60, %v5034_v40 }
 0x303   :  { %v5037_v9 = vpop.f32.mrf.mxu1 }
 0x304   :  { %v3230_v11 = vadd.f32 %v5036_v28, %v3190_v18 }
 0x305   :  { %v5038_v33 = vpop.f32.mrf.mxu1 }
 0x33f   :  { %v5056_v36 = vpop.f32.mrf.mxu1 }
 0x341   :  { %v5057_v56 = vpop.f32.mrf.mxu1 }
 0x342   :  { %v5058_v46 = vadd.f32 %v5057_v56, %v5056_v36 }
 0x343   :  { %v5059_v0 = vpop.f32.mrf.mxu1 }
 0x344   :  { %v3270_v19 = vadd.f32 %v5058_v46, %v3230_v11 }
 0x345   :  { %v5060_v6 = vpop.f32.mrf.mxu1 }
 0x35f   :  { %v5078_v10 = vpop.f32.mrf.mxu1 }
 0x361   :  { %v5079_v52 = vpop.f32.mrf.mxu1 }
 0x362   :  { %v5080_v38 = vadd.f32 %v5079_v52, %v5078_v10 }
 0x363   :  { %v5081_v8 = vpop.f32.mrf.mxu1 }
 0x364   :  { %v3310_v53 = vadd.f32 %v5080_v38, %v3270_v19 }
 0x365   :  { %v5082_v16 = vpop.f32.mrf.mxu1 }
 0x37f   :  { %v5100_v59 = vpop.f32.mrf.mxu1 }
 0x381   :  { %v5101_v13 = vpop.f32.mrf.mxu1 }
 0x382   :  { %v5102_v15 = vadd.f32 %v5101_v13, %v5100_v59  ;;  %v3591_v59 = vld [vmem:[#allocation2 + $0x8] sm:$0xff] }
 0x383   :  { %v5103_v4 = vpop.f32.mrf.mxu1 }
 0x384   :  { %v3350_v3 = vadd.f32 %v5102_v15, %v3310_v53 }
 0x385   :  { %v5104_v20 = vpop.f32.mrf.mxu1 }
 0x386   :  { %v3356_v51 = vpack.c.bf16 %v3350_v3, %v3350_v3 }
 0x388   :  { %5417 = vmatmul.mubr.msk.bf16.vlgmr.msra.gmra.mxu1 %vm3365_vm0, %v3356_v51 }
 0x389   :  { %5421 = vmatpush3.bf16.msra.mxu1 %v3416_v2  ;;  %5422 = vmatprep.mubr.msk.bf16.mxu1 %vm5760_vm1, %v7760_v41 }
 0x38a   :  { %5426 = vmatprep.subr.bf16.mxu1 %v7760_v41 }
 0x448   :  { %v3407_v47 = vpop.f32.mrf.mxu1 }
 0x449   :  { %v3408_v12 = vadd.f32 %v4760_v48, %v3407_v47 }
 0x44a   :  { %v5418_v14 = vpop.f32.mrf.mxu1 }
 0x44b   :  { %v3415_v29 = vpack.c.bf16 %v3408_v12, %v3408_v12 }
 0x44c   :  { %v3410_v1 = vpop.f32.mrf.mxu1 }
 0x44d   :  { %5423 = vmatmul.mubr.msk.bf16.vlgmr.msra.gmra.mxu1 %vm123_vm5, %v3415_v29  ;;  %v3671_v1 = vld [vmem:[#allocation2 + $0x10] sm:$0xff] }
 0x44e   :  { %5427 = vmatpush3.bf16.msra.mxu1 %v7306_v39  ;;  %v5419_v35 = vpop.f32.mrf.mxu1  ;;  %5430 = vmatprep.mubr.msk.bf16.mxu1 %vm5760_vm1, %v7760_v41 }
 0x44f   :  { %5428 = vmatprep.subr.bf16.mxu1 %v7760_v41 }
 0x452   :  { %5429 = vmatpush3.bf16.msra.mxu1 %v7316_v50 }
 0x453   :  { %5434 = vmatprep.subr.bf16.mxu1 %v7760_v41 }
 0x455   :  { %5431 = vmatmul.mubr.msk.bf16.vlgmr.msra.gmra.mxu1 %vm3512_vm2, %v3511_v43 }
 0x456   :  { %5435 = vmatpush3.bf16.msra.mxu1 %v7306_v39  ;;  %5438 = vmatprep.mubr.msk.bf16.mxu1 %vm5760_vm1, %v7760_v41 }
 0x457   :  { %5436 = vmatprep.subr.bf16.mxu1 %v7760_v41 }
 0x45a   :  { %5437 = vmatpush3.bf16.msra.mxu1 %v7316_v50 }
 0x45b   :  { %5442 = vmatprep.subr.bf16.mxu1 %v7760_v41 }
 0x50d   :  { %v3461_v27 = vpop.f32.mrf.mxu1 }
 0x50e   :  { %v3462_v25 = vadd.f32 %v4762_v5, %v3461_v27 }
 0x50f   :  { %v5424_v45 = vpop.f32.mrf.mxu1 }
 0x510   :  { %v3468_v63 = vcombine.high %v3462_v25, %v3462_v25  ;;  %v3475_v30 = vrot.slane %v3462_v25, %v7761_v17  ;;  %4764 = vst.sshfl [vmem:[#allocation2 + $0x20] sm:$0x3 pattern:$0x76325410] %v3462_v25 }
 0x511   :  { %v3464_v61 = vpop.f32.mrf.mxu1 }
 0x512   :  { %v3482_v37 = vrot.slane %v3468_v63, %v7761_v17  ;;  %v3483_v44 = vcombine.high %v3475_v30, %v3475_v30  ;;  %4765 = vst.sshfl [vmem:[#allocation2 + $0x30] sm:$0x3 pattern:$0x76325410] %v3468_v63 }
 0x513   :  { %v5425_v24 = vpop.f32.mrf.mxu1 }
 0x514   :  { %v3484_v22 = vcombine.high %v3482_v37, %v3482_v37  ;;  %3491 = vst [vmem:[#allocation2 + $0x28] sm:$0x3] %v3483_v44 }
 0x515   :  { %v3550_v58 = vpop.f32.mrf.mxu1 }
 0x516   :  { %3493 = vst [vmem:[#allocation2 + $0x38] sm:$0x3] %v3484_v22  ;;  %v3556_v18 = vadd.f32 %v3550_v58, %v3510_v21 }
 0x517   :  { %v5432_v49 = vpop.f32.mrf.mxu1 }
 0x518   :  { %5645 = vtanh.f32 %v3556_v18  ;;  %v4767_v28 = vmul.f32 -1.442695, %v3556_v18 }
 0x519   :  { %v3553_v40 = vpop.f32.mrf.mxu1 }
 0x51a   :  { %5647 = vpow2.f32 %v4767_v28 }
 0x51b   :  { %v5433_v23 = vpop.f32.mrf.mxu1 }
 0x51c   :  { %v3751_v23 = vld [vmem:[#allocation2 + $0x18] sm:$0xff] }
 0x525   :  { %v5646_v60 = vpop.eup %5645 }
 0x526   :  { %3570 = vrot.lane.b32.xlu0 %v5646_v60, %s5763_s10 }
 0x527   :  { %v5648_v9 = vpop.eup %5647 }
 0x528   :  { %v3560_v54 = vadd.f32 1.0, %v5648_v9 }
 0x52a   :  { %3565 = vrot.lane.b32.xlu0 %v3509_v57, %s5764_s1  ;;  %5649 = vrcp.f32 %v3560_v54 }
 0x537   :  { %v5650_v11 = vpop.eup %5649 }
 0x598   :  { %v3571_v33 = vpop.permute.xlu0 %3570 }
 0x599   :  { %v3573_v36 = vmul.f32 %v5650_v11, %v3571_v33 }
 0x59b   :  { %3575 = vrot.lane.b32.xlu1 %v3573_v36, %s5764_s1 }
 0x59c   :  { %v3566_v56 = vpop.permute.xlu0 %3565 }
 0x59d   :  { %v3568_v0 = vmul.f32 %v5650_v11, %v3566_v56 }
 0x60d   :  { %v3576_v6 = vpop.permute.xlu1 %3575 }
 0x60e   :  { %v3578_v10 = vadd.f32 %v3576_v6, %v3568_v0 }
 0x610   :  { %5651 = vtanh.f32 %v3578_v10 }
 0x61d   :  { %v5652_v52 = vpop.eup %5651 }
 0x61e   :  { %3581 = vrot.lane.b32.xlu1 %v5652_v52, %s5763_s10 }
 0x690   :  { %v3582_v8 = vpop.permute.xlu1 %3581 }
 0x691   :  { %v7345_v16 = vmul.f32 %v5650_v11, %v3582_v8 }
 0x693   :  { %v3592_v46 = vpack.c.bf16 %v7345_v16, %v7345_v16 }
 0x695   :  { %3594 = vrot.lane.b32.xlu0 %v3592_v46, %s5764_s1 }
 0x707   :  { %v3595_v38 = vpop.permute.xlu0 %3594 }
 0x708   :  { %5439 = vmatmul.mubr.msk.bf16.vlgmr.msra.gmra.mxu1 %vm3512_vm2, %v3595_v38 }
 0x709   :  { %5443 = vmatpush3.bf16.msra.mxu1 %v7306_v39  ;;  %5446 = vmatprep.mubr.msk.bf16.mxu1 %vm5760_vm1, %v7760_v41 }
 0x70a   :  { %5444 = vmatprep.subr.bf16.mxu1 %v7760_v41 }
 0x70d   :  { %5445 = vmatpush3.bf16.msra.mxu1 %v7316_v50 }
 0x70e   :  { %5450 = vmatprep.subr.bf16.mxu1 %v7760_v41 }
 0x7c8   :  { %v3633_v19 = vpop.f32.mrf.mxu1 }
 0x7c9   :  { %v3639_v13 = vadd.f32 %v3633_v19, %v3591_v59 }
 0x7ca   :  { %v5440_v53 = vpop.f32.mrf.mxu1 }
 0x7cb   :  { %5653 = vtanh.f32 %v3639_v13  ;;  %v4769_v4 = vmul.f32 -1.442695, %v3639_v13 }
 0x7cc   :  { %v3636_v15 = vpop.f32.mrf.mxu1 }
 0x7cd   :  { %5655 = vpow2.f32 %v4769_v4  ;;  %v3830_v15 = vld [vmem:[#allocation2 + $0x20] sm:$0xff] }
 0x7ce   :  { %v5441_v34 = vpop.f32.mrf.mxu1 }
 0x7d8   :  { %v5654_v32 = vpop.eup %5653 }
 0x7d9   :  { %3649 = vrot.lane.b32.xlu1 %v5654_v32, %s5763_s10 }
 0x7da   :  { %v5656_v3 = vpop.eup %5655 }
 0x7db   :  { %v3643_v20 = vadd.f32 1.0, %v5656_v3 }
 0x7dd   :  { %5657 = vrcp.f32 %v3643_v20 }
 0x7ea   :  { %v5658_v2 = vpop.eup %5657 }
 0x7eb   :  { %v3647_v31 = vmul.f32 %v5658_v2, %v3578_v10 }
 0x84b   :  { %v3650_v51 = vpop.permute.xlu1 %3649 }
 0x84c   :  { %v3652_v48 = vmul.f32 %v5658_v2, %v3650_v51 }
 0x84e   :  { %3654 = vrot.lane.b32.xlu0 %v3652_v48, %s5764_s1 }
 0x8c0   :  { %v3655_v7 = vpop.permute.xlu0 %3654 }
 0x8c1   :  { %v3657_v47 = vadd.f32 %v3655_v7, %v3647_v31 }
 0x8c3   :  { %5659 = vtanh.f32 %v3657_v47 }
 0x8d0   :  { %v5660_v12 = vpop.eup %5659 }
 0x8d1   :  { %3660 = vrot.lane.b32.xlu1 %v5660_v12, %s5763_s10 }
 0x943   :  { %v3661_v14 = vpop.permute.xlu1 %3660 }
 0x944   :  { %v7360_v29 = vmul.f32 %v5658_v2, %v3661_v14 }
 0x946   :  { %v3672_v26 = vpack.c.bf16 %v7360_v29, %v7360_v29 }
 0x948   :  { %3674 = vrot.lane.b32.xlu0 %v3672_v26, %s5764_s1 }
 0x9ba   :  { %v3675_v42 = vpop.permute.xlu0 %3674 }
 0x9bb   :  { %5447 = vmatmul.mubr.msk.bf16.vlgmr.msra.gmra.mxu1 %vm3512_vm2, %v3675_v42 }
 0x9bc   :  { %5451 = vmatpush3.bf16.msra.mxu1 %v7306_v39  ;;  %5454 = vmatprep.mubr.msk.bf16.mxu1 %vm5760_vm1, %v7760_v41 }
 0x9bd   :  { %5452 = vmatprep.subr.bf16.mxu1 %v7760_v41 }
 0x9c0   :  { %5453 = vmatpush3.bf16.msra.mxu1 %v7316_v50 }
 0x9c1   :  { %5458 = vmatprep.subr.bf16.mxu1 %v7760_v41 }
 0xa7b   :  { %v3713_v35 = vpop.f32.mrf.mxu1 }
 0xa7c   :  { %v3719_v55 = vadd.f32 %v3713_v35, %v3671_v1 }
 0xa7d   :  { %v5448_v43 = vpop.f32.mrf.mxu1 }
 0xa7e   :  { %5661 = vtanh.f32 %v3719_v55  ;;  %v4771_v45 = vmul.f32 -1.442695, %v3719_v55 }
 0xa7f   :  { %v3716_v5 = vpop.f32.mrf.mxu1 }
 0xa80   :  { %5663 = vpow2.f32 %v4771_v45 }
 0xa81   :  { %v5449_v27 = vpop.f32.mrf.mxu1 }
 0xa82   :  { %v3910_v27 = vld [vmem:[#allocation2 + $0x28] sm:$0xff] }
 0xa8b   :  { %v5662_v25 = vpop.eup %5661 }
 0xa8c   :  { %3729 = vrot.lane.b32.xlu1 %v5662_v25, %s5763_s10 }
 0xa8d   :  { %v5664_v63 = vpop.eup %5663 }
 0xa8e   :  { %v3723_v17 = vadd.f32 1.0, %v5664_v63 }
 0xa90   :  { %5665 = vrcp.f32 %v3723_v17 }
 0xa9d   :  { %v5666_v30 = vpop.eup %5665 }
 0xa9e   :  { %v3727_v44 = vmul.f32 %v5666_v30, %v3657_v47 }
 0xafe   :  { %v3730_v61 = vpop.permute.xlu1 %3729 }
 0xaff   :  { %v3732_v37 = vmul.f32 %v5666_v30, %v3730_v61 }
 0xb01   :  { %3734 = vrot.lane.b32.xlu0 %v3732_v37, %s5764_s1 }
 0xb73   :  { %v3735_v24 = vpop.permute.xlu0 %3734 }
 0xb74   :  { %v3737_v22 = vadd.f32 %v3735_v24, %v3727_v44 }
 0xb76   :  { %5667 = vtanh.f32 %v3737_v22 }
 0xb83   :  { %v5668_v21 = vpop.eup %5667 }
 0xb84   :  { %3740 = vrot.lane.b32.xlu1 %v5668_v21, %s5763_s10 }
 0xbf6   :  { %v3741_v58 = vpop.permute.xlu1 %3740 }
 0xbf7   :  { %v7375_v18 = vmul.f32 %v5666_v30, %v3741_v58 }
 0xbf9   :  { %v3752_v49 = vpack.c.bf16 %v7375_v18, %v7375_v18 }
 0xbfb   :  { %3754 = vrot.lane.b32.xlu0 %v3752_v49, %s5764_s1 }
 0xc6d   :  { %v3755_v40 = vpop.permute.xlu0 %3754 }
 0xc6e   :  { %5455 = vmatmul.mubr.msk.bf16.vlgmr.msra.gmra.mxu1 %vm3512_vm2, %v3755_v40 }
 0xc6f   :  { %5459 = vmatpush3.bf16.msra.mxu1 %v7306_v39  ;;  %5462 = vmatprep.mubr.msk.bf16.mxu1 %vm5760_vm1, %v7760_v41 }
 0xc70   :  { %5460 = vmatprep.subr.bf16.mxu1 %v7760_v41 }
 0xc73   :  { %5461 = vmatpush3.bf16.msra.mxu1 %v7316_v50 }
 0xc74   :  { %5466 = vmatprep.subr.bf16.mxu1 %v7760_v41 }
 0xd2e   :  { %v3793_v60 = vpop.f32.mrf.mxu1 }
 0xd2f   :  { %v3799_v57 = vadd.f32 %v3793_v60, %v3751_v23 }
 0xd30   :  { %v5456_v28 = vpop.f32.mrf.mxu1 }
 0xd31   :  { %5669 = vtanh.f32 %v3799_v57  ;;  %v4773_v33 = vmul.f32 -1.442695, %v3799_v57 }
 0xd32   :  { %v3796_v9 = vpop.f32.mrf.mxu1 }
 0xd33   :  { %5671 = vpow2.f32 %v4773_v33 }
 0xd34   :  { %v5457_v54 = vpop.f32.mrf.mxu1 }
 0xd3e   :  { %v5670_v11 = vpop.eup %5669 }
 0xd3f   :  { %3809 = vrot.lane.b32.xlu1 %v5670_v11, %s5763_s10  ;;  %v3990_v11 = vld [vmem:[#allocation2 + $0x30] sm:$0xff] }
 0xd40   :  { %v5672_v36 = vpop.eup %5671 }
 0xd41   :  { %v3803_v56 = vadd.f32 1.0, %v5672_v36 }
 0xd43   :  { %5673 = vrcp.f32 %v3803_v56 }
 0xd50   :  { %v5674_v0 = vpop.eup %5673 }
 0xd51   :  { %v3807_v52 = vmul.f32 %v5674_v0, %v3737_v22 }
 0xdb1   :  { %v3810_v6 = vpop.permute.xlu1 %3809 }
 0xdb2   :  { %v3812_v10 = vmul.f32 %v5674_v0, %v3810_v6 }
 0xdb4   :  { %3814 = vrot.lane.b32.xlu0 %v3812_v10, %s5764_s1 }
 0xe26   :  { %v3815_v8 = vpop.permute.xlu0 %3814 }
 0xe27   :  { %v3817_v46 = vadd.f32 %v3815_v8, %v3807_v52 }
 0xe29   :  { %5675 = vtanh.f32 %v3817_v46 }
 0xe36   :  { %v5676_v38 = vpop.eup %5675 }
 0xe37   :  { %3820 = vrot.lane.b32.xlu1 %v5676_v38, %s5763_s10 }
 0xea9   :  { %v3821_v59 = vpop.permute.xlu1 %3820 }
 0xeaa   :  { %v7390_v19 = vmul.f32 %v5674_v0, %v3821_v59 }
 0xeac   :  { %v3831_v13 = vpack.c.bf16 %v7390_v19, %v7390_v19 }
 0xeae   :  { %3833 = vrot.lane.b32.xlu0 %v3831_v13, %s5764_s1 }
 0xf20   :  { %v3834_v53 = vpop.permute.xlu0 %3833 }
 0xf21   :  { %5463 = vmatmul.mubr.msk.bf16.vlgmr.msra.gmra.mxu1 %vm3512_vm2, %v3834_v53 }
 0xf22   :  { %5467 = vmatpush3.bf16.msra.mxu1 %v7306_v39  ;;  %5470 = vmatprep.mubr.msk.bf16.mxu1 %vm5760_vm1, %v7760_v41 }
 0xf23   :  { %5468 = vmatprep.subr.bf16.mxu1 %v7760_v41 }
 0xf26   :  { %5469 = vmatpush3.bf16.msra.mxu1 %v7316_v50 }
 0xf27   :  { %5474 = vmatprep.subr.bf16.mxu1 %v7760_v41 }
 0xfe1   :  { %v3872_v34 = vpop.f32.mrf.mxu1 }
 0xfe2   :  { %v3878_v32 = vadd.f32 %v3872_v34, %v3830_v15 }
 0xfe3   :  { %v5464_v4 = vpop.f32.mrf.mxu1 }
 0xfe4   :  { %5677 = vtanh.f32 %v3878_v32  ;;  %v4775_v51 = vmul.f32 -1.442695, %v3878_v32 }
 0xfe5   :  { %v3875_v3 = vpop.f32.mrf.mxu1 }
 0xfe6   :  { %5679 = vpow2.f32 %v4775_v51  ;;  %v4070_v3 = vld [vmem:[#allocation2 + $0x38] sm:$0xff] }
 0xfe7   :  { %v5465_v20 = vpop.f32.mrf.mxu1 }
 0xff1   :  { %v5678_v2 = vpop.eup %5677 }
 0xff2   :  { %3888 = vrot.lane.b32.xlu1 %v5678_v2, %s5763_s10 }
 0xff3   :  { %v5680_v48 = vpop.eup %5679 }
 0xff4   :  { %v3882_v31 = vadd.f32 1.0, %v5680_v48 }
 0xff6   :  { %5681 = vrcp.f32 %v3882_v31 }
0x1003   :  { %v5682_v7 = vpop.eup %5681 }
0x1004   :  { %v3886_v14 = vmul.f32 %v5682_v7, %v3817_v46 }
0x1064   :  { %v3889_v47 = vpop.permute.xlu1 %3888 }
0x1065   :  { %v3891_v12 = vmul.f32 %v5682_v7, %v3889_v47 }
0x1067   :  { %3893 = vrot.lane.b32.xlu0 %v3891_v12, %s5764_s1 }
0x10d9   :  { %v3894_v26 = vpop.permute.xlu0 %3893 }
0x10da   :  { %v3896_v42 = vadd.f32 %v3894_v26, %v3886_v14 }
0x10dc   :  { %5683 = vtanh.f32 %v3896_v42 }
0x10e9   :  { %v5684_v1 = vpop.eup %5683 }
0x10ea   :  { %3899 = vrot.lane.b32.xlu1 %v5684_v1, %s5763_s10 }
0x115c   :  { %v3900_v35 = vpop.permute.xlu1 %3899 }
0x115d   :  { %v7405_v55 = vmul.f32 %v5682_v7, %v3900_v35 }
0x115f   :  { %v3911_v43 = vpack.c.bf16 %v7405_v55, %v7405_v55 }
0x1161   :  { %3913 = vrot.lane.b32.xlu0 %v3911_v43, %s5764_s1 }
0x11d3   :  { %v3914_v5 = vpop.permute.xlu0 %3913 }
0x11d4   :  { %5471 = vmatmul.mubr.msk.bf16.vlgmr.msra.gmra.mxu1 %vm3512_vm2, %v3914_v5 }
0x11d5   :  { %5475 = vmatpush3.bf16.msra.mxu1 %v7306_v39  ;;  %5478 = vmatprep.mubr.msk.bf16.mxu1 %vm5760_vm1, %v7760_v41 }
0x11d6   :  { %5476 = vmatprep.subr.bf16.mxu1 %v7760_v41 }
0x11d9   :  { %5477 = vmatpush3.bf16.msra.mxu1 %v7316_v50 }
0x11da   :  { %5482 = vmatprep.subr.bf16.mxu1 %v7760_v41 }
0x1294   :  { %v3952_v25 = vpop.f32.mrf.mxu1 }
0x1295   :  { %v3958_v45 = vadd.f32 %v3952_v25, %v3910_v27 }
0x1296   :  { %v5472_v63 = vpop.f32.mrf.mxu1 }
0x1297   :  { %5685 = vtanh.f32 %v3958_v45  ;;  %v4777_v37 = vmul.f32 -1.442695, %v3958_v45  ;;  %v4163_v63 = vld [vmem:[%s7706_s11] sm:$0xff] }
0x1298   :  { %v3955_v17 = vpop.f32.mrf.mxu1 }
0x1299   :  { %5687 = vpow2.f32 %v4777_v37  ;;  %v4164_v17 = vld [vmem:[%s7706_s11 + $0x8] sm:$0xff] }
0x129a   :  { %v5473_v30 = vpop.f32.mrf.mxu1  ;;  %v4171_v37 = vpack.c.bf16 %v4164_v17, %v4163_v63 }
0x12a4   :  { %v5686_v61 = vpop.eup %5685 }
0x12a5   :  { %3968 = vrot.lane.b32.xlu1 %v5686_v61, %s5763_s10 }
0x12a6   :  { %v5688_v44 = vpop.eup %5687 }
0x12a7   :  { %v3962_v24 = vadd.f32 1.0, %v5688_v44 }
0x12a9   :  { %5689 = vrcp.f32 %v3962_v24 }
0x12b6   :  { %v5690_v22 = vpop.eup %5689 }
0x12b7   :  { %v3966_v49 = vmul.f32 %v5690_v22, %v3896_v42 }
0x1317   :  { %v3969_v21 = vpop.permute.xlu1 %3968 }
0x1318   :  { %v3971_v58 = vmul.f32 %v5690_v22, %v3969_v21 }
0x131a   :  { %3973 = vrot.lane.b32.xlu0 %v3971_v58, %s5764_s1 }
0x138c   :  { %v3974_v40 = vpop.permute.xlu0 %3973 }
0x138d   :  { %v3976_v23 = vadd.f32 %v3974_v40, %v3966_v49 }
0x138f   :  { %5691 = vtanh.f32 %v3976_v23 }
0x139c   :  { %v5692_v60 = vpop.eup %5691 }
0x139d   :  { %3979 = vrot.lane.b32.xlu1 %v5692_v60, %s5763_s10 }
0x140f   :  { %v3980_v57 = vpop.permute.xlu1 %3979 }
0x1410   :  { %v7420_v28 = vmul.f32 %v5690_v22, %v3980_v57 }
0x1412   :  { %v3991_v9 = vpack.c.bf16 %v7420_v28, %v7420_v28 }
0x1414   :  { %3993 = vrot.lane.b32.xlu0 %v3991_v9, %s5764_s1 }
0x1486   :  { %v3994_v54 = vpop.permute.xlu0 %3993 }
0x1487   :  { %5479 = vmatmul.mubr.msk.bf16.vlgmr.msra.gmra.mxu1 %vm3512_vm2, %v3994_v54 }
0x1488   :  { %5483 = vmatpush3.bf16.msra.mxu1 %v7306_v39  ;;  %5486 = vmatprep.mubr.msk.bf16.mxu1 %vm5760_vm1, %v7760_v41  ;;  %vm4257_vm1 = vcmp.lt.s32.totalorder %v6318_v62, 5 }
0x1489   :  { %5484 = vmatprep.subr.bf16.mxu1 %v7760_v41 }
0x148c   :  { %5485 = vmatpush3.bf16.msra.mxu1 %v7316_v50 }
0x1547   :  { %v4032_v33 = vpop.f32.mrf.mxu1 }
0x1548   :  { %v4038_v36 = vadd.f32 %v4032_v33, %v3990_v11 }
0x1549   :  { %v5480_v56 = vpop.f32.mrf.mxu1 }
0x154a   :  { %5693 = vtanh.f32 %v4038_v36  ;;  %v4779_v52 = vmul.f32 -1.442695, %v4038_v36  ;;  %v4782_v56 = vld [vmem:[%s7708_s12] ss:$0 sm:$0xff]  ;;  %s5765_s12 = smov 96  }
0x154b   :  { %v4035_v0 = vpop.f32.mrf.mxu1 }
0x154c   :  { %5695 = vpow2.f32 %v4779_v52 }
0x154d   :  { %v5481_v6 = vpop.f32.mrf.mxu1 }
0x1557   :  { %v5694_v10 = vpop.eup %5693 }
0x1558   :  { %4048 = vrot.lane.b32.xlu1 %v5694_v10, %s5763_s10 }
0x1559   :  { %v5696_v39 = vpop.eup %5695 }
0x155a   :  { %v4042_v8 = vadd.f32 1.0, %v5696_v39 }
0x155c   :  { %5697 = vrcp.f32 %v4042_v8 }
0x1569   :  { %v5698_v46 = vpop.eup %5697 }
0x156a   :  { %v4046_v50 = vmul.f32 %v5698_v46, %v3976_v23 }
0x15ca   :  { %v4049_v38 = vpop.permute.xlu1 %4048 }
0x15cb   :  { %v4051_v41 = vmul.f32 %v5698_v46, %v4049_v38 }
0x15cd   :  { %4053 = vrot.lane.b32.xlu0 %v4051_v41, %s5764_s1 }
0x163f   :  { %v4054_v59 = vpop.permute.xlu0 %4053 }
0x1640   :  { %v4056_v13 = vadd.f32 %v4054_v59, %v4046_v50 }
0x1642   :  { %5699 = vtanh.f32 %v4056_v13 }
0x164f   :  { %v5700_v53 = vpop.eup %5699 }
0x1650   :  { %4059 = vrot.lane.b32.xlu1 %v5700_v53, %s5763_s10 }
0x16c2   :  { %v4060_v15 = vpop.permute.xlu1 %4059 }
0x16c3   :  { %v4062_v34 = vmul.f32 %v5698_v46, %v4060_v15 }
0x16c5   :  { %v4071_v32 = vpack.c.bf16 %v4062_v34, %v4062_v34 }
0x16c7   :  { %4073 = vrot.lane.b32.xlu0 %v4071_v32, %s5764_s1 }
0x1739   :  { %v4074_v4 = vpop.permute.xlu0 %4073 }
0x173a   :  { %5487 = vmatmul.mubr.msk.bf16.vlgmr.msra.gmra.mxu1 %vm3512_vm2, %v4074_v4 }
0x17fa   :  { %v4112_v20 = vpop.f32.mrf.mxu1 }
0x17fb   :  { %v4118_v2 = vadd.f32 %v4112_v20, %v4070_v3 }
0x17fc   :  { %v5488_v51 = vpop.f32.mrf.mxu1 }
0x17fd   :  { %5701 = vtanh.f32 %v4118_v2  ;;  %v4781_v47 = vmul.f32 -1.442695, %v4118_v2 }
0x17fe   :  { %v4115_v48 = vpop.f32.mrf.mxu1 }
0x17ff   :  { %5703 = vpow2.f32 %v4781_v47 }
0x1800   :  { %v5489_v31 = vpop.f32.mrf.mxu1 }
0x180a   :  { %v5702_v7 = vpop.eup %5701 }
0x180b   :  { %4128 = vrot.lane.b32.xlu1 %v5702_v7, %s5763_s10 }
0x180c   :  { %v5704_v12 = vpop.eup %5703 }
0x180d   :  { %v4122_v14 = vadd.f32 1.0, %v5704_v12 }
0x180f   :  { %5705 = vrcp.f32 %v4122_v14 }
0x181c   :  { %v5706_v26 = vpop.eup %5705 }
0x181d   :  { %v4126_v35 = vmul.f32 %v5706_v26, %v4056_v13 }
0x187d   :  { %v4129_v42 = vpop.permute.xlu1 %4128 }
0x187e   :  { %v4131_v1 = vmul.f32 %v5706_v26, %v4129_v42 }
0x1880   :  { %4133 = vrot.lane.b32.xlu0 %v4131_v1, %s5764_s1 }
0x1884   :  { %3586 = vrot.lane.b32.xlu0 %v7345_v16, %s5764_s1  ;;  %v4165_v16 = vld [vmem:[%s7706_s11 + $0x10] sm:$0xff] }
0x1888   :  { %3745 = vrot.lane.b32.xlu0 %v7375_v18, %s5764_s1  ;;  %v4166_v18 = vld [vmem:[%s7706_s11 + $0x18] sm:$0xff] }
0x1889   :  { %v4172_v45 = vpack.c.bf16 %v4166_v18, %v4165_v16 }
0x188b   :  { %5490 = vmatprep.subr.bf16.mxu1 %v4172_v45 }
0x188c   :  { %3904 = vrot.lane.b32.xlu0 %v7405_v55, %s5764_s1  ;;  %5491 = vmatpush3.bf16.msra.mxu1 %v4172_v45 }
0x188d   :  { %5492 = vmatprep.subr.bf16.mxu1 %v4171_v37 }
0x1890   :  { %4064 = vrot.lane.b32.xlu0 %v4062_v34, %s5764_s1  ;;  %5493 = vmatpush3.bf16.msra.mxu1 %v4171_v37 }
0x18f2   :  { %v4134_v43 = vpop.permute.xlu0 %4133 }
0x18f3   :  { %v7445_v5 = vadd.f32 %v4134_v43, %v4126_v35 }
0x18f5   :  { %5707 = vtanh.f32 %v7445_v5 }
0x18f6   :  { %v3587_v27 = vpop.permute.xlu0 %3586 }
0x18f7   :  { %3589 = vst.msk [vmem:[#allocation3] sm:$0xff] %vm3512_vm2, %v3587_v27 }
0x18fa   :  { %v3746_v25 = vpop.permute.xlu0 %3745 }
0x18fb   :  { %3749 = vst.msk [vmem:[#allocation3 + $0x10] sm:$0xff] %vm3512_vm2, %v3746_v25 }
0x18fe   :  { %v3905_v55 = vpop.permute.xlu0 %3904  ;;  %v4155_v49 = vld [vmem:[#allocation3] sm:$0xff] }
0x18ff   :  { %3908 = vst.msk [vmem:[#allocation3 + $0x20] sm:$0xff] %vm3512_vm2, %v3905_v55 }
0x1902   :  { %v5708_v30 = vpop.eup %5707  ;;  %v4065_v61 = vpop.permute.xlu0 %4064 }
0x1903   :  { %4068 = vst.msk [vmem:[#allocation3 + $0x30] sm:$0xff] %vm3512_vm2, %v4065_v61  ;;  %4139 = vrot.lane.b32.xlu1 %v5708_v30, %s5763_s10 }
0x1906   :  { %v4159_v57 = vld [vmem:[#allocation3 + $0x20] sm:$0xff] }
0x1907   :  { %3665 = vrot.lane.b32.xlu1 %v7360_v29, %s5764_s1 }
0x190a   :  { %v4161_v11 = vld [vmem:[#allocation3 + $0x30] sm:$0xff] }
0x190b   :  { %3825 = vrot.lane.b32.xlu1 %v7390_v19, %s5764_s1  ;;  %v4157_v19 = vld [vmem:[#allocation3 + $0x10] sm:$0xff] }
0x190f   :  { %3984 = vrot.lane.b32.xlu1 %v7420_v28, %s5764_s1 }
0x1975   :  { %v4140_v44 = vpop.permute.xlu1 %4139 }
0x1976   :  { %v4142_v24 = vmul.f32 %v5706_v26, %v4140_v44 }
0x1978   :  { %4144 = vrot.lane.b32.xlu1 %v4142_v24, %s5764_s1 }
0x1979   :  { %v3666_v22 = vpop.permute.xlu1 %3665 }
0x197a   :  { %3669 = vst.msk [vmem:[#allocation3 + $0x8] sm:$0xff] %vm3512_vm2, %v3666_v22 }
0x197d   :  { %v3826_v21 = vpop.permute.xlu1 %3825 }
0x197e   :  { %3829 = vst.msk [vmem:[#allocation3 + $0x18] sm:$0xff] %vm3512_vm2, %v3826_v21 }
0x1981   :  { %v3985_v58 = vpop.permute.xlu1 %3984  ;;  %v4156_v40 = vld [vmem:[#allocation3 + $0x8] sm:$0xff] }
0x1982   :  { %3988 = vst.msk [vmem:[#allocation3 + $0x28] sm:$0xff] %vm3512_vm2, %v3985_v58  ;;  %v4167_v29 = vpack.c.bf16 %v4156_v40, %v4155_v49 }
0x1984   :  { %5494 = vmatprep.mubr.msk.bf16.mxu1 %vm3512_vm2, %v4167_v29 }
0x1985   :  { %v4158_v23 = vld [vmem:[#allocation3 + $0x18] sm:$0xff] }
0x1986   :  { %v4168_v60 = vpack.c.bf16 %v4158_v23, %v4157_v19 }
0x1988   :  { %5495 = vmatmul.mubr.msk.bf16.vlgmr.msra.gmra.mxu1 %vm3512_vm2, %v4168_v60 }
0x1989   :  { %v4160_v28 = vld [vmem:[#allocation3 + $0x28] sm:$0xff] }
0x198a   :  { %v4169_v9 = vpack.c.bf16 %v4160_v28, %v4159_v57 }
0x198c   :  { %5498 = vmatprep.mubr.msk.bf16.mxu1 %vm3512_vm2, %v4169_v9 }
0x19ea   :  { %v4145_v54 = vpop.permute.xlu1 %4144 }
0x19eb   :  { %4148 = vst.msk [vmem:[#allocation3 + $0x38] sm:$0xff] %vm3512_vm2, %v4145_v54  ;;  %4149 = vst.msk [vmem:[%s7707_s16] sm:$0xff] %vm3512_vm2, %v4145_v54 }
0x19f2   :  { %v4162_v33 = vld [vmem:[#allocation3 + $0x38] sm:$0xff] }
0x19f3   :  { %v4170_v36 = vpack.c.bf16 %v4162_v33, %v4161_v11 }
0x19f5   :  { %5499 = vmatmul.mubr.msk.bf16.gmra.mxu1 %vm3512_vm2, %v4170_v36 }
0x1a48   :  { %v5496_v0 = vpop.f32.mrf.mxu1 }
0x1a49   :  { %v7487_v6 = vadd.f32 %v5496_v0, %v4782_v56 }
0x1a4a   :  { %v4226_v10 = vpop.f32.mrf.mxu1 }
0x1a4b   :  { %v7489_v52 = vadd.f32 %v4782_v56, %v4226_v10  ;;  %v4263_v41 = vmax.f32 %v7487_v6, 1e-08  ;;  %vm4367_vm4 = vcmp.gt.f32.partialorder %v7487_v6, 0.0 }
0x1a4c   :  { %v5497_v39 = vpop.f32.mrf.mxu1 }
0x1a4d   :  { %v7491_v8 = vadd.f32 %v5497_v39, %v4782_v56  ;;  %v4261_v38 = vmax.f32 %v7489_v52, 1e-08  ;;  %v4271_v15 = vmin.f32 %v4263_v41, 1.0  ;;  %vm4365_vm5 = vcmp.gt.f32.partialorder %v7489_v52, 0.0 }
0x1a4e   :  { %v4229_v46 = vpop.f32.mrf.mxu1 }
0x1a4f   :  { %v7495_v50 = vadd.f32 %v4782_v56, %v4229_v46  ;;  %v4269_v59 = vmin.f32 %v4261_v38, 1.0  ;;  %v4264_v34 = vmax.f32 %v7491_v8, 1e-08  ;;  %v4279_v3 = vsel %vm4257_vm1, %v4271_v15, 0.0 }
0x1a50   :  { %vm4368_vm9 = vcmp.gt.f32.partialorder %v7491_v8, 0.0 }
0x1a51   :  { %v4277_v13 = vsel %vm4257_vm1, %v4269_v59, 0.0  ;;  %v4262_v53 = vmax.f32 %v7495_v50, 1e-08  ;;  %v4272_v20 = vmin.f32 %v4264_v34, 1.0  ;;  %vm4366_vm7 = vcmp.gt.f32.partialorder %v7495_v50, 0.0 }
0x1a52   :  { %4285 = vmax.xlane.f32.xlu0 %v4277_v13 }
0x1a53   :  { %v4270_v32 = vmin.f32 %v4262_v53, 1.0  ;;  %v4280_v2 = vsel %vm4257_vm1, %v4272_v20, 0.0 }
0x1a55   :  { %v4278_v4 = vsel %vm4257_vm1, %v4270_v32, 0.0 }
0x1a56   :  { %4287 = vmax.xlane.f32.xlu1 %v4278_v4  ;;  %4289 = vmax.xlane.f32.xlu0 %v4279_v3 }
0x1a5a   :  { %4291 = vmax.xlane.f32.xlu0 %v4280_v2 }
0x1ab5   :  { %v5500_v51 = vpop.f32.mrf.mxu1 }
0x1ab6   :  { %v7508_v48 = vadd.f32 %v5500_v51, %v4782_v56 }
0x1ab7   :  { %v4242_v31 = vpop.f32.mrf.mxu1 }
0x1ab8   :  { %v7510_v7 = vadd.f32 %v4782_v56, %v4242_v31  ;;  %v4267_v42 = vmax.f32 %v7508_v48, 1e-08  ;;  %vm4371_vm10 = vcmp.gt.f32.partialorder %v7508_v48, 0.0 }
0x1ab9   :  { %v5501_v47 = vpop.f32.mrf.mxu1 }
0x1aba   :  { %v7512_v12 = vadd.f32 %v5501_v47, %v4782_v56  ;;  %v4265_v26 = vmax.f32 %v7510_v7, 1e-08  ;;  %v4275_v27 = vmin.f32 %v4267_v42, 1.0  ;;  %v4373_v47 = vmin.f32 %v7489_v52, 0.0 }
0x1abb   :  { %v4245_v14 = vpop.f32.mrf.mxu1  ;;  %v4375_v42 = vmin.f32 %v7487_v6, 0.0  ;;  %vm4369_vm12 = vcmp.gt.f32.partialorder %v7510_v7, 0.0 }
0x1abc   :  { %v7516_v1 = vadd.f32 %v4782_v56, %v4245_v14  ;;  %v4273_v35 = vmin.f32 %v4265_v26, 1.0  ;;  %v4268_v16 = vmax.f32 %v7512_v12, 1e-08  ;;  %v4283_v55 = vsel %vm4257_vm1, %v4275_v27, 0.0 }
0x1abd   :  { %v4381_v14 = vmul.f32 1.442695, %v4373_v47  ;;  %v4374_v26 = vmin.f32 %v7495_v50, 0.0  ;;  %vm4372_vm13 = vcmp.gt.f32.partialorder %v7512_v12, 0.0 }
0x1abe   :  { %v4281_v43 = vsel %vm4257_vm1, %v4273_v35, 0.0  ;;  %v4266_v25 = vmax.f32 %v7516_v1, 1e-08  ;;  %v4276_v63 = vmin.f32 %v4268_v16, 1.0  ;;  %vm4370_vm11 = vcmp.gt.f32.partialorder %v7516_v1, 0.0 }
0x1abf   :  { %4293 = vmax.xlane.f32.xlu1 %v4281_v43  ;;  %v4383_v43 = vmul.f32 1.442695, %v4374_v26 }
0x1ac0   :  { %v4274_v18 = vmin.f32 %v4266_v25, 1.0  ;;  %v4284_v17 = vsel %vm4257_vm1, %v4276_v63, 0.0 }
0x1ac2   :  { %v4282_v45 = vsel %vm4257_vm1, %v4274_v18, 0.0 }
0x1ac3   :  { %4297 = vmax.xlane.f32.xlu1 %v4283_v55  ;;  %4295 = vmax.xlane.f32.xlu0 %v4282_v45 }
0x1ac7   :  { %4299 = vmax.xlane.f32.xlu0 %v4284_v17 }
0x1adb   :  { %v4286_v30 = vpop.xlane.xlu0 %4285 }
0x1adc   :  { %v4301_v61 = vsub.f32 %v4269_v59, %v4286_v30 }
0x1ade   :  { %v4309_v37 = vmul.f32 1.442695, %v4301_v61 }
0x1adf   :  { %v4288_v44 = vpop.xlane.xlu1 %4287  ;;  %v4290_v24 = vpop.xlane.xlu0 %4289 }
0x1ae0   :  { %5709 = vpow2.f32 %v4309_v37  ;;  %v4302_v22 = vsub.f32 %v4270_v32, %v4288_v44  ;;  %v4303_v21 = vsub.f32 %v4271_v15, %v4290_v24 }
0x1ae2   :  { %v4311_v58 = vmul.f32 1.442695, %v4302_v22  ;;  %v4313_v49 = vmul.f32 1.442695, %v4303_v21 }
0x1ae3   :  { %v4292_v40 = vpop.xlane.xlu0 %4291 }
0x1ae4   :  { %5711 = vpow2.f32 %v4311_v58  ;;  %v4304_v29 = vsub.f32 %v4272_v20, %v4292_v40 }
0x1ae5   :  { %5713 = vpow2.f32 %v4313_v49 }
0x1ae6   :  { %v4315_v19 = vmul.f32 1.442695, %v4304_v29 }
0x1ae8   :  { %5715 = vpow2.f32 %v4315_v19 }
0x1aed   :  { %v5710_v23 = vpop.eup %5709 }
0x1aee   :  { %v7530_v60 = vsel %vm4257_vm1, %v5710_v23, 0.0 }
0x1aef   :  { %4333 = vadd.xlane.f32.xlu1 %v7530_v60 }
0x1af1   :  { %v5712_v57 = vpop.eup %5711 }
0x1af2   :  { %v5714_v28 = vpop.eup %5713  ;;  %v7535_v9 = vsel %vm4257_vm1, %v5712_v57, 0.0 }
0x1af3   :  { %4335 = vadd.xlane.f32.xlu0 %v7535_v9  ;;  %v7540_v54 = vsel %vm4257_vm1, %v5714_v28, 0.0 }
0x1af4   :  { %4337 = vadd.xlane.f32.xlu1 %v7540_v54 }
0x1af5   :  { %v5716_v11 = vpop.eup %5715 }
0x1af6   :  { %v7545_v33 = vsel %vm4257_vm1, %v5716_v11, 0.0 }
0x1af7   :  { %4339 = vadd.xlane.f32.xlu0 %v7545_v33 }
0x1b48   :  { %v4294_v36 = vpop.xlane.xlu1 %4293 }
0x1b49   :  { %v4305_v56 = vsub.f32 %v4273_v35, %v4294_v36  ;;  %v4376_v35 = vmin.f32 %v7491_v8, 0.0 }
0x1b4b   :  { %v4317_v38 = vmul.f32 1.442695, %v4305_v56  ;;  %v4387_v25 = vmul.f32 1.442695, %v4376_v35 }
0x1b4c   :  { %v4298_v0 = vpop.xlane.xlu1 %4297  ;;  %v4296_v10 = vpop.xlane.xlu0 %4295 }
0x1b4d   :  { %v4307_v39 = vsub.f32 %v4275_v27, %v4298_v0  ;;  %v4306_v46 = vsub.f32 %v4274_v18, %v4296_v10  ;;  %v4385_v27 = vmul.f32 1.442695, %v4375_v42 }
0x1b4f   :  { %v4321_v41 = vmul.f32 1.442695, %v4307_v39  ;;  %v4319_v59 = vmul.f32 1.442695, %v4306_v46 }
0x1b50   :  { %v4300_v13 = vpop.xlane.xlu0 %4299 }
0x1b51   :  { %5717 = vpow2.f32 %v4321_v41  ;;  %v4308_v53 = vsub.f32 %v4276_v63, %v4300_v13 }
0x1b52   :  { %5719 = vpow2.f32 %v4319_v59 }
0x1b53   :  { %5721 = vpow2.f32 %v4317_v38  ;;  %v4323_v15 = vmul.f32 1.442695, %v4308_v53 }
0x1b55   :  { %5723 = vpow2.f32 %v4323_v15 }
0x1b56   :  { %5725 = vpow2.f32 %v4381_v14 }
0x1b57   :  { %5727 = vpow2.f32 %v4383_v43 }
0x1b58   :  { %5729 = vpow2.f32 %v4385_v27 }
0x1b59   :  { %5731 = vpow2.f32 %v4387_v25 }
0x1b5e   :  { %v5718_v34 = vpop.eup %5717 }
0x1b5f   :  { %v5720_v32 = vpop.eup %5719  ;;  %v7550_v4 = vsel %vm4257_vm1, %v5718_v34, 0.0  ;;  %v4378_v34 = vmin.f32 %v7516_v1, 0.0 }
0x1b60   :  { %v5722_v3 = vpop.eup %5721  ;;  %4345 = vadd.xlane.f32.xlu1 %v7550_v4  ;;  %v7555_v20 = vsel %vm4257_vm1, %v5720_v32, 0.0 }
0x1b61   :  { %4343 = vadd.xlane.f32.xlu0 %v7555_v20  ;;  %v7560_v51 = vsel %vm4257_vm1, %v5722_v3, 0.0  ;;  %v4380_v3 = vmin.f32 %v7512_v12, 0.0 }
0x1b62   :  { %v5724_v2 = vpop.eup %5723 }
0x1b63   :  { %v7564_v31 = vsel %vm4257_vm1, %v5724_v2, 0.0  ;;  %v5726_v18 = vpop.eup %5725  ;;  %v4391_v2 = vmul.f32 1.442695, %v4378_v34  ;;  %v4395_v14 = vmul.f32 1.442695, %v4380_v3 }
0x1b64   :  { %4341 = vadd.xlane.f32.xlu1 %v7560_v51  ;;  %v4787_v45 = vadd.f32 -1.0, %v5726_v18  ;;  %v5728_v17 = vpop.eup %5727 }
0x1b65   :  { %4347 = vadd.xlane.f32.xlu0 %v7564_v31  ;;  %v5730_v30 = vpop.eup %5729  ;;  %v4788_v44 = vadd.f32 -1.0, %v5728_v17 }
0x1b66   :  { %v4405_v37 = vsel %vm4365_vm5, %v7489_v52, %v4787_v45  ;;  %v5732_v24 = vpop.eup %5731  ;;  %v4789_v22 = vadd.f32 -1.0, %v5730_v30 }
0x1b67   :  { %v4790_v21 = vadd.f32 -1.0, %v5732_v24  ;;  %v4406_v58 = vsel %vm4366_vm7, %v7495_v50, %v4788_v44 }
0x1b68   :  { %v4407_v40 = vsel %vm4367_vm4, %v7487_v6, %v4789_v22  ;;  %v4414_v57 = vadd.f32 1.0, %v4406_v58 }
0x1b69   :  { %v4415_v28 = vadd.f32 1.0, %v4407_v40  ;;  %v4408_v11 = vsel %vm4368_vm9, %v7491_v8, %v4790_v21 }
0x1b6a   :  { %v4422_v39 = vsel %vm7583_vm8, %v4414_v57, %v7495_v50 }
0x1b6b   :  { %v4423_v38 = vsel %vm7583_vm8, %v4415_v28, %v7487_v6 }
0x1b75   :  { %4151 = vrot.lane.b32.xlu1 %v7445_v5, %s5765_s12  ;;  %v4413_v5 = vadd.f32 1.0, %v4405_v37 }
0x1b77   :  { %v4421_v23 = vsel %vm7583_vm8, %v4413_v5, %v7489_v52 }
0x1b78   :  { %v4334_v16 = vpop.xlane.xlu1 %4333 }
0x1b79   :  { %5733 = vrcp.f32 %v4334_v16 }
0x1b7c   :  { %v4336_v55 = vpop.xlane.xlu0 %4335 }
0x1b7d   :  { %v4338_v63 = vpop.xlane.xlu1 %4337  ;;  %5735 = vrcp.f32 %v4336_v55 }
0x1b7e   :  { %5737 = vrcp.f32 %v4338_v63 }
0x1b80   :  { %v4340_v61 = vpop.xlane.xlu0 %4339 }
0x1b81   :  { %5739 = vrcp.f32 %v4340_v61 }
0x1b86   :  { %v5734_v49 = vpop.eup %5733 }
0x1b87   :  { %v4357_v19 = vmul.f32 %v5734_v49, %v7530_v60  ;;  %v4416_v60 = vadd.f32 1.0, %v4408_v11 }
0x1b89   :  { %v4429_v36 = vsel %vm4257_vm1, %v4357_v19, %v4421_v23  ;;  %v4424_v6 = vsel %vm7583_vm8, %v4416_v60, %v7491_v8  ;;  %v4377_v8 = vmin.f32 %v7510_v7, 0.0 }
0x1b8a   :  { %v5736_v56 = vpop.eup %5735  ;;  %v4437_v0 = vsel %vm4259_vm6, %v4429_v36, 0.0 }
0x1b8b   :  { %v5738_v10 = vpop.eup %5737  ;;  %4445 = vst [vmem:[%s7709_s15] sm:$0xff] %v4437_v0  ;;  %v4358_v52 = vmul.f32 %v5736_v56, %v7535_v9  ;;  %v4389_v47 = vmul.f32 1.442695, %v4377_v8 }
0x1b8c   :  { %v4359_v46 = vmul.f32 %v5738_v10, %v7540_v54 }
0x1b8d   :  { %v4430_v41 = vsel %vm4257_vm1, %v4358_v52, %v4422_v39 }
0x1b8e   :  { %v5740_v59 = vpop.eup %5739  ;;  %v4431_v13 = vsel %vm4257_vm1, %v4359_v46, %v4423_v38  ;;  %v4438_v9 = vsel %vm4259_vm6, %v4430_v41, 0.0 }
0x1b8f   :  { %v4439_v53 = vsel %vm4259_vm6, %v4431_v13, 0.0  ;;  %4446 = vst [vmem:[%s7709_s15 + $0x8] sm:$0xff] %v4438_v9  ;;  %v4360_v50 = vmul.f32 %v5740_v59, %v7545_v33  ;;  %v4379_v33 = vmin.f32 %v7508_v48, 0.0 }
0x1b90   :  { %4447 = vst [vmem:[%s7709_s15 + $0x10] sm:$0xff] %v4439_v53 }
0x1b91   :  { %v4432_v54 = vsel %vm4257_vm1, %v4360_v50, %v4424_v6  ;;  %v4393_v32 = vmul.f32 1.442695, %v4379_v33 }
0x1b92   :  { %v4440_v15 = vsel %vm4259_vm6, %v4432_v54, 0.0 }
0x1b93   :  { %4448 = vst [vmem:[%s7709_s15 + $0x18] sm:$0xff] %v4440_v15  ;;  %5741 = vpow2.f32 %v4393_v32 }
0x1b94   :  { %5743 = vpow2.f32 %v4391_v2 }
0x1b95   :  { %5745 = vpow2.f32 %v4389_v47 }
0x1b96   :  { %5747 = vpow2.f32 %v4395_v14 }
0x1ba0   :  { %v5742_v35 = vpop.eup %5741 }
0x1ba1   :  { %v5744_v43 = vpop.eup %5743  ;;  %v4793_v25 = vadd.f32 -1.0, %v5742_v35 }
0x1ba2   :  { %v5746_v18 = vpop.eup %5745  ;;  %v4792_v55 = vadd.f32 -1.0, %v5744_v43 }
0x1ba3   :  { %v5748_v45 = vpop.eup %5747  ;;  %v4411_v17 = vsel %vm4371_vm10, %v7508_v48, %v4793_v25  ;;  %v4791_v30 = vadd.f32 -1.0, %v5746_v18 }
0x1ba4   :  { %v4794_v61 = vadd.f32 -1.0, %v5748_v45  ;;  %v4410_v37 = vsel %vm4370_vm11, %v7516_v1, %v4792_v55  ;;  %v4419_v44 = vadd.f32 1.0, %v4411_v17 }
0x1ba5   :  { %v4409_v24 = vsel %vm4369_vm12, %v7510_v7, %v4791_v30  ;;  %v4418_v22 = vadd.f32 1.0, %v4410_v37 }
0x1ba6   :  { %v4412_v21 = vsel %vm4372_vm13, %v7512_v12, %v4794_v61  ;;  %v4427_v40 = vsel %vm7583_vm8, %v4419_v44, %v7508_v48  ;;  %v4417_v19 = vadd.f32 1.0, %v4409_v24 }
0x1ba7   :  { %v4420_v57 = vadd.f32 1.0, %v4412_v21  ;;  %v4426_v28 = vsel %vm7583_vm8, %v4418_v22, %v7516_v1 }
0x1ba9   :  { %v4428_v52 = vsel %vm7583_vm8, %v4420_v57, %v7512_v12 }
0x1be9   :  { %v4346_v26 = vpop.xlane.xlu1 %4345 }
0x1bea   :  { %5749 = vrcp.f32 %v4346_v26  ;;  %v4344_v42 = vpop.xlane.xlu0 %4343 }
0x1beb   :  { %5751 = vrcp.f32 %v4344_v42 }
0x1bed   :  { %v4342_v27 = vpop.xlane.xlu1 %4341 }
0x1bee   :  { %5753 = vrcp.f32 %v4342_v27  ;;  %v4348_v16 = vpop.xlane.xlu0 %4347 }
0x1bef   :  { %5755 = vrcp.f32 %v4348_v16 }
0x1bf1   :  { %v4152_v63 = vpop.permute.xlu1 %4151 }
0x1bf2   :  { %4154 = vst.msk [vmem:[%s7710_s17] sm:$0xff] %vm3512_vm2, %v4152_v63 }
0x1bf7   :  { %v5750_v5 = vpop.eup %5749 }
0x1bf8   :  { %v5752_v58 = vpop.eup %5751  ;;  %v4363_v49 = vmul.f32 %v5750_v5, %v7550_v4 }
0x1bf9   :  { %v4362_v23 = vmul.f32 %v5752_v58, %v7555_v20  ;;  %v4425_v20 = vsel %vm7583_vm8, %v4417_v19, %v7510_v7 }
0x1bfa   :  { %v4435_v11 = vsel %vm4257_vm1, %v4363_v49, %v4427_v40 }
0x1bfb   :  { %v5754_v36 = vpop.eup %5753  ;;  %v4443_v56 = vsel %vm4259_vm6, %v4435_v11, 0.0  ;;  %v4434_v4 = vsel %vm4257_vm1, %v4362_v23, %v4426_v28 }
0x1bfc   :  { %v5756_v0 = vpop.eup %5755  ;;  %4451 = vst [vmem:[%s7709_s15 + $0x30] sm:$0xff] %v4443_v56  ;;  %v4442_v48 = vsel %vm4259_vm6, %v4434_v4, 0.0  ;;  %v4361_v1 = vmul.f32 %v5754_v36, %v7560_v51 }
0x1bfd   :  { %4450 = vst [vmem:[%s7709_s15 + $0x28] sm:$0xff] %v4442_v48  ;;  %v4364_v10 = vmul.f32 %v5756_v0, %v7564_v31 }
0x1bfe   :  { %v4433_v60 = vsel %vm4257_vm1, %v4361_v1, %v4425_v20 }
0x1bff   :  { %v4441_v51 = vsel %vm4259_vm6, %v4433_v60, 0.0  ;;  %v4436_v39 = vsel %vm4257_vm1, %v4364_v10, %v4428_v52 }
0x1c00   :  { %4449 = vst [vmem:[%s7709_s15 + $0x20] sm:$0xff] %v4441_v51  ;;  %v4444_v7 = vsel %vm4259_vm6, %v4436_v39, 0.0 }
0x1c01   :  { %4452 = vst [vmem:[%s7709_s15 + $0x38] sm:$0xff] %v4444_v7 }

</bundles_post_ra>
